<compile_context>
chip_gen: v6e
topology: v6e:2x2x1
jax: 0.10.0
libtpu: 0.0.40
codegen_flags: <defaults>
</compile_context>

<pallas_src>
import functools
import math

import jax
import jax.numpy as jnp
import numpy as np
from jax import lax
from jax.experimental import pallas as pl
from jax.experimental.pallas import tpu as pltpu


def _round_up(a, m):
    return ((a + m - 1) // m) * m


def _inv_res_kernel(x_ref, w1_ref, wdw_ref, w3_ref, o_ref, y1_ref, dw_ref, *,
                    h, w, cin, chid_p, cout, k, stride, pad, ho, wo,
                    top, left, residual, row_block):
    """One batch element per grid step.

    x_ref  : (1, s, H, W//s, Cin)   input, W-phase-factored (s2d in wrapper)
    w1_ref : (Cin, Chid_p)          expand 1x1 weights (Chid zero-padded)
    wdw_ref: (K*K, Chid_p)          depthwise weights, tap-major/channel-last
    w3_ref : (Chid_p, Cout)         project 1x1 weights (zero-padded rows)
    o_ref  : (1, Ho, Wo*Cout)       lane-dense output (reshaped in wrapper)
    y1_ref : (Hq, s, Wq, s*Chid_p)  staging: zero-halo, phase-factored expand
    dw_ref : (Ho, Wo, Chid_p)       staging: depthwise output
    """
    s = stride
    wq_in = w // s
    hq = y1_ref.shape[0]
    wq = y1_ref.shape[2]
    t0, t1 = top // s, top // s + h // s      # interior rows in scratch
    l0, l1 = left // s, left // s + wq_in     # interior cols in scratch

    # ---- 0) zero ONLY the halo strips (interior fully overwritten below).
    # Re-done every grid step so it is correct no matter which core runs this
    # step (VMEM scratch is per-core & persistent across grid iterations).
    if t0 > 0:
        y1_ref[0:t0, :, :, :] = jnp.zeros(
            (t0, s, wq, y1_ref.shape[3]), y1_ref.dtype)
    if t1 < hq:
        y1_ref[t1:hq, :, :, :] = jnp.zeros(
            (hq - t1, s, wq, y1_ref.shape[3]), y1_ref.dtype)
    if l0 > 0:
        y1_ref[t0:t1, :, 0:l0, :] = jnp.zeros(
            (t1 - t0, s, l0, y1_ref.shape[3]), y1_ref.dtype)
    if l1 < wq:
        y1_ref[t0:t1, :, l1:wq, :] = jnp.zeros(
            (t1 - t0, s, wq - l1, y1_ref.shape[3]), y1_ref.dtype)

    # ---- 1) expand 1x1 conv + ReLU6: ONE tall MXU matmul (bf16 x bf16) -----
    x_all = x_ref[0].reshape(s * h * wq_in, cin)          # native (bf16) dtype
    y_all = jnp.dot(x_all, w1_ref[...], preferred_element_type=jnp.float32)
    y_all = jnp.clip(y_all, 0.0, 6.0).astype(y1_ref.dtype)
    y_all = y_all.reshape(s, h // s, s, wq_in, chid_p)
    for r in range(s):                                    # per-W-phase store
        y1_ref[t0:t1, :, l0:l1, r * chid_p:(r + 1) * chid_p] = y_all[r]

    # ---- 2) depthwise KxK stride-s conv + ReLU6 (pure VPU) -----------------
    # Chunk (row_block, Wo, 128) accumulates in vregs across all K*K taps with
    # f32 accumulation; one store per chunk into the dw staging buffer.
    wdw_f32 = wdw_ref[...].astype(jnp.float32)            # hoisted tap load
    for r0 in range(0, ho, row_block):
        rb = min(row_block, ho - r0)
        for cb in range(0, chid_p, 128):
            acc = None
            for i in range(k):
                a = top - pad + i
                for j in range(k):
                    b = left - pad + j
                    win = y1_ref[a // s + r0: a // s + r0 + rb, a % s,
                                 b // s: b // s + wo,
                                 (b % s) * chid_p + cb:
                                 (b % s) * chid_p + cb + 128]   # (rb, wo, 128)
                    tap = wdw_f32[i * k + j, cb:cb + 128].reshape(1, 1, 128)
                    term = win.astype(jnp.float32) * tap
                    acc = term if acc is None else acc + term
            acc = jnp.clip(acc, 0.0, 6.0)
            dw_ref[r0:r0 + rb, :, cb:cb + 128] = acc.astype(dw_ref.dtype)

    # ---- 3) project 1x1 conv: single MXU matmul (bf16 LHS, f32 acc) --------
    out = jnp.dot(dw_ref[...].reshape(ho * wo, chid_p), w3_ref[...],
                  preferred_element_type=jnp.float32)      # (Ho*Wo, Cout)

    # ---- 4) residual add (static flag; implies s == 1, Cin == Cout) --------
    if residual:
        out = out + x_ref[0, 0].reshape(h * w, cin).astype(jnp.float32)

    # ---- 5) lane-dense store: last dim = Wo*Cout ---------------------------
    o_ref[...] = out.astype(o_ref.dtype).reshape(1, ho, wo * cout)


def inverted_residual_block(x_nhwc, w_expand_oihw, w_dw_oihw, w_project_oihw,
                            *, stride):
    """Pallas forward of InvertedResidualBlock.  x is NHWC.

    w_expand_oihw  : (Chid, Cin, 1, 1)   -- nn.Conv2d(in, hidden, 1, bias=False)
    w_dw_oihw      : (Chid, 1, K, K)     -- depthwise conv, groups=hidden
    w_project_oihw : (Cout, Chid, 1, 1)  -- nn.Conv2d(hidden, out, 1, bias=False)
    """
    n, h, w, cin = x_nhwc.shape
    chid = w_expand_oihw.shape[0]
    assert w_expand_oihw.shape[1] == cin
    k = w_dw_oihw.shape[-1]
    assert w_dw_oihw.shape[0] == chid
    cout = w_project_oihw.shape[0]
    assert w_project_oihw.shape[1] == chid

    s = stride
    pad = k // 2
    assert h % s == 0 and w % s == 0, "spatial dims must be divisible by stride"
    ho = (h + 2 * pad - k) // s + 1
    wo = (w + 2 * pad - k) // s + 1
    residual = (s == 1 and cin == cout)
    wq_in = w // s
    chid_p = _round_up(chid, 128)            # 128-aligned hidden channels

    # ---- layout glue (all cheap): W-space-to-depth, weight repacks + pad ---
    x_ph = x_nhwc.reshape(n, h, wq_in, s, cin)
    x_ph = jnp.transpose(x_ph, (0, 3, 1, 2, 4))            # (N, s, H, W//s, Cin)

    w1 = jnp.transpose(w_expand_oihw[:, :, 0, 0])          # (Cin, Chid)
    wdw = jnp.transpose(w_dw_oihw[:, 0], (1, 2, 0)).reshape(k * k, chid)
    w3 = jnp.transpose(w_project_oihw[:, :, 0, 0])         # (Chid, Cout)
    if chid_p != chid:
        w1 = jnp.pad(w1, ((0, 0), (0, chid_p - chid)))
        wdw = jnp.pad(wdw, ((0, 0), (0, chid_p - chid)))
        w3 = jnp.pad(w3, ((0, chid_p - chid), (0, 0)))

    # ---- scratch geometry: padded expand output, phase-factored by stride --
    top = _round_up(pad, s)
    left = _round_up(pad, s)
    hr = _round_up(max(top - pad + (k - 1) + s * (ho - 1) + 1, top + h), s)
    wr = _round_up(max(left - pad + (k - 1) + s * (wo - 1) + 1, left + w), s)
    hq, wq = hr // s, wr // s

    stage_dtype = x_nhwc.dtype               # bf16 inputs -> bf16 staging
    row_block = max(1, min(8, ho, max(1, 128 // wo)))

    # ---- explicit VMEM budget ----------------------------------------------
    itm = jnp.dtype(x_nhwc.dtype).itemsize
    wtm = jnp.dtype(w1.dtype).itemsize
    stm = jnp.dtype(stage_dtype).itemsize
    vmem_est = (
        2 * (s * h * wq_in * cin) * itm                       # in block (x2)
        + 2 * (cin * chid_p + k * k * chid_p + chid_p * cout) * wtm
        + 2 * (ho * wo * cout) * itm                          # out block (x2)
        + hq * s * wq * s * chid_p * stm                      # y1 scratch
        + ho * wo * chid_p * stm                              # dw scratch
        + (h * w * chid_p + ho * wo * cout) * 4               # f32 matmul temps
        + (4 << 20))                                          # headroom
    vmem_limit = int(min(max(vmem_est, 32 << 20), 64 << 20))

    kernel = functools.partial(
        _inv_res_kernel, h=h, w=w, cin=cin, chid_p=chid_p, cout=cout, k=k,
        stride=s, pad=pad, ho=ho, wo=wo, top=top, left=left,
        residual=residual, row_block=row_block)

    out_flat = pl.pallas_call(
        kernel,
        out_shape=jax.ShapeDtypeStruct((n, ho, wo * cout), x_nhwc.dtype),
        grid_spec=pltpu.PrefetchScalarGridSpec(
            num_scalar_prefetch=0,
            grid=(n,),
            in_specs=[
                pl.BlockSpec((1, s, h, wq_in, cin), lambda b: (b, 0, 0, 0, 0)),
                pl.BlockSpec((cin, chid_p), lambda b: (0, 0)),
                pl.BlockSpec((k * k, chid_p), lambda b: (0, 0)),
                pl.BlockSpec((chid_p, cout), lambda b: (0, 0)),
            ],
            out_specs=pl.BlockSpec((1, ho, wo * cout), lambda b: (b, 0, 0)),
            scratch_shapes=[
                pltpu.VMEM((hq, s, wq, s * chid_p), stage_dtype),
                pltpu.VMEM((ho, wo, chid_p), stage_dtype),
            ]),
        compiler_params=pltpu.CompilerParams(
            dimension_semantics=("parallel",),
            vmem_limit_bytes=vmem_limit),
    )(x_ph, w1, wdw, w3)

    return out_flat.reshape(n, ho, wo, cout)                  # free reshape


# ---------------------------- pure-JAX reference ----------------------------
def _reference(x_nhwc, w_expand_oihw, w_dw_oihw, w_project_oihw, stride):
    f32 = jnp.float32
    x = x_nhwc.astype(f32)
    we = w_expand_oihw.astype(f32)
    wd = w_dw_oihw.astype(f32)
    wp = w_project_oihw.astype(f32)
    dn = ("NHWC", "HWIO", "NHWC")
    hi = lax.Precision.HIGHEST
    chid = we.shape[0]
    k = wd.shape[-1]
    pad = k // 2
    y = lax.conv_general_dilated(
        x, jnp.transpose(we, (2, 3, 1, 0)), (1, 1),
        [(0, 0), (0, 0)], dimension_numbers=dn, precision=hi)
    y = jnp.clip(y, 0.0, 6.0)
    y = lax.conv_general_dilated(
        y, jnp.transpose(wd, (2, 3, 1, 0)), (stride, stride),
        [(pad, pad), (pad, pad)], dimension_numbers=dn,
        feature_group_count=chid, precision=hi)
    y = jnp.clip(y, 0.0, 6.0)
    y = lax.conv_general_dilated(
        y, jnp.transpose(wp, (2, 3, 1, 0)), (1, 1),
        [(0, 0), (0, 0)], dimension_numbers=dn, precision=hi)
    if stride == 1 and x.shape[-1] == wp.shape[0]:
        y = y + x
    return y


if __name__ == "__main__":
    key = jax.random.PRNGKey(0)

    def make_params(key, cin, cout, k, expand_ratio):
        chid = int(cin * expand_ratio)
        k1, k2, k3 = jax.random.split(key, 3)

        def u(kk, shape, fan_in):
            bound = 1.0 / math.sqrt(fan_in)
            return jax.random.uniform(kk, shape, jnp.float32,
                                      minval=-bound, maxval=bound
                                      ).astype(jnp.bfloat16)

        w_expand = u(k1, (chid, cin, 1, 1), cin)
        w_dw = u(k2, (chid, 1, k, k), k * k)
        w_project = u(k3, (cout, chid, 1, 1), chid)
        return w_expand, w_dw, w_project

    # (name, cin, cout, kernel_size, stride, expand_ratio)
    configs = [
        ("stride2_downsample", 64, 128, 3, 2, 6),   # default-style, chid=384
        ("stride1_residual", 64, 64, 3, 1, 2),      # residual branch, chid=128
        ("stride2_chid_pad", 24, 32, 3, 2, 6),      # chid=144 -> padded to 256
    ]

    N, H, W = 2, 16, 16
    kx, kp = jax.random.split(key)
    for idx, (name, cin, cout, k, s, er) in enumerate(configs):
        kxi = jax.random.fold_in(kx, idx)
        kpi = jax.random.fold_in(kp, idx)
        x = jax.random.normal(kxi, (N, H, W, cin), jnp.float32
                              ).astype(jnp.bfloat16)
        w_e, w_d, w_p = make_params(kpi, cin, cout, k, er)

        out = inverted_residual_block(x, w_e, w_d, w_p, stride=s)
        out = jax.block_until_ready(out)

        ref = _reference(x, w_e, w_d, w_p, s)
        assert out.shape == ref.shape, f"shape mismatch for {name}"
        np.testing.assert_allclose(
            np.asarray(out.astype(jnp.float32)), np.asarray(ref),
            rtol=3e-2, atol=3e-2, err_msg=f"config {name}")

    print("KERNEL_OK")
</pallas_src>

<mosaic_0001>
module attributes {stable_mosaic.version = 11 : i64} {
  func.func @_inv_res_kernel(%arg0: i32, %arg1: memref<1x2x16x8x64xbf16, #tpu.memory_space<vmem>>, %arg2: memref<64x384xbf16, #tpu.memory_space<vmem>>, %arg3: memref<9x384xbf16, #tpu.memory_space<vmem>>, %arg4: memref<384x128xbf16, #tpu.memory_space<vmem>>, %arg5: memref<1x8x1024xbf16, #tpu.memory_space<vmem>>, %arg6: memref<9x2x9x768xbf16, #tpu.memory_space<vmem>>, %arg7: memref<8x8x384xbf16, #tpu.memory_space<vmem>>) attributes {dimension_semantics = [#tpu.dimension_semantics<parallel>], iteration_bounds = array<i64: 2>, scalar_prefetch = 0 : i64, scratch_operands = 2 : i64, tpu.core_type = #tpu.core_type<tc>, window_params = [{transform_indices = @transform_0, window_bounds = array<i64: 1, 2, 16, 8, 64>}, {pipeline_mode = #tpu.pipeline_mode<synchronous>, transform_indices = @transform_1, window_bounds = array<i64: 64, 384>}, {pipeline_mode = #tpu.pipeline_mode<synchronous>, transform_indices = @transform_2, window_bounds = array<i64: 9, 384>}, {pipeline_mode = #tpu.pipeline_mode<synchronous>, transform_indices = @transform_3, window_bounds = array<i64: 384, 128>}, {transform_indices = @transform_4, window_bounds = array<i64: 1, 8, 1024>}]} {
    %cst = arith.constant 0.000000e+00 : bf16
    %0 = vector.broadcast %cst : bf16 to vector<1x2x9x768xbf16>
    %c0 = arith.constant 0 : index
    %c0_0 = arith.constant 0 : index
    %c0_1 = arith.constant 0 : index
    %c0_2 = arith.constant 0 : index
    %1 = vector.load %arg6[%c0, %c0_0, %c0_1, %c0_2] : memref<9x2x9x768xbf16, #tpu.memory_space<vmem>>, vector<1x2x9x768xbf16>
    tpu.vector_store %arg6[%c0, %c0_0, %c0_1, %c0_2], %0 {strides = array<i32>} : memref<9x2x9x768xbf16, #tpu.memory_space<vmem>>, vector<1x2x9x768xbf16>,
    %cst_3 = arith.constant 0.000000e+00 : bf16
    %2 = vector.broadcast %cst_3 : bf16 to vector<8x2x1x768xbf16>
    %c1 = arith.constant 1 : index
    %c0_4 = arith.constant 0 : index
    %c0_5 = arith.constant 0 : index
    %c0_6 = arith.constant 0 : index
    %3 = vector.load %arg6[%c1, %c0_4, %c0_5, %c0_6] : memref<9x2x9x768xbf16, #tpu.memory_space<vmem>>, vector<8x2x1x768xbf16>
    tpu.vector_store %arg6[%c1, %c0_4, %c0_5, %c0_6], %2 {strides = array<i32>} : memref<9x2x9x768xbf16, #tpu.memory_space<vmem>>, vector<8x2x1x768xbf16>,
    %c0_7 = arith.constant 0 : index
    %c0_8 = arith.constant 0 : index
    %c0_9 = arith.constant 0 : index
    %c0_10 = arith.constant 0 : index
    %c0_11 = arith.constant 0 : index
    %4 = vector.load %arg1[%c0_7, %c0_8, %c0_9, %c0_10, %c0_11] : memref<1x2x16x8x64xbf16, #tpu.memory_space<vmem>>, vector<1x2x16x8x64xbf16>
    %5 = vector.shape_cast %4 : vector<1x2x16x8x64xbf16> to vector<2x16x8x64xbf16>
    %6 = vector.shape_cast %5 : vector<2x16x8x64xbf16> to vector<256x64xbf16>
    %c0_12 = arith.constant 0 : index
    %c0_13 = arith.constant 0 : index
    %7 = vector.load %arg2[%c0_12, %c0_13] : memref<64x384xbf16, #tpu.memory_space<vmem>>, vector<64x384xbf16>
    %cst_14 = arith.constant dense<0.000000e+00> : vector<256x384xf32>
    %8 = tpu.matmul %6, %7, %cst_14 {dimension_numbers = #tpu.dot_dimension_numbers<[1], [0], [0], [1], [0, 0, 1, 1], [], []>} : vector<256x64xbf16>, vector<64x384xbf16>, vector<256x384xf32> -> vector<256x384xf32>
    %cst_15 = arith.constant 0.000000e+00 : f32
    %cst_16 = arith.constant 6.000000e+00 : f32
    %9 = vector.broadcast %cst_15 : f32 to vector<256x384xf32>
    %10 = arith.maximumf %9, %8 : vector<256x384xf32>
    %11 = vector.broadcast %cst_16 : f32 to vector<256x384xf32>
    %12 = arith.minimumf %11, %10 : vector<256x384xf32>
    %13 = arith.truncf %12 : vector<256x384xf32> to vector<256x384xbf16>
    %14 = vector.shape_cast %13 : vector<256x384xbf16> to vector<2x8x2x8x384xbf16>
    %15 = vector.extract_strided_slice %14 {offsets = [0, 0, 0, 0, 0], sizes = [1, 8, 2, 8, 384], strides = [1, 1, 1, 1, 1]} : vector<2x8x2x8x384xbf16> to vector<1x8x2x8x384xbf16>
    %16 = vector.shape_cast %15 : vector<1x8x2x8x384xbf16> to vector<8x2x8x384xbf16>
    %c1_17 = arith.constant 1 : index
    %c0_18 = arith.constant 0 : index
    %c1_19 = arith.constant 1 : index
    %c0_20 = arith.constant 0 : index
    %17 = vector.load %arg6[%c1_17, %c0_18, %c1_19, %c0_20] : memref<9x2x9x768xbf16, #tpu.memory_space<vmem>>, vector<8x2x8x384xbf16>
    tpu.vector_store %arg6[%c1_17, %c0_18, %c1_19, %c0_20], %16 {strides = array<i32>} : memref<9x2x9x768xbf16, #tpu.memory_space<vmem>>, vector<8x2x8x384xbf16>,
    %18 = vector.extract_strided_slice %14 {offsets = [1, 0, 0, 0, 0], sizes = [1, 8, 2, 8, 384], strides = [1, 1, 1, 1, 1]} : vector<2x8x2x8x384xbf16> to vector<1x8x2x8x384xbf16>
    %19 = vector.shape_cast %18 : vector<1x8x2x8x384xbf16> to vector<8x2x8x384xbf16>
    %c1_21 = arith.constant 1 : index
    %c0_22 = arith.constant 0 : index
    %c1_23 = arith.constant 1 : index
    %c384 = arith.constant 384 : index
    %20 = vector.load %arg6[%c1_21, %c0_22, %c1_23, %c384] : memref<9x2x9x768xbf16, #tpu.memory_space<vmem>>, vector<8x2x8x384xbf16>
    tpu.vector_store %arg6[%c1_21, %c0_22, %c1_23, %c384], %19 {strides = array<i32>} : memref<9x2x9x768xbf16, #tpu.memory_space<vmem>>, vector<8x2x8x384xbf16>,
    %c0_24 = arith.constant 0 : index
    %c0_25 = arith.constant 0 : index
    %21 = vector.load %arg3[%c0_24, %c0_25] : memref<9x384xbf16, #tpu.memory_space<vmem>>, vector<9x384xbf16>
    %22 = arith.extf %21 : vector<9x384xbf16> to vector<9x384xf32>
    %c0_26 = arith.constant 0 : index
    %c1_27 = arith.constant 1 : index
    %c0_28 = arith.constant 0 : index
    %c384_29 = arith.constant 384 : index
    %23 = vector.load %arg6[%c0_26, %c1_27, %c0_28, %c384_29] : memref<9x2x9x768xbf16, #tpu.memory_space<vmem>>, vector<8x1x8x128xbf16>
    %24 = vector.shape_cast %23 : vector<8x1x8x128xbf16> to vector<8x8x128xbf16>
    %25 = vector.extract_strided_slice %22 {offsets = [0, 0], sizes = [1, 128], strides = [1, 1]} : vector<9x384xf32> to vector<1x128xf32>
    %26 = vector.shape_cast %25 : vector<1x128xf32> to vector<128xf32>
    %27 = vector.shape_cast %26 : vector<128xf32> to vector<1x1x128xf32>
    %28 = arith.extf %24 : vector<8x8x128xbf16> to vector<8x8x128xf32>
    %29 = vector.broadcast %27 : vector<1x1x128xf32> to vector<8x8x128xf32>
    %30 = arith.mulf %28, %29 : vector<8x8x128xf32>
    %c0_30 = arith.constant 0 : index
    %c1_31 = arith.constant 1 : index
    %c1_32 = arith.constant 1 : index
    %c0_33 = arith.constant 0 : index
    %31 = vector.load %arg6[%c0_30, %c1_31, %c1_32, %c0_33] : memref<9x2x9x768xbf16, #tpu.memory_space<vmem>>, vector<8x1x8x128xbf16>
    %32 = vector.shape_cast %31 : vector<8x1x8x128xbf16> to vector<8x8x128xbf16>
    %33 = vector.extract_strided_slice %22 {offsets = [1, 0], sizes = [1, 128], strides = [1, 1]} : vector<9x384xf32> to vector<1x128xf32>
    %34 = vector.shape_cast %33 : vector<1x128xf32> to vector<128xf32>
    %35 = vector.shape_cast %34 : vector<128xf32> to vector<1x1x128xf32>
    %36 = arith.extf %32 : vector<8x8x128xbf16> to vector<8x8x128xf32>
    %37 = vector.broadcast %35 : vector<1x1x128xf32> to vector<8x8x128xf32>
    %38 = arith.mulf %36, %37 : vector<8x8x128xf32>
    %39 = arith.addf %30, %38 : vector<8x8x128xf32>
    %c0_34 = arith.constant 0 : index
    %c1_35 = arith.constant 1 : index
    %c1_36 = arith.constant 1 : index
    %c384_37 = arith.constant 384 : index
    %40 = vector.load %arg6[%c0_34, %c1_35, %c1_36, %c384_37] : memref<9x2x9x768xbf16, #tpu.memory_space<vmem>>, vector<8x1x8x128xbf16>
    %41 = vector.shape_cast %40 : vector<8x1x8x128xbf16> to vector<8x8x128xbf16>
    %42 = vector.extract_strided_slice %22 {offsets = [2, 0], sizes = [1, 128], strides = [1, 1]} : vector<9x384xf32> to vector<1x128xf32>
    %43 = vector.shape_cast %42 : vector<1x128xf32> to vector<128xf32>
    %44 = vector.shape_cast %43 : vector<128xf32> to vector<1x1x128xf32>
    %45 = arith.extf %41 : vector<8x8x128xbf16> to vector<8x8x128xf32>
    %46 = vector.broadcast %44 : vector<1x1x128xf32> to vector<8x8x128xf32>
    %47 = arith.mulf %45, %46 : vector<8x8x128xf32>
    %48 = arith.addf %39, %47 : vector<8x8x128xf32>
    %c1_38 = arith.constant 1 : index
    %c0_39 = arith.constant 0 : index
    %c0_40 = arith.constant 0 : index
    %c384_41 = arith.constant 384 : index
    %49 = vector.load %arg6[%c1_38, %c0_39, %c0_40, %c384_41] : memref<9x2x9x768xbf16, #tpu.memory_space<vmem>>, vector<8x1x8x128xbf16>
    %50 = vector.shape_cast %49 : vector<8x1x8x128xbf16> to vector<8x8x128xbf16>
    %51 = vector.extract_strided_slice %22 {offsets = [3, 0], sizes = [1, 128], strides = [1, 1]} : vector<9x384xf32> to vector<1x128xf32>
    %52 = vector.shape_cast %51 : vector<1x128xf32> to vector<128xf32>
    %53 = vector.shape_cast %52 : vector<128xf32> to vector<1x1x128xf32>
    %54 = arith.extf %50 : vector<8x8x128xbf16> to vector<8x8x128xf32>
    %55 = vector.broadcast %53 : vector<1x1x128xf32> to vector<8x8x128xf32>
    %56 = arith.mulf %54, %55 : vector<8x8x128xf32>
    %57 = arith.addf %48, %56 : vector<8x8x128xf32>
    %c1_42 = arith.constant 1 : index
    %c0_43 = arith.constant 0 : index
    %c1_44 = arith.constant 1 : index
    %c0_45 = arith.constant 0 : index
    %58 = vector.load %arg6[%c1_42, %c0_43, %c1_44, %c0_45] : memref<9x2x9x768xbf16, #tpu.memory_space<vmem>>, vector<8x1x8x128xbf16>
    %59 = vector.shape_cast %58 : vector<8x1x8x128xbf16> to vector<8x8x128xbf16>
    %60 = vector.extract_strided_slice %22 {offsets = [4, 0], sizes = [1, 128], strides = [1, 1]} : vector<9x384xf32> to vector<1x128xf32>
    %61 = vector.shape_cast %60 : vector<1x128xf32> to vector<128xf32>
    %62 = vector.shape_cast %61 : vector<128xf32> to vector<1x1x128xf32>
    %63 = arith.extf %59 : vector<8x8x128xbf16> to vector<8x8x128xf32>
    %64 = vector.broadcast %62 : vector<1x1x128xf32> to vector<8x8x128xf32>
    %65 = arith.mulf %63, %64 : vector<8x8x128xf32>
    %66 = arith.addf %57, %65 : vector<8x8x128xf32>
    %c1_46 = arith.constant 1 : index
    %c0_47 = arith.constant 0 : index
    %c1_48 = arith.constant 1 : index
    %c384_49 = arith.constant 384 : index
    %67 = vector.load %arg6[%c1_46, %c0_47, %c1_48, %c384_49] : memref<9x2x9x768xbf16, #tpu.memory_space<vmem>>, vector<8x1x8x128xbf16>
    %68 = vector.shape_cast %67 : vector<8x1x8x128xbf16> to vector<8x8x128xbf16>
    %69 = vector.extract_strided_slice %22 {offsets = [5, 0], sizes = [1, 128], strides = [1, 1]} : vector<9x384xf32> to vector<1x128xf32>
    %70 = vector.shape_cast %69 : vector<1x128xf32> to vector<128xf32>
    %71 = vector.shape_cast %70 : vector<128xf32> to vector<1x1x128xf32>
    %72 = arith.extf %68 : vector<8x8x128xbf16> to vector<8x8x128xf32>
    %73 = vector.broadcast %71 : vector<1x1x128xf32> to vector<8x8x128xf32>
    %74 = arith.mulf %72, %73 : vector<8x8x128xf32>
    %75 = arith.addf %66, %74 : vector<8x8x128xf32>
    %c1_50 = arith.constant 1 : index
    %c1_51 = arith.constant 1 : index
    %c0_52 = arith.constant 0 : index
    %c384_53 = arith.constant 384 : index
    %76 = vector.load %arg6[%c1_50, %c1_51, %c0_52, %c384_53] : memref<9x2x9x768xbf16, #tpu.memory_space<vmem>>, vector<8x1x8x128xbf16>
    %77 = vector.shape_cast %76 : vector<8x1x8x128xbf16> to vector<8x8x128xbf16>
    %78 = vector.extract_strided_slice %22 {offsets = [6, 0], sizes = [1, 128], strides = [1, 1]} : vector<9x384xf32> to vector<1x128xf32>
    %79 = vector.shape_cast %78 : vector<1x128xf32> to vector<128xf32>
    %80 = vector.shape_cast %79 : vector<128xf32> to vector<1x1x128xf32>
    %81 = arith.extf %77 : vector<8x8x128xbf16> to vector<8x8x128xf32>
    %82 = vector.broadcast %80 : vector<1x1x128xf32> to vector<8x8x128xf32>
    %83 = arith.mulf %81, %82 : vector<8x8x128xf32>
    %84 = arith.addf %75, %83 : vector<8x8x128xf32>
    %c1_54 = arith.constant 1 : index
    %c1_55 = arith.constant 1 : index
    %c1_56 = arith.constant 1 : index
    %c0_57 = arith.constant 0 : index
    %85 = vector.load %arg6[%c1_54, %c1_55, %c1_56, %c0_57] : memref<9x2x9x768xbf16, #tpu.memory_space<vmem>>, vector<8x1x8x128xbf16>
    %86 = vector.shape_cast %85 : vector<8x1x8x128xbf16> to vector<8x8x128xbf16>
    %87 = vector.extract_strided_slice %22 {offsets = [7, 0], sizes = [1, 128], strides = [1, 1]} : vector<9x384xf32> to vector<1x128xf32>
    %88 = vector.shape_cast %87 : vector<1x128xf32> to vector<128xf32>
    %89 = vector.shape_cast %88 : vector<128xf32> to vector<1x1x128xf32>
    %90 = arith.extf %86 : vector<8x8x128xbf16> to vector<8x8x128xf32>
    %91 = vector.broadcast %89 : vector<1x1x128xf32> to vector<8x8x128xf32>
    %92 = arith.mulf %90, %91 : vector<8x8x128xf32>
    %93 = arith.addf %84, %92 : vector<8x8x128xf32>
    %c1_58 = arith.constant 1 : index
    %c1_59 = arith.constant 1 : index
    %c1_60 = arith.constant 1 : index
    %c384_61 = arith.constant 384 : index
    %94 = vector.load %arg6[%c1_58, %c1_59, %c1_60, %c384_61] : memref<9x2x9x768xbf16, #tpu.memory_space<vmem>>, vector<8x1x8x128xbf16>
    %95 = vector.shape_cast %94 : vector<8x1x8x128xbf16> to vector<8x8x128xbf16>
    %96 = vector.extract_strided_slice %22 {offsets = [8, 0], sizes = [1, 128], strides = [1, 1]} : vector<9x384xf32> to vector<1x128xf32>
    %97 = vector.shape_cast %96 : vector<1x128xf32> to vector<128xf32>
    %98 = vector.shape_cast %97 : vector<128xf32> to vector<1x1x128xf32>
    %99 = arith.extf %95 : vector<8x8x128xbf16> to vector<8x8x128xf32>
    %100 = vector.broadcast %98 : vector<1x1x128xf32> to vector<8x8x128xf32>
    %101 = arith.mulf %99, %100 : vector<8x8x128xf32>
    %102 = arith.addf %93, %101 : vector<8x8x128xf32>
    %cst_62 = arith.constant 0.000000e+00 : f32
    %cst_63 = arith.constant 6.000000e+00 : f32
    %103 = vector.broadcast %cst_62 : f32 to vector<8x8x128xf32>
    %104 = arith.maximumf %103, %102 : vector<8x8x128xf32>
    %105 = vector.broadcast %cst_63 : f32 to vector<8x8x128xf32>
    %106 = arith.minimumf %105, %104 : vector<8x8x128xf32>
    %107 = arith.truncf %106 : vector<8x8x128xf32> to vector<8x8x128xbf16>
    %c0_64 = arith.constant 0 : index
    %c0_65 = arith.constant 0 : index
    %c0_66 = arith.constant 0 : index
    %108 = vector.load %arg7[%c0_64, %c0_65, %c0_66] : memref<8x8x384xbf16, #tpu.memory_space<vmem>>, vector<8x8x128xbf16>
    tpu.vector_store %arg7[%c0_64, %c0_65, %c0_66], %107 {strides = array<i32>} : memref<8x8x384xbf16, #tpu.memory_space<vmem>>, vector<8x8x128xbf16>,
    %c0_67 = arith.constant 0 : index
    %c1_68 = arith.constant 1 : index
    %c0_69 = arith.constant 0 : index
    %c512 = arith.constant 512 : index
    %109 = vector.load %arg6[%c0_67, %c1_68, %c0_69, %c512] : memref<9x2x9x768xbf16, #tpu.memory_space<vmem>>, vector<8x1x8x128xbf16>
    %110 = vector.shape_cast %109 : vector<8x1x8x128xbf16> to vector<8x8x128xbf16>
    %111 = vector.extract_strided_slice %22 {offsets = [0, 128], sizes = [1, 128], strides = [1, 1]} : vector<9x384xf32> to vector<1x128xf32>
    %112 = vector.shape_cast %111 : vector<1x128xf32> to vector<128xf32>
    %113 = vector.shape_cast %112 : vector<128xf32> to vector<1x1x128xf32>
    %114 = arith.extf %110 : vector<8x8x128xbf16> to vector<8x8x128xf32>
    %115 = vector.broadcast %113 : vector<1x1x128xf32> to vector<8x8x128xf32>
    %116 = arith.mulf %114, %115 : vector<8x8x128xf32>
    %c0_70 = arith.constant 0 : index
    %c1_71 = arith.constant 1 : index
    %c1_72 = arith.constant 1 : index
    %c128 = arith.constant 128 : index
    %117 = vector.load %arg6[%c0_70, %c1_71, %c1_72, %c128] : memref<9x2x9x768xbf16, #tpu.memory_space<vmem>>, vector<8x1x8x128xbf16>
    %118 = vector.shape_cast %117 : vector<8x1x8x128xbf16> to vector<8x8x128xbf16>
    %119 = vector.extract_strided_slice %22 {offsets = [1, 128], sizes = [1, 128], strides = [1, 1]} : vector<9x384xf32> to vector<1x128xf32>
    %120 = vector.shape_cast %119 : vector<1x128xf32> to vector<128xf32>
    %121 = vector.shape_cast %120 : vector<128xf32> to vector<1x1x128xf32>
    %122 = arith.extf %118 : vector<8x8x128xbf16> to vector<8x8x128xf32>
    %123 = vector.broadcast %121 : vector<1x1x128xf32> to vector<8x8x128xf32>
    %124 = arith.mulf %122, %123 : vector<8x8x128xf32>
    %125 = arith.addf %116, %124 : vector<8x8x128xf32>
    %c0_73 = arith.constant 0 : index
    %c1_74 = arith.constant 1 : index
    %c1_75 = arith.constant 1 : index
    %c512_76 = arith.constant 512 : index
    %126 = vector.load %arg6[%c0_73, %c1_74, %c1_75, %c512_76] : memref<9x2x9x768xbf16, #tpu.memory_space<vmem>>, vector<8x1x8x128xbf16>
    %127 = vector.shape_cast %126 : vector<8x1x8x128xbf16> to vector<8x8x128xbf16>
    %128 = vector.extract_strided_slice %22 {offsets = [2, 128], sizes = [1, 128], strides = [1, 1]} : vector<9x384xf32> to vector<1x128xf32>
    %129 = vector.shape_cast %128 : vector<1x128xf32> to vector<128xf32>
    %130 = vector.shape_cast %129 : vector<128xf32> to vector<1x1x128xf32>
    %131 = arith.extf %127 : vector<8x8x128xbf16> to vector<8x8x128xf32>
    %132 = vector.broadcast %130 : vector<1x1x128xf32> to vector<8x8x128xf32>
    %133 = arith.mulf %131, %132 : vector<8x8x128xf32>
    %134 = arith.addf %125, %133 : vector<8x8x128xf32>
    %c1_77 = arith.constant 1 : index
    %c0_78 = arith.constant 0 : index
    %c0_79 = arith.constant 0 : index
    %c512_80 = arith.constant 512 : index
    %135 = vector.load %arg6[%c1_77, %c0_78, %c0_79, %c512_80] : memref<9x2x9x768xbf16, #tpu.memory_space<vmem>>, vector<8x1x8x128xbf16>
    %136 = vector.shape_cast %135 : vector<8x1x8x128xbf16> to vector<8x8x128xbf16>
    %137 = vector.extract_strided_slice %22 {offsets = [3, 128], sizes = [1, 128], strides = [1, 1]} : vector<9x384xf32> to vector<1x128xf32>
    %138 = vector.shape_cast %137 : vector<1x128xf32> to vector<128xf32>
    %139 = vector.shape_cast %138 : vector<128xf32> to vector<1x1x128xf32>
    %140 = arith.extf %136 : vector<8x8x128xbf16> to vector<8x8x128xf32>
    %141 = vector.broadcast %139 : vector<1x1x128xf32> to vector<8x8x128xf32>
    %142 = arith.mulf %140, %141 : vector<8x8x128xf32>
    %143 = arith.addf %134, %142 : vector<8x8x128xf32>
    %c1_81 = arith.constant 1 : index
    %c0_82 = arith.constant 0 : index
    %c1_83 = arith.constant 1 : index
    %c128_84 = arith.constant 128 : index
    %144 = vector.load %arg6[%c1_81, %c0_82, %c1_83, %c128_84] : memref<9x2x9x768xbf16, #tpu.memory_space<vmem>>, vector<8x1x8x128xbf16>
    %145 = vector.shape_cast %144 : vector<8x1x8x128xbf16> to vector<8x8x128xbf16>
    %146 = vector.extract_strided_slice %22 {offsets = [4, 128], sizes = [1, 128], strides = [1, 1]} : vector<9x384xf32> to vector<1x128xf32>
    %147 = vector.shape_cast %146 : vector<1x128xf32> to vector<128xf32>
    %148 = vector.shape_cast %147 : vector<128xf32> to vector<1x1x128xf32>
    %149 = arith.extf %145 : vector<8x8x128xbf16> to vector<8x8x128xf32>
    %150 = vector.broadcast %148 : vector<1x1x128xf32> to vector<8x8x128xf32>
    %151 = arith.mulf %149, %150 : vector<8x8x128xf32>
    %152 = arith.addf %143, %151 : vector<8x8x128xf32>
    %c1_85 = arith.constant 1 : index
    %c0_86 = arith.constant 0 : index
    %c1_87 = arith.constant 1 : index
    %c512_88 = arith.constant 512 : index
    %153 = vector.load %arg6[%c1_85, %c0_86, %c1_87, %c512_88] : memref<9x2x9x768xbf16, #tpu.memory_space<vmem>>, vector<8x1x8x128xbf16>
    %154 = vector.shape_cast %153 : vector<8x1x8x128xbf16> to vector<8x8x128xbf16>
    %155 = vector.extract_strided_slice %22 {offsets = [5, 128], sizes = [1, 128], strides = [1, 1]} : vector<9x384xf32> to vector<1x128xf32>
    %156 = vector.shape_cast %155 : vector<1x128xf32> to vector<128xf32>
    %157 = vector.shape_cast %156 : vector<128xf32> to vector<1x1x128xf32>
    %158 = arith.extf %154 : vector<8x8x128xbf16> to vector<8x8x128xf32>
    %159 = vector.broadcast %157 : vector<1x1x128xf32> to vector<8x8x128xf32>
    %160 = arith.mulf %158, %159 : vector<8x8x128xf32>
    %161 = arith.addf %152, %160 : vector<8x8x128xf32>
    %c1_89 = arith.constant 1 : index
    %c1_90 = arith.constant 1 : index
    %c0_91 = arith.constant 0 : index
    %c512_92 = arith.constant 512 : index
    %162 = vector.load %arg6[%c1_89, %c1_90, %c0_91, %c512_92] : memref<9x2x9x768xbf16, #tpu.memory_space<vmem>>, vector<8x1x8x128xbf16>
    %163 = vector.shape_cast %162 : vector<8x1x8x128xbf16> to vector<8x8x128xbf16>
    %164 = vector.extract_strided_slice %22 {offsets = [6, 128], sizes = [1, 128], strides = [1, 1]} : vector<9x384xf32> to vector<1x128xf32>
    %165 = vector.shape_cast %164 : vector<1x128xf32> to vector<128xf32>
    %166 = vector.shape_cast %165 : vector<128xf32> to vector<1x1x128xf32>
    %167 = arith.extf %163 : vector<8x8x128xbf16> to vector<8x8x128xf32>
    %168 = vector.broadcast %166 : vector<1x1x128xf32> to vector<8x8x128xf32>
    %169 = arith.mulf %167, %168 : vector<8x8x128xf32>
    %170 = arith.addf %161, %169 : vector<8x8x128xf32>
    %c1_93 = arith.constant 1 : index
    %c1_94 = arith.constant 1 : index
    %c1_95 = arith.constant 1 : index
    %c128_96 = arith.constant 128 : index
    %171 = vector.load %arg6[%c1_93, %c1_94, %c1_95, %c128_96] : memref<9x2x9x768xbf16, #tpu.memory_space<vmem>>, vector<8x1x8x128xbf16>
    %172 = vector.shape_cast %171 : vector<8x1x8x128xbf16> to vector<8x8x128xbf16>
    %173 = vector.extract_strided_slice %22 {offsets = [7, 128], sizes = [1, 128], strides = [1, 1]} : vector<9x384xf32> to vector<1x128xf32>
    %174 = vector.shape_cast %173 : vector<1x128xf32> to vector<128xf32>
    %175 = vector.shape_cast %174 : vector<128xf32> to vector<1x1x128xf32>
    %176 = arith.extf %172 : vector<8x8x128xbf16> to vector<8x8x128xf32>
    %177 = vector.broadcast %175 : vector<1x1x128xf32> to vector<8x8x128xf32>
    %178 = arith.mulf %176, %177 : vector<8x8x128xf32>
    %179 = arith.addf %170, %178 : vector<8x8x128xf32>
    %c1_97 = arith.constant 1 : index
    %c1_98 = arith.constant 1 : index
    %c1_99 = arith.constant 1 : index
    %c512_100 = arith.constant 512 : index
    %180 = vector.load %arg6[%c1_97, %c1_98, %c1_99, %c512_100] : memref<9x2x9x768xbf16, #tpu.memory_space<vmem>>, vector<8x1x8x128xbf16>
    %181 = vector.shape_cast %180 : vector<8x1x8x128xbf16> to vector<8x8x128xbf16>
    %182 = vector.extract_strided_slice %22 {offsets = [8, 128], sizes = [1, 128], strides = [1, 1]} : vector<9x384xf32> to vector<1x128xf32>
    %183 = vector.shape_cast %182 : vector<1x128xf32> to vector<128xf32>
    %184 = vector.shape_cast %183 : vector<128xf32> to vector<1x1x128xf32>
    %185 = arith.extf %181 : vector<8x8x128xbf16> to vector<8x8x128xf32>
    %186 = vector.broadcast %184 : vector<1x1x128xf32> to vector<8x8x128xf32>
    %187 = arith.mulf %185, %186 : vector<8x8x128xf32>
    %188 = arith.addf %179, %187 : vector<8x8x128xf32>
    %cst_101 = arith.constant 0.000000e+00 : f32
    %cst_102 = arith.constant 6.000000e+00 : f32
    %189 = vector.broadcast %cst_101 : f32 to vector<8x8x128xf32>
    %190 = arith.maximumf %189, %188 : vector<8x8x128xf32>
    %191 = vector.broadcast %cst_102 : f32 to vector<8x8x128xf32>
    %192 = arith.minimumf %191, %190 : vector<8x8x128xf32>
    %193 = arith.truncf %192 : vector<8x8x128xf32> to vector<8x8x128xbf16>
    %c0_103 = arith.constant 0 : index
    %c0_104 = arith.constant 0 : index
    %c128_105 = arith.constant 128 : index
    %194 = vector.load %arg7[%c0_103, %c0_104, %c128_105] : memref<8x8x384xbf16, #tpu.memory_space<vmem>>, vector<8x8x128xbf16>
    tpu.vector_store %arg7[%c0_103, %c0_104, %c128_105], %193 {strides = array<i32>} : memref<8x8x384xbf16, #tpu.memory_space<vmem>>, vector<8x8x128xbf16>,
    %c0_106 = arith.constant 0 : index
    %c1_107 = arith.constant 1 : index
    %c0_108 = arith.constant 0 : index
    %c640 = arith.constant 640 : index
    %195 = vector.load %arg6[%c0_106, %c1_107, %c0_108, %c640] : memref<9x2x9x768xbf16, #tpu.memory_space<vmem>>, vector<8x1x8x128xbf16>
    %196 = vector.shape_cast %195 : vector<8x1x8x128xbf16> to vector<8x8x128xbf16>
    %197 = vector.extract_strided_slice %22 {offsets = [0, 256], sizes = [1, 128], strides = [1, 1]} : vector<9x384xf32> to vector<1x128xf32>
    %198 = vector.shape_cast %197 : vector<1x128xf32> to vector<128xf32>
    %199 = vector.shape_cast %198 : vector<128xf32> to vector<1x1x128xf32>
    %200 = arith.extf %196 : vector<8x8x128xbf16> to vector<8x8x128xf32>
    %201 = vector.broadcast %199 : vector<1x1x128xf32> to vector<8x8x128xf32>
    %202 = arith.mulf %200, %201 : vector<8x8x128xf32>
    %c0_109 = arith.constant 0 : index
    %c1_110 = arith.constant 1 : index
    %c1_111 = arith.constant 1 : index
    %c256 = arith.constant 256 : index
    %203 = vector.load %arg6[%c0_109, %c1_110, %c1_111, %c256] : memref<9x2x9x768xbf16, #tpu.memory_space<vmem>>, vector<8x1x8x128xbf16>
    %204 = vector.shape_cast %203 : vector<8x1x8x128xbf16> to vector<8x8x128xbf16>
    %205 = vector.extract_strided_slice %22 {offsets = [1, 256], sizes = [1, 128], strides = [1, 1]} : vector<9x384xf32> to vector<1x128xf32>
    %206 = vector.shape_cast %205 : vector<1x128xf32> to vector<128xf32>
    %207 = vector.shape_cast %206 : vector<128xf32> to vector<1x1x128xf32>
    %208 = arith.extf %204 : vector<8x8x128xbf16> to vector<8x8x128xf32>
    %209 = vector.broadcast %207 : vector<1x1x128xf32> to vector<8x8x128xf32>
    %210 = arith.mulf %208, %209 : vector<8x8x128xf32>
    %211 = arith.addf %202, %210 : vector<8x8x128xf32>
    %c0_112 = arith.constant 0 : index
    %c1_113 = arith.constant 1 : index
    %c1_114 = arith.constant 1 : index
    %c640_115 = arith.constant 640 : index
    %212 = vector.load %arg6[%c0_112, %c1_113, %c1_114, %c640_115] : memref<9x2x9x768xbf16, #tpu.memory_space<vmem>>, vector<8x1x8x128xbf16>
    %213 = vector.shape_cast %212 : vector<8x1x8x128xbf16> to vector<8x8x128xbf16>
    %214 = vector.extract_strided_slice %22 {offsets = [2, 256], sizes = [1, 128], strides = [1, 1]} : vector<9x384xf32> to vector<1x128xf32>
    %215 = vector.shape_cast %214 : vector<1x128xf32> to vector<128xf32>
    %216 = vector.shape_cast %215 : vector<128xf32> to vector<1x1x128xf32>
    %217 = arith.extf %213 : vector<8x8x128xbf16> to vector<8x8x128xf32>
    %218 = vector.broadcast %216 : vector<1x1x128xf32> to vector<8x8x128xf32>
    %219 = arith.mulf %217, %218 : vector<8x8x128xf32>
    %220 = arith.addf %211, %219 : vector<8x8x128xf32>
    %c1_116 = arith.constant 1 : index
    %c0_117 = arith.constant 0 : index
    %c0_118 = arith.constant 0 : index
    %c640_119 = arith.constant 640 : index
    %221 = vector.load %arg6[%c1_116, %c0_117, %c0_118, %c640_119] : memref<9x2x9x768xbf16, #tpu.memory_space<vmem>>, vector<8x1x8x128xbf16>
    %222 = vector.shape_cast %221 : vector<8x1x8x128xbf16> to vector<8x8x128xbf16>
    %223 = vector.extract_strided_slice %22 {offsets = [3, 256], sizes = [1, 128], strides = [1, 1]} : vector<9x384xf32> to vector<1x128xf32>
    %224 = vector.shape_cast %223 : vector<1x128xf32> to vector<128xf32>
    %225 = vector.shape_cast %224 : vector<128xf32> to vector<1x1x128xf32>
    %226 = arith.extf %222 : vector<8x8x128xbf16> to vector<8x8x128xf32>
    %227 = vector.broadcast %225 : vector<1x1x128xf32> to vector<8x8x128xf32>
    %228 = arith.mulf %226, %227 : vector<8x8x128xf32>
    %229 = arith.addf %220, %228 : vector<8x8x128xf32>
    %c1_120 = arith.constant 1 : index
    %c0_121 = arith.constant 0 : index
    %c1_122 = arith.constant 1 : index
    %c256_123 = arith.constant 256 : index
    %230 = vector.load %arg6[%c1_120, %c0_121, %c1_122, %c256_123] : memref<9x2x9x768xbf16, #tpu.memory_space<vmem>>, vector<8x1x8x128xbf16>
    %231 = vector.shape_cast %230 : vector<8x1x8x128xbf16> to vector<8x8x128xbf16>
    %232 = vector.extract_strided_slice %22 {offsets = [4, 256], sizes = [1, 128], strides = [1, 1]} : vector<9x384xf32> to vector<1x128xf32>
    %233 = vector.shape_cast %232 : vector<1x128xf32> to vector<128xf32>
    %234 = vector.shape_cast %233 : vector<128xf32> to vector<1x1x128xf32>
    %235 = arith.extf %231 : vector<8x8x128xbf16> to vector<8x8x128xf32>
    %236 = vector.broadcast %234 : vector<1x1x128xf32> to vector<8x8x128xf32>
    %237 = arith.mulf %235, %236 : vector<8x8x128xf32>
    %238 = arith.addf %229, %237 : vector<8x8x128xf32>
    %c1_124 = arith.constant 1 : index
    %c0_125 = arith.constant 0 : index
    %c1_126 = arith.constant 1 : index
    %c640_127 = arith.constant 640 : index
    %239 = vector.load %arg6[%c1_124, %c0_125, %c1_126, %c640_127] : memref<9x2x9x768xbf16, #tpu.memory_space<vmem>>, vector<8x1x8x128xbf16>
    %240 = vector.shape_cast %239 : vector<8x1x8x128xbf16> to vector<8x8x128xbf16>
    %241 = vector.extract_strided_slice %22 {offsets = [5, 256], sizes = [1, 128], strides = [1, 1]} : vector<9x384xf32> to vector<1x128xf32>
    %242 = vector.shape_cast %241 : vector<1x128xf32> to vector<128xf32>
    %243 = vector.shape_cast %242 : vector<128xf32> to vector<1x1x128xf32>
    %244 = arith.extf %240 : vector<8x8x128xbf16> to vector<8x8x128xf32>
    %245 = vector.broadcast %243 : vector<1x1x128xf32> to vector<8x8x128xf32>
    %246 = arith.mulf %244, %245 : vector<8x8x128xf32>
    %247 = arith.addf %238, %246 : vector<8x8x128xf32>
    %c1_128 = arith.constant 1 : index
    %c1_129 = arith.constant 1 : index
    %c0_130 = arith.constant 0 : index
    %c640_131 = arith.constant 640 : index
    %248 = vector.load %arg6[%c1_128, %c1_129, %c0_130, %c640_131] : memref<9x2x9x768xbf16, #tpu.memory_space<vmem>>, vector<8x1x8x128xbf16>
    %249 = vector.shape_cast %248 : vector<8x1x8x128xbf16> to vector<8x8x128xbf16>
    %250 = vector.extract_strided_slice %22 {offsets = [6, 256], sizes = [1, 128], strides = [1, 1]} : vector<9x384xf32> to vector<1x128xf32>
    %251 = vector.shape_cast %250 : vector<1x128xf32> to vector<128xf32>
    %252 = vector.shape_cast %251 : vector<128xf32> to vector<1x1x128xf32>
    %253 = arith.extf %249 : vector<8x8x128xbf16> to vector<8x8x128xf32>
    %254 = vector.broadcast %252 : vector<1x1x128xf32> to vector<8x8x128xf32>
    %255 = arith.mulf %253, %254 : vector<8x8x128xf32>
    %256 = arith.addf %247, %255 : vector<8x8x128xf32>
    %c1_132 = arith.constant 1 : index
    %c1_133 = arith.constant 1 : index
    %c1_134 = arith.constant 1 : index
    %c256_135 = arith.constant 256 : index
    %257 = vector.load %arg6[%c1_132, %c1_133, %c1_134, %c256_135] : memref<9x2x9x768xbf16, #tpu.memory_space<vmem>>, vector<8x1x8x128xbf16>
    %258 = vector.shape_cast %257 : vector<8x1x8x128xbf16> to vector<8x8x128xbf16>
    %259 = vector.extract_strided_slice %22 {offsets = [7, 256], sizes = [1, 128], strides = [1, 1]} : vector<9x384xf32> to vector<1x128xf32>
    %260 = vector.shape_cast %259 : vector<1x128xf32> to vector<128xf32>
    %261 = vector.shape_cast %260 : vector<128xf32> to vector<1x1x128xf32>
    %262 = arith.extf %258 : vector<8x8x128xbf16> to vector<8x8x128xf32>
    %263 = vector.broadcast %261 : vector<1x1x128xf32> to vector<8x8x128xf32>
    %264 = arith.mulf %262, %263 : vector<8x8x128xf32>
    %265 = arith.addf %256, %264 : vector<8x8x128xf32>
    %c1_136 = arith.constant 1 : index
    %c1_137 = arith.constant 1 : index
    %c1_138 = arith.constant 1 : index
    %c640_139 = arith.constant 640 : index
    %266 = vector.load %arg6[%c1_136, %c1_137, %c1_138, %c640_139] : memref<9x2x9x768xbf16, #tpu.memory_space<vmem>>, vector<8x1x8x128xbf16>
    %267 = vector.shape_cast %266 : vector<8x1x8x128xbf16> to vector<8x8x128xbf16>
    %268 = vector.extract_strided_slice %22 {offsets = [8, 256], sizes = [1, 128], strides = [1, 1]} : vector<9x384xf32> to vector<1x128xf32>
    %269 = vector.shape_cast %268 : vector<1x128xf32> to vector<128xf32>
    %270 = vector.shape_cast %269 : vector<128xf32> to vector<1x1x128xf32>
    %271 = arith.extf %267 : vector<8x8x128xbf16> to vector<8x8x128xf32>
    %272 = vector.broadcast %270 : vector<1x1x128xf32> to vector<8x8x128xf32>
    %273 = arith.mulf %271, %272 : vector<8x8x128xf32>
    %274 = arith.addf %265, %273 : vector<8x8x128xf32>
    %cst_140 = arith.constant 0.000000e+00 : f32
    %cst_141 = arith.constant 6.000000e+00 : f32
    %275 = vector.broadcast %cst_140 : f32 to vector<8x8x128xf32>
    %276 = arith.maximumf %275, %274 : vector<8x8x128xf32>
    %277 = vector.broadcast %cst_141 : f32 to vector<8x8x128xf32>
    %278 = arith.minimumf %277, %276 : vector<8x8x128xf32>
    %279 = arith.truncf %278 : vector<8x8x128xf32> to vector<8x8x128xbf16>
    %c0_142 = arith.constant 0 : index
    %c0_143 = arith.constant 0 : index
    %c256_144 = arith.constant 256 : index
    %280 = vector.load %arg7[%c0_142, %c0_143, %c256_144] : memref<8x8x384xbf16, #tpu.memory_space<vmem>>, vector<8x8x128xbf16>
    tpu.vector_store %arg7[%c0_142, %c0_143, %c256_144], %279 {strides = array<i32>} : memref<8x8x384xbf16, #tpu.memory_space<vmem>>, vector<8x8x128xbf16>,
    %c0_145 = arith.constant 0 : index
    %c0_146 = arith.constant 0 : index
    %c0_147 = arith.constant 0 : index
    %281 = vector.load %arg7[%c0_145, %c0_146, %c0_147] : memref<8x8x384xbf16, #tpu.memory_space<vmem>>, vector<8x8x384xbf16>
    %282 = vector.shape_cast %281 : vector<8x8x384xbf16> to vector<64x384xbf16>
    %c0_148 = arith.constant 0 : index
    %c0_149 = arith.constant 0 : index
    %283 = vector.load %arg4[%c0_148, %c0_149] : memref<384x128xbf16, #tpu.memory_space<vmem>>, vector<384x128xbf16>
    %cst_150 = arith.constant dense<0.000000e+00> : vector<64x128xf32>
    %284 = tpu.matmul %282, %283, %cst_150 {dimension_numbers = #tpu.dot_dimension_numbers<[1], [0], [0], [1], [0, 0, 1, 1], [], []>} : vector<64x384xbf16>, vector<384x128xbf16>, vector<64x128xf32> -> vector<64x128xf32>
    %285 = arith.truncf %284 : vector<64x128xf32> to vector<64x128xbf16>
    %286 = vector.shape_cast %285 : vector<64x128xbf16> to vector<1x8x1024xbf16>
    %c0_151 = arith.constant 0 : index
    %c0_152 = arith.constant 0 : index
    %c0_153 = arith.constant 0 : index
    %287 = vector.load %arg5[%c0_151, %c0_152, %c0_153] : memref<1x8x1024xbf16, #tpu.memory_space<vmem>>, vector<1x8x1024xbf16>
    tpu.vector_store %arg5[%c0_151, %c0_152, %c0_153], %286 {strides = array<i32>} : memref<1x8x1024xbf16, #tpu.memory_space<vmem>>, vector<1x8x1024xbf16>,
    return
  }
  func.func @transform_0(%arg0: i32) -> (i32, i32, i32, i32, i32) {
    %c0_i32 = arith.constant 0 : i32
    %c0_i32_0 = arith.constant 0 : i32
    %c0_i32_1 = arith.constant 0 : i32
    %c0_i32_2 = arith.constant 0 : i32
    %c0_i32_3 = arith.constant 0 : i32
    return %arg0, %c0_i32, %c0_i32_0, %c0_i32_1, %c0_i32_2 : i32, i32, i32, i32, i32
  }
  func.func @transform_1(%arg0: i32) -> (i32, i32) {
    %c0_i32 = arith.constant 0 : i32
    %c0_i32_0 = arith.constant 0 : i32
    %c0_i32_1 = arith.constant 0 : i32
    return %c0_i32, %c0_i32_0 : i32, i32
  }
  func.func @transform_2(%arg0: i32) -> (i32, i32) {
    %c0_i32 = arith.constant 0 : i32
    %c0_i32_0 = arith.constant 0 : i32
    %c0_i32_1 = arith.constant 0 : i32
    return %c0_i32, %c0_i32_0 : i32, i32
  }
  func.func @transform_3(%arg0: i32) -> (i32, i32) {
    %c0_i32 = arith.constant 0 : i32
    %c0_i32_0 = arith.constant 0 : i32
    %c0_i32_1 = arith.constant 0 : i32
    return %c0_i32, %c0_i32_0 : i32, i32
  }
  func.func @transform_4(%arg0: i32) -> (i32, i32, i32) {
    %c0_i32 = arith.constant 0 : i32
    %c0_i32_0 = arith.constant 0 : i32
    %c0_i32_1 = arith.constant 0 : i32
    return %arg0, %c0_i32, %c0_i32_0 : i32, i32, i32
  }
}

</mosaic_0001>

<bundles_post_ra>
// kernel: tpu_custom_call.1
= control target key start
LH: loop header
LB: loop body
LE: loop exit
PB: predicated region body
PF: predicated region fallthrough
CT: control target
= control target key end

     0   :  { %9 = vsyncpa [#allocation5], 0  ;;  %s8920_s0 = inlined_call_operand.hbm [shape: bf16[2,2,16,8,64], index: 0, kind: input, shape index: {}]   ;;  %s8921_s1 = inlined_call_operand.hbm [shape: bf16[64,384], index: 1, kind: input, shape index: {}]   ;;  %s8922_s2 = inlined_call_operand.hbm [shape: bf16[9,384], index: 2, kind: input, shape index: {}]   ;;  %s8923_s3 = inlined_call_operand.hbm [shape: bf16[384,128], index: 3, kind: input, shape index: {}]   ;;  %s8924_s4 = inlined_call_operand.hbm [shape: bf16[2,8,1024], index: 4, kind: output, shape index: {}]  }
   0x1   :  { %11 = vsyncpa [#allocation5 + $0x1], 0 }
   0x2   :  { %12 = vsyncpa [#allocation8], 0 }
   0x3   :  { %13 = vsyncpa [#allocation11], 0 }
   0x4   :  { %14 = vsyncpa [#allocation6], 0 }
   0x5   :  { %16 = vsyncpa [#allocation6 + $0x1], 0  ;;  %s6127_s15 = smov 0   ;;  %s6129_s16 = smov 0  }
   0x6   :  { %s6131_s17 = smov 0   ;;  %s6133_s18 = smov 0  }
   0x7 LB: > { %s6148_s19 = sadd.s32 4294967295, %s6089_s18   ;;  %s5352_s20 = sadd.s32 4294967294, %s6089_s18   ;;  %s6089_s18 = sphi %s6133_s18, %s9738_s18   ;;  %s6085_s17 = sphi %s6131_s17, %s9737_s17   ;;  %s6081_s16 = sphi %s6129_s16, %s9736_s16   ;;  %s6077_s15 = sphi %s6127_s15, %s9735_s15  }
   0x8   : > { %p42_p0 = scmp.ne.s32.totalorder %s6081_s16, %s6077_s15  ;;  %p8925_p1 = scmp.eq.s32.totalorder %s6148_s19, 0 }
   0x9   : > { %p135_p3 = scmp.eq.s32.totalorder %s5352_s20, 1  ;;  %p5353_p5 = scmp.ge.s32.totalorder %s6089_s18, 1 }
   0xa   : > { %p6157_p4 = por %p8925_p1, %p42_p0  ;;  %p142_p7 = scmp.lt.s32.totalorder %s6089_s18, 3 }
   0xb   : > { %p6162_p6 = por %p135_p3, %p42_p0  ;;  %s6091_s24 = smov [#allocation7]  }
   0xc   : > { %s9113_s21 = scalar_select %p6157_p4, 1, 0 }
   0xd   : > { %s9114_s22 = scalar_select %p6162_p6, 1, 0 }
   0xe   : > { %p6167_p8 = pnand %p5353_p5, %p142_p7  ;;  %s154_s25 = sshll.u32 %s6091_s24, 4  ;;  %s155_s25 = int_to_ptr.vmem [resolvable:$true] %s154_s25 }
   0xf   : > { %s6092_s27 = smov [#allocation9]   ;;  %s6093_s29 = smov [#allocation10]  }
  0x10   : > { %s9115_s23 = scalar_select %p6167_p8, 1, 0 }
  0x11   : > { %p5770_p9 = pneg %p6167_p8  ;;  %s167_s28 = sshll.u32 %s6092_s27, 4  ;;  %s168_s28 = int_to_ptr.vmem [resolvable:$true] %s167_s28 }
  0x12   : > { %s180_s30 = sshll.u32 %s6093_s29, 4  ;;  %s5922_s5 = scalar_lea.vmem %s155_s25, 1536  ;;  %s181_s30 = int_to_ptr.vmem [resolvable:$true] %s180_s30 }
  0x13   : > { %p6176_p11 = pnand %p5770_p9, %p8925_p1  ;;  %p5923_p13 = scmp.ne.s32.totalorder %s155_s25, %s5922_s5 }
  0x14   : > { %p5930_p5 = scmp.lt.s32.totalorder %s155_s25, %s155_s25  ;;  %p5931_p7 = scmp.lt.s32.totalorder %s5922_s5, %s5922_s5 }
  0x15   : > { %p5913_p12 = pneg %p6176_p11 }
  0x16   : > { %p5932_p9 = por %p5931_p7, %p5930_p5 }
  0x17   : > { %p5925_p0 = pnand %p5923_p13, %p5913_p12 }
  0x19   : > { %p5926_p3 = pneg %p5925_p0 }
  0x1b   : > { %p5933_p10 = pnand %p5932_p9, %p5926_p3 }
  0x1d   : > { %5936 = shalt.err (!%p5933_p10)
}
  0x1e   : > { %s6094_s6 = smov 192   ;;  %s6095_s7 = smov 12  }
  0x1f   : > { %5773 = dma.hbm_to_vmem [thread:$0]  (!%p6176_p11), %s8921_s1, 1536, %s155_s25, [#allocation8], %s6094_s6, %s6094_s6, %s6095_s7  }
  0x20   : > { %s5948_s10 = scalar_lea.vmem %s168_s28, 384  ;;  %p5956_p2 = scmp.lt.s32.totalorder %s168_s28, %s168_s28 }
  0x21   : > { %p5949_p1 = scmp.ne.s32.totalorder %s168_s28, %s5948_s10  ;;  %p5957_p6 = scmp.lt.s32.totalorder %s5948_s10, %s5948_s10 }
  0x23   : > { %p5951_p13 = pnand %p5949_p1, %p5913_p12  ;;  %p5958_p5 = por %p5957_p6, %p5956_p2 }
  0x25   : > { %p5952_p0 = pneg %p5951_p13 }
  0x27   : > { %p5959_p3 = pnand %p5958_p5, %p5952_p0 }
  0x29   : > { %5962 = shalt.err (!%p5959_p3)
}
  0x2a   : > { %5776 = dma.hbm_to_vmem [thread:$0]  (!%p6176_p11), %s8922_s2, 384, %s168_s28, [#allocation8], %s6094_s6, %s6094_s6, %s6095_s7  }
  0x2b   : > { %s5974_s13 = scalar_lea.vmem %s181_s30, 3072  ;;  %p5982_p9 = scmp.lt.s32.totalorder %s181_s30, %s181_s30 }
  0x2c   : > { %p5975_p10 = scmp.ne.s32.totalorder %s181_s30, %s5974_s13  ;;  %p5983_p13 = scmp.lt.s32.totalorder %s5974_s13, %s5974_s13 }
  0x2e   : > { %p5977_p7 = pnand %p5975_p10, %p5913_p12  ;;  %p5984_p4 = por %p5983_p13, %p5982_p9 }
  0x30   : > { %p5978_p1 = pneg %p5977_p7 }
  0x32   : > { %p5985_p2 = pnand %p5984_p4, %p5978_p1 }
  0x34   : > { %5988 = shalt.err (!%p5985_p2)
}
  0x35   : > { %s6096_s14 = smov 64   ;;  %s6097_s20 = smov 4  }
  0x36   : > { %5779 = dma.hbm_to_vmem [thread:$0]  (!%p6176_p11), %s8923_s3, 3072, %s181_s30, [#allocation11], %s6096_s14, %s6096_s14, %s6097_s20  }
  0x37   : > { %s6210_s27 = sadd.s32 1, %s6089_s18   ;;  %s29_s29 = sadd.s32 1, %s6085_s17 }
  0x38   : > { %s26_s28 = ssub.s32 %s6089_s18, %s6210_s27  ;;  %p36_p6 = scmp.ne.s32.totalorder %s6085_s17, %s6081_s16 }
  0x39   : > { %p27_p4 = scmp.eq.s32.totalorder %s26_s28, 0  ;;  %p37_p12 = scmp.eq.s32.totalorder %s6089_s18, 0 }
  0x3a   : > { %p5791_p0 = scmp.lt.s32.totalorder %s6089_s18, 2  ;;  %p9117_p3 = scmp.eq.s32.totalorder %s6148_s19, 1 }
  0x3b   : > { %s6220_s5 = scalar_select %p27_p4, %s6085_s17, %s29_s29  }
  0x3c   : > { %p38_p5 = por %p37_p12, %p36_p6  ;;  %p6224_p10 = por %p9117_p3, %p36_p6 }
  0x3d   : > { %s194_s6 = sand.u32 1, %s6085_s17   ;;  %s5552_s7 = sshll.u32 %s6089_s18, 11 }
  0x3e   : > { %s9118_s26 = scalar_select %p6224_p10, 1, 0 }
  0x3f   : > { %s5358_s30 = sshll.u32 %s194_s6, 7  ;;  %s6233_s10 = scalar_lea.hbm %s8920_s0, %s5552_s7 }
  0x40   : > { %s198_s11 = scalar_lea.vmem [#allocation4], %s5358_s30  ;;  %p6235_p11 = pnand %p5791_p0, %p38_p5 }
  0x41   : > { %s205_s12 = sshll.u32 %s198_s11, 4  ;;  %s6241_s24 = scalar_lea.sflag [#allocation5], %s194_s6  ;;  %s6239_s12 = int_to_ptr.vmem [resolvable:$true] %s205_s12 }
  0x42   : > { %s5989_s25 = scalar_lea.hbm %s6233_s10, 2048  ;;  %p5991_p1 = pneg %p6235_p11 }
  0x43   : > { %p5990_p7 = scmp.ne.s32.totalorder %s6233_s10, %s5989_s25  ;;  %s5994_s7 = scalar_lea.hbm %s8920_s0, 4096 }
  0x44   : > { %p5995_p2 = scmp.lt.s32.totalorder %s6233_s10, %s8920_s0  ;;  %p5996_p4 = scmp.lt.s32.totalorder %s5994_s7, %s5989_s25 }
  0x45   : > { %p5992_p9 = pnand %p5991_p1, %p5990_p7 }
  0x46   : > { %p5997_p6 = por %p5996_p4, %p5995_p2 }
  0x47   : > { %p5993_p13 = pneg %p5992_p9 }
  0x49   : > { %p5998_p12 = pnand %p5997_p6, %p5993_p13 }
  0x4b   : > { %6001 = shalt.err (!%p5998_p12)
}
  0x4c   : > { %s6002_s6 = scalar_lea.vmem %s6239_s12, 2048  ;;  %s6098_s9 = smov [#allocation4]  }
  0x4d   : > { %p6003_p0 = scmp.ne.s32.totalorder %s6239_s12, %s6002_s6  ;;  %s6007_s11 = sshll.u32 %s6098_s9, 4  ;;  %s6008_s11 = int_to_ptr.vmem [resolvable:$false] %s6007_s11 }
  0x4e   : > { %s6009_s28 = scalar_lea.vmem %s6008_s11, 4096  ;;  %p6010_p7 = scmp.lt.s32.totalorder %s6239_s12, %s6008_s11 }
  0x4f   : > { %p6005_p5 = pnand %p6003_p0, %p5991_p1  ;;  %p6011_p9 = scmp.lt.s32.totalorder %s6009_s28, %s6002_s6 }
  0x51   : > { %p6006_p3 = pneg %p6005_p5  ;;  %p6012_p10 = por %p6011_p9, %p6010_p7 }
  0x53   : > { %p6013_p8 = pnand %p6012_p10, %p6006_p3 }
  0x55   : > { %6016 = shalt.err (!%p6013_p8)
}
  0x56   : > { %5783 = dma.hbm_to_vmem [thread:$0]  (!%p6235_p11), %s6233_s10, 2048, %s6239_s12, %s6241_s24, %s6096_s14, %s6096_s14, %s6097_s20  }
  0x57   : > { %p9120_p1 = scmp.ne.s32.totalorder %s9115_s23, 0 }
  0x59   : > { %217 = sbr.rel (%p9120_p1) target bundleno = 1137 (0x471), region = 36 }
  0x5e   : > { %s6268_s25 = sand.u32 1, %s6081_s16   ;;  %p9121_p8 = scmp.ne.s32.totalorder %s9113_s21, 0 }
  0x5f   : > { %s5362_s29 = sshll.u32 %s6268_s25, 7  ;;  %s220_s7 = scalar_lea.sflag [#allocation5], %s6268_s25 }
  0x60   : > { %s6272_s30 = scalar_lea.vmem [#allocation4], %s5362_s29 }
  0x61   : > { %6060 = dma.done.wait (%p9121_p8), %s220_s7, 2048  }
  0x62   : > { %6062 = vsyncadd (%p9121_p8), %s220_s7, 4294965248  ;;  %p9122_p10 = scmp.eq.s32.totalorder %s6148_s19, 0 }
  0x64   : > { %6064 = dma.done.wait (%p9122_p10), [#allocation8], 1920   ;;  %p9123_p11 = pmov %p9122_p10 }
  0x65   : > { %p9124_p13 = pmov %p9122_p10 }
  0x66   : > { %6066 = vsyncadd (%p9123_p11), [#allocation8], 4294965376 }
  0x67   : > { %6068 = dma.done.wait (%p9124_p13), [#allocation11], 3072   ;;  %p9125_p2 = pmov %p9122_p10 }
  0x68   : > { %vm264_vm0 = vcmask 1040384   ;;  %vm265_vm1 = vsmask.f32 256  ;;  %vm267_vm2 = vcmask 1044484   ;;  %vm268_vm3 = vsmask.f32 4352 }
  0x69   : > { %6070 = vsyncadd (%p9125_p2), [#allocation11], 4294964224  ;;  %v6099_v1 = vmov 0   ;;  %v271_v3 = vld [vmem:[#allocation2 + $0x18] sm:$0x11]  ;;  %v5849_v15 = vld [vmem:[%s6272_s30] sm:$0xff]  }
  0x6a   : > { %vm6286_vm4 = vmand %vm264_vm0, %vm265_vm1  ;;  %710 = vmatprep.mubr.bf16.mxu0 %v6099_v1  ;;  %280 = vst [vmem:[#allocation2 + $0x30] sm:$0xff] %v6099_v1  ;;  %v274_v4 = vld [vmem:[#allocation2 + $0x20] sm:$0x11]  ;;  %v277_v5 = vld [vmem:[#allocation2 + $0x28] sm:$0x11]  ;;  %vm629_vm7 = vcmask 523264  }
  0x6b   : > { %281 = vst [vmem:[#allocation2 + $0x38] sm:$0xff] %v6099_v1  ;;  %282 = vst [vmem:[#allocation2 + $0x40] sm:$0xff] %v6099_v1  ;;  %v5837_v9 = vld [vmem:[#allocation7 + $0x4c] ss:$12 sps:$4 sm:$0xff]   ;;  %v5839_v10 = vld [vmem:[#allocation7 + $0x48] ss:$12 sps:$4 sm:$0xff]   ;;  %5698 = vmatprep.mubr.msk.bf16.mxu1 %vm629_vm7, %v5849_v15 }
  0x6c   : > { %vm269_vm5 = vmand %vm267_vm2, %vm268_vm3  ;;  %v5840_v11 = vld [vmem:[#allocation7 + $0x34] ss:$12 sps:$4 sm:$0xff]   ;;  %686 = vmatprep.subr.bf16.mxu0 %v5837_v9  ;;  %v5842_v12 = vld [vmem:[#allocation7 + $0x30] ss:$12 sps:$4 sm:$0xff]   ;;  %vm1800_vm8 = vcmask 1043456   ;;  %vm1803_vm10 = vcmask 1047556  }
  0x6d   : > { %vm6296_vm6 = vmor %vm269_vm5, %vm6286_vm4  ;;  %687 = vmatpush1.bf16.msra.mxu0 %v5839_v10  ;;  %v5843_v13 = vld [vmem:[#allocation7 + $0x1c] ss:$12 sps:$4 sm:$0xff]   ;;  %v5845_v14 = vld [vmem:[#allocation7 + $0x18] ss:$12 sps:$4 sm:$0xff]   ;;  %vm1801_vm9 = vsmask.f32 7938 }
  0x6e   : > { %v272_v6 = vsel %vm6296_vm6, 0, %v271_v3  ;;  %v275_v7 = vsel %vm6296_vm6, 0, %v274_v4  ;;  %v278_v8 = vsel %vm6296_vm6, 0, %v277_v5  ;;  %688 = vmatprep.subr.bf16.mxu0 %v5840_v11  ;;  %v5850_v16 = vld [vmem:[#allocation7 + $0x50] ss:$12 sps:$4 sm:$0xff]   ;;  %v5851_v22 = vld [vmem:[%s6272_s30 + $0x8] sm:$0xff]   ;;  %vm6413_vm12 = vmand %vm1800_vm8, %vm1801_vm9 }
  0x6f   : > { %273 = vst [vmem:[#allocation2 + $0x18] sm:$0x11] %v272_v6  ;;  %276 = vst [vmem:[#allocation2 + $0x20] sm:$0x11] %v275_v7  ;;  %v5846_v17 = vld [vmem:[#allocation7 + $0x4] ss:$12 sps:$4 sm:$0xff]   ;;  %5690 = vmatprep.subr.bf16.mxu1 %v5850_v16 }
  0x70   : > { %279 = vst [vmem:[#allocation2 + $0x28] sm:$0x11] %v278_v8  ;;  %v5852_v18 = vld [vmem:[#allocation7 + $0x38] ss:$12 sps:$4 sm:$0xff]   ;;  %5691 = vmatpush3.bf16.msra.mxu1 %v5850_v16  ;;  %v5853_v19 = vld [vmem:[#allocation7 + $0x20] ss:$12 sps:$4 sm:$0xff]  }
  0x71   : > { %689 = vmatpush1.bf16.msra.mxu0 %v5842_v12  ;;  %5692 = vmatprep.subr.bf16.mxu1 %v5852_v18  ;;  %v5848_v20 = vld [vmem:[#allocation7] ss:$12 sps:$4 sm:$0xff]   ;;  %v5855_v21 = vld [vmem:[#allocation7 + $0x8] ss:$12 sps:$4 sm:$0xff]   ;;  %v5856_v24 = vld [vmem:[%s6272_s30 + $0x18] sm:$0xff]   ;;  %vm2618_vm15 = vcmask 1046528  }
  0x72   : > { %690 = vmatprep.subr.bf16.mxu0 %v5843_v13  ;;  %v5854_v23 = vld [vmem:[%s6272_s30 + $0x10] sm:$0xff]   ;;  %v5857_v25 = vld [vmem:[%s6272_s30 + $0x20] sm:$0xff]   ;;  %v5858_v26 = vld [vmem:[%s6272_s30 + $0x28] sm:$0xff]   ;;  %vm1804_vm11 = vsmask.f32 7954  ;;  %s5366_s21 = sshll.u32 %s6268_s25, 5 }
  0x73   : > { %v5859_v27 = vld [vmem:[%s6272_s30 + $0x30] sm:$0xff]   ;;  %v5860_v28 = vld [vmem:[%s6272_s30 + $0x38] sm:$0xff]   ;;  %v5861_v29 = vld [vmem:[%s6272_s30 + $0x40] sm:$0xff]   ;;  %s5617_s23 = sshll.u32 %s6148_s19, 9  ;;  %s259_s14 = scalar_lea.vmem [#allocation12], %s5366_s21 }
  0x74   : > { %5693 = vmatpush3.bf16.msra.mxu1 %v5852_v18  ;;  %v5862_v30 = vld [vmem:[%s6272_s30 + $0x48] sm:$0xff]   ;;  %v5863_v31 = vld [vmem:[%s6272_s30 + $0x50] sm:$0xff]   ;;  %v5864_v32 = vld [vmem:[%s6272_s30 + $0x58] sm:$0xff]   ;;  %s5253_s20 = sshll.u32 %s259_s14, 4  ;;  %s8883_s13 = scalar_lea.hbm %s8924_s4, %s5617_s23  ;;  %s5254_s20 = int_to_ptr.vmem [resolvable:$true] %s5253_s20 }
  0x75   : > { %691 = vmatpush1.bf16.msra.mxu0 %v5845_v14  ;;  %5694 = vmatprep.subr.bf16.mxu1 %v5853_v19  ;;  %v5865_v33 = vld [vmem:[%s6272_s30 + $0x60] sm:$0xff]   ;;  %v5866_v34 = vld [vmem:[%s6272_s30 + $0x68] sm:$0xff]   ;;  %v5867_v35 = vld [vmem:[%s6272_s30 + $0x70] sm:$0xff]   ;;  %s5239_s19 = scalar_lea.sflag [#allocation6], %s6268_s25  ;;  %s6017_s24 = scalar_lea.vmem %s5254_s20, 512 }
  0x76   : > { %692 = vmatprep.subr.bf16.mxu0 %v5846_v17  ;;  %v5868_v36 = vld [vmem:[%s6272_s30 + $0x78] sm:$0xff]   ;;  %v293_v37 = vld [vmem:[#allocation2 + $0x60] sm:$0x11]  ;;  %v302_v39 = vld [vmem:[#allocation2 + $0x90] sm:$0x11]  ;;  %p6018_p4 = scmp.ne.s32.totalorder %s5254_s20, %s6017_s24  ;;  %p9732_p6 = scmp.ne.s32.totalorder %s9118_s26, 0 }
  0x77   : > { %v294_v38 = vsel %vm6296_vm6, 0, %v293_v37  ;;  %v303_v40 = vsel %vm6296_vm6, 0, %v302_v39  ;;  %v311_v41 = vld [vmem:[#allocation2 + $0xc0] sm:$0x11]  ;;  %v320_v43 = vld [vmem:[#allocation2 + $0xf0] sm:$0x11]  ;;  %vm1805_vm13 = vmand %vm1803_vm10, %vm1804_vm11 }
  0x78   : > { %5695 = vmatpush3.bf16.msra.mxu1 %v5853_v19  ;;  %295 = vst [vmem:[#allocation2 + $0x60] sm:$0x11] %v294_v38  ;;  %304 = vst [vmem:[#allocation2 + $0x90] sm:$0x11] %v303_v40  ;;  %v312_v42 = vsel %vm6296_vm6, 0, %v311_v41  ;;  %v321_v44 = vsel %vm6296_vm6, 0, %v320_v43  ;;  %p6019_p12 = pnand %p6018_p4, %p9732_p6 }
  0x79   : > { %693 = vmatpush1.bf16.msra.mxu0 %v5848_v20  ;;  %5696 = vmatprep.subr.bf16.mxu1 %v5855_v21  ;;  %313 = vst [vmem:[#allocation2 + $0xc0] sm:$0x11] %v312_v42  ;;  %322 = vst [vmem:[#allocation2 + $0xf0] sm:$0x11] %v321_v44  ;;  %v329_v45 = vld [vmem:[#allocation2 + $0x120] sm:$0x11] }
  0x7a   : > { %v330_v46 = vsel %vm6296_vm6, 0, %v329_v45  ;;  %v338_v47 = vld [vmem:[#allocation2 + $0x150] sm:$0x11]  ;;  %v347_v49 = vld [vmem:[#allocation2 + $0x180] sm:$0x11]  ;;  %vm6419_vm14 = vmor %vm1805_vm13, %vm6413_vm12  ;;  %p6020_p0 = pneg %p6019_p12  ;;  %s6101_s8 = smov [#allocation12]  }
  0x7b   : > { %331 = vst [vmem:[#allocation2 + $0x120] sm:$0x11] %v330_v46  ;;  %v339_v48 = vsel %vm6296_vm6, 0, %v338_v47  ;;  %v348_v50 = vsel %vm6296_vm6, 0, %v347_v49  ;;  %v356_v51 = vld [vmem:[#allocation2 + $0x1b0] sm:$0x11] }
  0x7c   : > { %5395 = vmatmul.mubr.msk.bf16.vlgmr.msra.gmra.mxu0 %vm629_vm7, %v5849_v15  ;;  %5697 = vmatpush3.bf16.msra.mxu1 %v5855_v21  ;;  %340 = vst [vmem:[#allocation2 + $0x150] sm:$0x11] %v339_v48  ;;  %349 = vst [vmem:[#allocation2 + $0x180] sm:$0x11] %v348_v50  ;;  %v357_v52 = vsel %vm6296_vm6, 0, %v356_v51  ;;  %s6021_s6 = sshll.u32 %s6101_s8, 4  ;;  %s6022_s6 = int_to_ptr.vmem [resolvable:$false] %s6021_s6 }
  0x7d   : > { %720 = vmatprep.mubr.bf16.mxu0 %v6099_v1  ;;  %358 = vst [vmem:[#allocation2 + $0x1b0] sm:$0x11] %v357_v52  ;;  %v314_v53 = vld [vmem:[#allocation2 + $0xc8] sm:$0x11]  ;;  %v323_v57 = vld [vmem:[#allocation2 + $0xf8] sm:$0x11]  ;;  %p6024_p5 = scmp.lt.s32.totalorder %s5254_s20, %s6022_s6 }
  0x7e   : > { %v315_v54 = vsel %vm6296_vm6, 0, %v314_v53  ;;  %v296_v55 = vld [vmem:[#allocation2 + $0x68] sm:$0x11]  ;;  %v324_v58 = vsel %vm6296_vm6, 0, %v323_v57  ;;  %v305_v59 = vld [vmem:[#allocation2 + $0x98] sm:$0x11] }
  0x7f   : > { %5699 = vmatmul.mubr.msk.bf16.vlgmr.msra.gmra.mxu1 %vm629_vm7, %v5851_v22  ;;  %316 = vst [vmem:[#allocation2 + $0xc8] sm:$0x11] %v315_v54  ;;  %v297_v56 = vsel %vm6296_vm6, 0, %v296_v55  ;;  %325 = vst [vmem:[#allocation2 + $0xf8] sm:$0x11] %v324_v58  ;;  %v306_v60 = vsel %vm6296_vm6, 0, %v305_v59 }
  0x80   : > { %5702 = vmatprep.mubr.msk.bf16.mxu1 %vm629_vm7, %v5854_v23  ;;  %298 = vst [vmem:[#allocation2 + $0x68] sm:$0x11] %v297_v56  ;;  %v365_v61 = vld [vmem:[#allocation2 + $0x1e0] sm:$0x11]  ;;  %307 = vst [vmem:[#allocation2 + $0x98] sm:$0x11] %v306_v60 }
  0x81   : > { %v366_v62 = vsel %vm6296_vm6, 0, %v365_v61  ;;  %v374_v63 = vld [vmem:[#allocation2 + $0x210] sm:$0x11]  ;;  %v350_v3 = vld [vmem:[#allocation2 + $0x188] sm:$0x11]  ;;  %v1807_v46 = vld [vmem:[#allocation2 + $0x60] sm:$0xff] }
  0x82   : > { %367 = vst [vmem:[#allocation2 + $0x1e0] sm:$0x11] %v366_v62  ;;  %v351_v4 = vsel %vm6296_vm6, 0, %v350_v3  ;;  %v332_v5 = vld [vmem:[#allocation2 + $0x128] sm:$0x11]  ;;  %s6023_s9 = scalar_lea.vmem %s6022_s6, 1024 }
  0x83   : > { %352 = vst [vmem:[#allocation2 + $0x188] sm:$0x11] %v351_v4  ;;  %v333_v6 = vsel %vm6296_vm6, 0, %v332_v5  ;;  %v383_v7 = vld [vmem:[#allocation2 + $0x240] sm:$0x11]  ;;  %p6025_p3 = scmp.lt.s32.totalorder %s6023_s9, %s6017_s24 }
  0x84   : > { %5396 = vmatmul.mubr.msk.bf16.gmra.mxu0 %vm629_vm7, %v5851_v22  ;;  %334 = vst [vmem:[#allocation2 + $0x128] sm:$0x11] %v333_v6  ;;  %v384_v8 = vsel %vm6296_vm6, 0, %v383_v7  ;;  %v359_v9 = vld [vmem:[#allocation2 + $0x1b8] sm:$0x11] }
  0x85   : > { %730 = vmatprep.mubr.bf16.mxu0 %v6099_v1  ;;  %385 = vst [vmem:[#allocation2 + $0x240] sm:$0x11] %v384_v8  ;;  %v360_v10 = vsel %vm6296_vm6, 0, %v359_v9  ;;  %v341_v11 = vld [vmem:[#allocation2 + $0x158] sm:$0x11]  ;;  %p6026_p7 = por %p6025_p3, %p6024_p5 }
  0x86   : > { %361 = vst [vmem:[#allocation2 + $0x1b8] sm:$0x11] %v360_v10  ;;  %v342_v12 = vsel %vm6296_vm6, 0, %v341_v11  ;;  %v386_v13 = vld [vmem:[#allocation2 + $0x248] sm:$0x11] }
  0x87   : > { %5703 = vmatmul.mubr.msk.bf16.gmra.mxu1 %vm629_vm7, %v5856_v24  ;;  %343 = vst [vmem:[#allocation2 + $0x158] sm:$0x11] %v342_v12  ;;  %v387_v14 = vsel %vm6296_vm6, 0, %v386_v13  ;;  %v368_v15 = vld [vmem:[#allocation2 + $0x1e8] sm:$0x11]  ;;  %p6027_p9 = pnand %p6026_p7, %p6020_p0 }
  0x88   : > { %5706 = vmatprep.mubr.msk.bf16.mxu1 %vm629_vm7, %v5857_v25  ;;  %388 = vst [vmem:[#allocation2 + $0x248] sm:$0x11] %v387_v14  ;;  %v369_v16 = vsel %vm6296_vm6, 0, %v368_v15  ;;  %v392_v18 = vld [vmem:[#allocation2 + $0x270] sm:$0x11] }
  0x89   : > { %370 = vst [vmem:[#allocation2 + $0x1e8] sm:$0x11] %v369_v16  ;;  %v393_v20 = vsel %vm6296_vm6, 0, %v392_v18  ;;  %v1813_v47 = vld [vmem:[#allocation2 + $0x78] sm:$0x11] }
  0x8a   : > { %394 = vst [vmem:[#allocation2 + $0x270] sm:$0x11] %v393_v20  ;;  %v1825_v5 = vld [vmem:[#allocation2 + $0xa8] sm:$0x11]  ;;  %v1840_v9 = vld [vmem:[#allocation2 + $0xe0] sm:$0x1] }
  0x8b   : > { %v1834_v15 = vld [vmem:[#allocation2 + $0xc8] sm:$0xf] }
  0x8c   : > { %5397 = vmatmul.mubr.msk.bf16.gmra.mxu0 %vm629_vm7, %v5854_v23 }
  0x8d   : > { %740 = vmatprep.mubr.bf16.mxu0 %v6099_v1 }
  0x8f   : > { %5707 = vmatmul.mubr.msk.bf16.gmra.mxu1 %vm629_vm7, %v5858_v26 }
  0x90   : > { %5710 = vmatprep.mubr.msk.bf16.mxu1 %vm629_vm7, %v5859_v27 }
  0x94   : > { %5398 = vmatmul.mubr.msk.bf16.gmra.mxu0 %vm629_vm7, %v5856_v24 }
  0x95   : > { %750 = vmatprep.mubr.bf16.mxu0 %v6099_v1 }
  0x97   : > { %5711 = vmatmul.mubr.msk.bf16.gmra.mxu1 %vm629_vm7, %v5860_v28 }
  0x98   : > { %5714 = vmatprep.mubr.msk.bf16.mxu1 %vm629_vm7, %v5861_v29 }
  0x9c   : > { %5399 = vmatmul.mubr.msk.bf16.gmra.mxu0 %vm629_vm7, %v5857_v25 }
  0x9d   : > { %760 = vmatprep.mubr.bf16.mxu0 %v6099_v1 }
  0x9f   : > { %5715 = vmatmul.mubr.msk.bf16.gmra.mxu1 %vm629_vm7, %v5862_v30 }
  0xa0   : > { %5718 = vmatprep.mubr.msk.bf16.mxu1 %vm629_vm7, %v5863_v31 }
  0xa4   : > { %5400 = vmatmul.mubr.msk.bf16.gmra.mxu0 %vm629_vm7, %v5858_v26 }
  0xa5   : > { %770 = vmatprep.mubr.bf16.mxu0 %v6099_v1 }
  0xa7   : > { %5719 = vmatmul.mubr.msk.bf16.gmra.mxu1 %vm629_vm7, %v5864_v32 }
  0xa8   : > { %5722 = vmatprep.mubr.msk.bf16.mxu1 %vm629_vm7, %v5865_v33 }
  0xac   : > { %5401 = vmatmul.mubr.msk.bf16.gmra.mxu0 %vm629_vm7, %v5859_v27 }
  0xad   : > { %780 = vmatprep.mubr.bf16.mxu0 %v6099_v1 }
  0xaf   : > { %5723 = vmatmul.mubr.msk.bf16.gmra.mxu1 %vm629_vm7, %v5866_v34 }
  0xb0   : > { %5726 = vmatprep.mubr.msk.bf16.mxu1 %vm629_vm7, %v5867_v35 }
  0xb4   : > { %5402 = vmatmul.mubr.msk.bf16.gmra.mxu0 %vm629_vm7, %v5860_v28 }
  0xb5   : > { %790 = vmatprep.mubr.bf16.mxu0 %v6099_v1 }
  0xb7   : > { %5727 = vmatmul.mubr.msk.bf16.gmra.mxu1 %vm629_vm7, %v5868_v36 }
  0xbc   : > { %5403 = vmatmul.mubr.msk.bf16.gmra.mxu0 %vm629_vm7, %v5861_v29 }
  0xbd   : > { %800 = vmatprep.mubr.bf16.mxu0 %v6099_v1 }
  0xc4   : > { %5404 = vmatmul.mubr.msk.bf16.gmra.mxu0 %vm629_vm7, %v5862_v30 }
  0xc5   : > { %810 = vmatprep.mubr.bf16.mxu0 %v6099_v1 }
  0xcc   : > { %5405 = vmatmul.mubr.msk.bf16.gmra.mxu0 %vm629_vm7, %v5863_v31 }
  0xcd   : > { %820 = vmatprep.mubr.bf16.mxu0 %v6099_v1 }
  0xd4   : > { %5406 = vmatmul.mubr.msk.bf16.gmra.mxu0 %vm629_vm7, %v5864_v32 }
  0xd5   : > { %830 = vmatprep.mubr.bf16.mxu0 %v6099_v1 }
  0xdc   : > { %5407 = vmatmul.mubr.msk.bf16.gmra.mxu0 %vm629_vm7, %v5865_v33  ;;  %v2538_v33 = vlaneseq }
  0xdd   : > { %840 = vmatprep.mubr.bf16.mxu0 %v6099_v1 }
  0xde   : > { %v6423_v48 = vshrl.u32 %v2538_v33, 7 }
  0xe0   : > { %9134 = vst [vmem:[#allocation17_spill] sm:$0xff] %v6423_v48  ;;  %v2821_v33 = vsub.s32 4, %v6423_v48 }
  0xe4   : > { %5408 = vmatmul.mubr.msk.bf16.gmra.mxu0 %vm629_vm7, %v5866_v34 }
  0xe5   : > { %850 = vmatprep.mubr.bf16.mxu0 %v6099_v1 }
  0xec   : > { %5409 = vmatmul.mubr.msk.bf16.gmra.mxu0 %vm629_vm7, %v5867_v35 }
  0xed   : > { %860 = vmatprep.mubr.bf16.mxu0 %v6099_v1  ;;  %v375_v1 = vsel %vm6296_vm6, 0, %v374_v63 }
  0xee   : > { %376 = vst [vmem:[#allocation2 + $0x210] sm:$0x11] %v375_v1  ;;  %v1819_v1 = vld [vmem:[#allocation2 + $0x90] sm:$0xff] }
  0xf4   : > { %5410 = vmatmul.mubr.msk.bf16.gmra.mxu0 %vm629_vm7, %v5868_v36 }
 0x13c   : > { %v712_v17 = vpop.f32.mrf.mxu0 }
 0x13d   : > { %v1032_v19 = vmax.f32 %v712_v17, 0.0 }
 0x13e   : > { %v714_v21 = vpop.f32.mrf.mxu0 }
 0x13f   : > { %v1033_v22 = vmax.f32 %v714_v21, 0.0  ;;  %v1128_v24 = vmin.f32 %v1032_v19, 6.0  ;;  %v5700_v28 = vpop.f32.mrf.mxu1  ;;  %v2511_v21 = vld [vmem:[#allocation9] sm:$0xff] }
 0x140   : > { %v716_v23 = vpop.f32.mrf.mxu0  ;;  %v1040_v31 = vmax.f32 %v5700_v28, 0.0 }
 0x141   : > { %v1129_v25 = vmin.f32 %v1033_v22, 6.0  ;;  %v1035_v26 = vmax.f32 %v716_v23, 0.0  ;;  %v905_v4 = vpop.f32.mrf.mxu1 }
 0x142   : > { %v718_v27 = vpop.f32.mrf.mxu0  ;;  %v1136_v40 = vmin.f32 %v1040_v31, 6.0  ;;  %v1034_v10 = vmax.f32 %v905_v4, 0.0  ;;  %v6437_v31 = vunpack.c.l.bf16 %v2511_v21 }
 0x143   : > { %v5553_v29 = vpack.c.bf16 %v1129_v25, %v1128_v24  ;;  %v1036_v30 = vmax.f32 %v718_v27, 0.0  ;;  %v1131_v36 = vmin.f32 %v1035_v26, 6.0 }
 0x144   : > { %v722_v34 = vpop.f32.mrf.mxu0  ;;  %v5558_v51 = vpack.c.bf16 %v1136_v40, %v1136_v40 }
 0x145   : > { %v1481_v35 = vshrl.u32 %v5553_v29, 16  ;;  %v1132_v37 = vmin.f32 %v1036_v30, 6.0  ;;  %v1038_v38 = vmax.f32 %v722_v34, 0.0  ;;  %v1484_v42 = vshll.u32 %v5553_v29, 16 }
 0x146   : > { %v724_v39 = vpop.f32.mrf.mxu0  ;;  %v1520_v59 = vshrl.u32 %v5558_v51, 16  ;;  %v1523_v60 = vshll.u32 %v5558_v51, 16 }
 0x147   : > { %v1483_v41 = vrot.slane %v1481_v35, 7  ;;  %v5555_v43 = vpack.c.bf16 %v1132_v37, %v1131_v36  ;;  %v1039_v44 = vmax.f32 %v724_v39, 0.0  ;;  %v1134_v49 = vmin.f32 %v1038_v38, 6.0  ;;  %v1831_v36 = vld [vmem:[#allocation2 + $0xc0] sm:$0xff]  ;;  %v1837_v37 = vld [vmem:[#allocation2 + $0xd8] sm:$0x11] }
 0x148   : > { %v726_v50 = vpop.f32.mrf.mxu0  ;;  %v1522_v8 = vrot.slane %v1520_v59, 7  ;;  %v2584_v39 = vsub.s32 1, %v6423_v48 }
 0x149   : > { %v1486_v52 = vor.u32 %v1484_v42, %v1483_v41  ;;  %v1494_v53 = vrot.slane %v1483_v41, 4  ;;  %v1497_v54 = vshrl.u32 %v5555_v43, 16  ;;  %v1500_v55 = vshll.u32 %v5555_v43, 16  ;;  %v1843_v42 = vld [vmem:[#allocation2 + $0xf0] sm:$0xff] }
 0x14a   : > { %v1135_v56 = vmin.f32 %v1039_v44, 6.0  ;;  %v1041_v57 = vmax.f32 %v726_v50, 0.0  ;;  %v728_v58 = vpop.f32.mrf.mxu0  ;;  %v1525_v19 = vor.u32 %v1523_v60, %v1522_v8  ;;  %v1527_v20 = vrot.slane %v1522_v8, 4 }
 0x14b   : > { %v1808_v61 = vsel %vm6419_vm14, %v1486_v52, %v1807_v46  ;;  %v1814_v62 = vsel %vm6296_vm6, %v1494_v53, %v1813_v47  ;;  %v1499_v63 = vrot.slane %v1497_v54, 7  ;;  %v1042_v3 = vmax.f32 %v728_v58, 0.0  ;;  %v1849_v47 = vld [vmem:[#allocation2 + $0x108] sm:$0x11] }
 0x14c   : > { %1809 = vst [vmem:[#allocation2 + $0x60] sm:$0xff] %v1808_v61  ;;  %1815 = vst [vmem:[#allocation2 + $0x78] sm:$0x11] %v1814_v62  ;;  %v5557_v6 = vpack.c.bf16 %v1135_v56, %v1134_v49  ;;  %v732_v7 = vpop.f32.mrf.mxu0  ;;  %v1137_v13 = vmin.f32 %v1041_v57, 6.0  ;;  %v1835_v28 = vsel %vm6413_vm12, %v1525_v19, %v1834_v15  ;;  %v1841_v29 = vsel %vm6286_vm4, %v1527_v20, %v1840_v9  ;;  %v2512_v56 = vld [vmem:[#allocation9 + $0x8] sm:$0xf] }
 0x14d   : > { %v1502_v11 = vor.u32 %v1500_v55, %v1499_v63  ;;  %v1510_v12 = vrot.slane %v1499_v63, 4  ;;  %v1138_v14 = vmin.f32 %v1042_v3, 6.0  ;;  %v1044_v17 = vmax.f32 %v732_v7, 0.0  ;;  %1836 = vst [vmem:[#allocation2 + $0xc8] sm:$0xf] %v1835_v28 }
 0x14e   : > { %v1513_v16 = vshrl.u32 %v5557_v6, 16  ;;  %v734_v18 = vpop.f32.mrf.mxu0  ;;  %v1516_v24 = vshll.u32 %v5557_v6, 16  ;;  %1842 = vst [vmem:[#allocation2 + $0xe0] sm:$0x1] %v1841_v29  ;;  %v6441_v44 = vunpack.c.h.bf16 %v2511_v21  ;;  %v1130_v50 = vmin.f32 %v1034_v10, 6.0 }
 0x14f   : > { %v1820_v22 = vsel %vm6419_vm14, %v1502_v11, %v1819_v1  ;;  %v1826_v23 = vsel %vm6296_vm6, %v1510_v12, %v1825_v5  ;;  %v5559_v25 = vpack.c.bf16 %v1138_v14, %v1137_v13  ;;  %v1045_v27 = vmax.f32 %v734_v18, 0.0 }
 0x150   : > { %1821 = vst [vmem:[#allocation2 + $0x90] sm:$0xff] %v1820_v22  ;;  %1827 = vst [vmem:[#allocation2 + $0xa8] sm:$0x11] %v1826_v23  ;;  %v1515_v26 = vrot.slane %v1513_v16, 7  ;;  %v1140_v49 = vmin.f32 %v1044_v17, 6.0  ;;  %v6448_v58 = vrot.slane %v6437_v31, %v2821_v33  ;;  %v6455_v5 = vrot.slane %v6441_v44, %v2821_v33  ;;  %v736_v6 = vpop.f32.mrf.mxu0 }
 0x151   : > { %v1529_v30 = vshrl.u32 %v5559_v25, 16  ;;  %v1532_v41 = vshll.u32 %v5559_v25, 16  ;;  %v1141_v43 = vmin.f32 %v1045_v27, 6.0  ;;  %9135 = vst [vmem:[#allocation18_spill] sm:$0xff] %v6441_v44  ;;  %v6457_v7 = vunpack.c.l.bf16 %v2512_v56 }
 0x152   : > { %v1518_v34 = vor.u32 %v1516_v24, %v1515_v26  ;;  %v1526_v35 = vrot.slane %v1515_v26, 4  ;;  %v6460_v9 = vrot.slane %v6437_v31, %v2584_v39  ;;  %v6463_v11 = vrot.slane %v6441_v44, %v2584_v39  ;;  %v6485_v24 = vpop.f32.mrf.mxu1 }
 0x153   : > { %v2787_v38 = vld [vmem:[#allocation2 + $0x60] sm:$0xff]   ;;  %v1531_v40 = vrot.slane %v1529_v30, 7  ;;  %v2788_v46 = vld [vmem:[#allocation2 + $0x78] sm:$0x1]  ;;  %v3521_v51 = vld [vmem:[#allocation2 + $0x7c] sm:$0x1]  ;;  %v5561_v1 = vpack.c.bf16 %v1141_v43, %v1140_v49  ;;  %v6465_v12 = vpack.c.bf16 %v1130_v50, %v1130_v50  ;;  %v6483_v23 = vrot.slane %v6457_v7, %v2821_v33 }
 0x154   : > { %v1832_v52 = vsel %vm6419_vm14, %v1518_v34, %v1831_v36  ;;  %v1838_v53 = vsel %vm6296_vm6, %v1526_v35, %v1837_v37  ;;  %v2803_v57 = vunpack.c.l.bf16 %v2787_v38  ;;  %v2804_v59 = vunpack.c.l.bf16 %v2788_v46  ;;  %9136 = vst [vmem:[#allocation19_spill] sm:$0xff] %v6463_v11  ;;  %v738_v37 = vpop.f32.mrf.mxu0 }
 0x155   : > { %v1534_v54 = vor.u32 %v1532_v41, %v1531_v40  ;;  %v1542_v55 = vrot.slane %v1531_v40, 4  ;;  %1833 = vst [vmem:[#allocation2 + $0xc0] sm:$0xff] %v1832_v52  ;;  %1839 = vst [vmem:[#allocation2 + $0xd8] sm:$0x11] %v1838_v53  ;;  %v3536_v3 = vunpack.c.h.bf16 %v2787_v38  ;;  %v3537_v4 = vunpack.c.l.bf16 %v3521_v51  ;;  %v1855_v53 = vld [vmem:[#allocation2 + $0x120] sm:$0xff] }
 0x156   : > { %v6468_v16 = vsub.s32 7, %v6423_v48  ;;  %v6471_v17 = vmul.f32 %v6448_v58, %v2803_v57  ;;  %v6474_v18 = vmul.f32 %v6448_v58, %v2804_v59  ;;  %v1545_v19 = vshrl.u32 %v5561_v1, 16  ;;  %v6507_v59 = vld [vmem:[#allocation2 + $0xc8] sm:$0xf] }
 0x157   : > { %v2552_v60 = vld [vmem:[#allocation2 + $0x90] sm:$0xff]   ;;  %v2553_v61 = vld [vmem:[#allocation2 + $0xa8] sm:$0x1]  ;;  %v1844_v62 = vsel %vm6419_vm14, %v1534_v54, %v1843_v42  ;;  %v1850_v63 = vsel %vm6296_vm6, %v1542_v55, %v1849_v47  ;;  %v3287_v10 = vld [vmem:[#allocation2 + $0xac] sm:$0x1]  ;;  %v1047_v20 = vmax.f32 %v736_v6, 0.0  ;;  %v6477_v21 = vmul.f32 %v6455_v5, %v3536_v3  ;;  %v742_v6 = vpop.f32.mrf.mxu0 }
 0x158   : > { %1845 = vst [vmem:[#allocation2 + $0xf0] sm:$0xff] %v1844_v62  ;;  %1851 = vst [vmem:[#allocation2 + $0x108] sm:$0x11] %v1850_v63  ;;  %v2568_v8 = vunpack.c.l.bf16 %v2552_v60  ;;  %v2569_v13 = vunpack.c.l.bf16 %v2553_v61  ;;  %v3302_v14 = vunpack.c.h.bf16 %v2552_v60  ;;  %v3303_v15 = vunpack.c.l.bf16 %v3287_v10  ;;  %v6499_v41 = vld [vmem:[#allocation2 + $0x90] sm:$0xff]   ;;  %v6503_v49 = vld [vmem:[#allocation2 + $0xa8] sm:$0x1] }
 0x159   : > { %9137 = vst [vmem:[#allocation20_spill] sm:$0xff] %v6468_v16  ;;  %9138 = vst [vmem:[#allocation21_spill] sm:$0xff] %v6477_v21  ;;  %v6480_v22 = vmul.f32 %v6455_v5, %v3537_v4  ;;  %v6488_v25 = vrot.slane %v6457_v7, %v2584_v39  ;;  %v1547_v29 = vrot.slane %v1545_v19, 7  ;;  %v1488_v30 = vshrl.u32 %v6465_v12, 16  ;;  %v6505_v55 = vld [vmem:[#allocation2 + $0xac] sm:$0x1] }
 0x15a   : > { %v2588_v26 = vmul.f32 %v6460_v9, %v2568_v8  ;;  %v1043_v34 = vmax.f32 %v6485_v24, 0.0  ;;  %v2589_v35 = vmul.f32 %v6460_v9, %v2569_v13  ;;  %v3322_v33 = vmul.f32 %v6463_v11, %v3302_v14  ;;  %9141 = vst [vmem:[#allocation24_spill] sm:$0xff] %v6499_v41  ;;  %9142 = vst [vmem:[#allocation25_spill] sm:$0xff] %v6503_v49  ;;  %v6515_v4 = vld [vmem:[#allocation2 + $0xe0] sm:$0x1]  ;;  %v744_v13 = vpop.f32.mrf.mxu0 }
 0x15b   : > { %9139 = vst [vmem:[#allocation22_spill] sm:$0xff] %v6480_v22  ;;  %9140 = vst [vmem:[#allocation23_spill] sm:$0xff] %v6488_v25  ;;  %v3323_v36 = vmul.f32 %v6463_v11, %v3303_v15  ;;  %v1491_v38 = vshll.u32 %v6465_v12, 16  ;;  %v1548_v42 = vshll.u32 %v5561_v1, 16  ;;  %v1143_v43 = vmin.f32 %v1047_v20, 6.0 }
 0x15c   : > { %v2789_v27 = vld [vmem:[#allocation2 + $0xc0] sm:$0xff]   ;;  %v2790_v28 = vld [vmem:[#allocation2 + $0xd8] sm:$0x1]  ;;  %v3523_v52 = vld [vmem:[#allocation2 + $0xdc] sm:$0x1]  ;;  %v2622_v54 = vrot.slane %v2588_v26, 1  ;;  %v6511_v60 = vrot.slane %v6457_v7, %v6468_v16 }
 0x15d   : > { %v2805_v50 = vunpack.c.l.bf16 %v2789_v27  ;;  %v2806_v51 = vunpack.c.l.bf16 %v2790_v28  ;;  %9143 = vst [vmem:[#allocation26_spill] sm:$0xff] %v6505_v55  ;;  %v1550_v56 = vor.u32 %v1548_v42, %v1547_v29  ;;  %v1048_v57 = vmax.f32 %v738_v37, 0.0  ;;  %v1873_v24 = vld [vmem:[#allocation2 + $0x168] sm:$0x11]  ;;  %v1948_v49 = vld [vmem:[#allocation2 + $0x290] sm:$0x1] }
 0x15e   : > { %9144 = vst [vmem:[#allocation27_spill] sm:$0xff] %v6511_v60  ;;  %v2623_v61 = vrot.slane %v2589_v35, 1  ;;  %v3355_v62 = vrot.slane %v3322_v33, 1  ;;  %v3356_v63 = vrot.slane %v3323_v36, 1  ;;  %v3538_v1 = vunpack.c.h.bf16 %v2789_v27  ;;  %v1861_v27 = vld [vmem:[#allocation2 + $0x138] sm:$0x11] }
 0x15f   : > { %v6513_v3 = vld [vmem:[#allocation2 + $0xf0] sm:$0xff]   ;;  %v3539_v14 = vunpack.c.l.bf16 %v3523_v52  ;;  %v6522_v19 = vmul.f32 %v6448_v58, %v2805_v50  ;;  %v6525_v20 = vmul.f32 %v6448_v58, %v2806_v51  ;;  %v2555_v26 = vld [vmem:[#allocation2 + $0x108] sm:$0x1]  ;;  %v4270_v28 = vunpack.c.l.bf16 %v6507_v59  ;;  %v3289_v47 = vld [vmem:[#allocation2 + $0x10c] sm:$0x1] }
 0x160   : > { %v2570_v35 = vunpack.c.l.bf16 %v6513_v3  ;;  %v6529_v33 = vld [vmem:[#allocation2 + $0xf0] sm:$0xff]   ;;  %v1558_v36 = vrot.slane %v1547_v29, 4  ;;  %v1856_v37 = vsel %vm6419_vm14, %v1550_v56, %v1855_v53  ;;  %v4271_v42 = vunpack.c.l.bf16 %v6515_v4  ;;  %v6596_v55 = vld [vmem:[#allocation2 + $0x10c] sm:$0x1] }
 0x161   : > { %9145 = vst [vmem:[#allocation28_spill] sm:$0xff] %v6529_v33  ;;  %v6535_v50 = vsel %vm2618_vm15, %v2622_v54, %v2623_v61  ;;  %v6538_v51 = vsel %vm2618_vm15, %v3355_v62, %v3356_v63  ;;  %v6541_v52 = vmul.f32 %v6455_v5, %v3538_v1  ;;  %1857 = vst [vmem:[#allocation2 + $0x120] sm:$0xff] %v1856_v37  ;;  %v1144_v15 = vmin.f32 %v1048_v57, 6.0  ;;  %v6554_v1 = vld [vmem:[#allocation2 + $0x108] sm:$0x1]  ;;  %v6563_v54 = vpop.f32.mrf.mxu0  ;;  %v1867_v61 = vld [vmem:[#allocation2 + $0x150] sm:$0xff] }
 0x162   : > { %9146 = vst [vmem:[#allocation29_spill] sm:$0xff] %v6538_v51  ;;  %v6544_v46 = vmul.f32 %v6455_v5, %v3539_v14  ;;  %v2571_v29 = vunpack.c.l.bf16 %v2555_v26  ;;  %v1862_v53 = vsel %vm6296_vm6, %v1558_v36, %v1861_v27  ;;  %v1050_v56 = vmax.f32 %v742_v6, 0.0  ;;  %9149 = vst [vmem:[#allocation32_spill] sm:$0xff] %v6554_v1  ;;  %v1810_v62 = vld [vmem:[#allocation2 + $0x68] sm:$0xf]  ;;  %v1927_v1 = vld [vmem:[#allocation2 + $0x240] sm:$0xff] }
 0x163   : > { %9147 = vst [vmem:[#allocation30_spill] sm:$0xff] %v6541_v52  ;;  %1863 = vst [vmem:[#allocation2 + $0x138] sm:$0x11] %v1862_v53  ;;  %v5563_v63 = vpack.c.bf16 %v1144_v15, %v1143_v43  ;;  %v6552_v57 = vmul.f32 %v6460_v9, %v2570_v35  ;;  %v1490_v14 = vrot.slane %v1488_v30, 7  ;;  %v1051_v26 = vmax.f32 %v744_v13, 0.0 }
 0x164   : > { %9148 = vst [vmem:[#allocation31_spill] sm:$0xff] %v6544_v46  ;;  %v1139_v6 = vmin.f32 %v1043_v34, 6.0  ;;  %v3304_v27 = vunpack.c.h.bf16 %v6513_v3  ;;  %v3305_v36 = vunpack.c.l.bf16 %v3289_v47  ;;  %v1146_v10 = vmin.f32 %v1050_v56, 6.0  ;;  %v1816_v53 = vld [vmem:[#allocation2 + $0x80] sm:$0x1]  ;;  %9152 = vst [vmem:[#allocation35_spill] sm:$0xff] %v6596_v55 }
 0x165   : > { %v1561_v37 = vshrl.u32 %v5563_v63, 16  ;;  %v1493_v43 = vor.u32 %v1491_v38, %v1490_v14  ;;  %v1495_v15 = vrot.slane %v1490_v14, 4  ;;  %v1147_v35 = vmin.f32 %v1051_v26, 6.0 }
 0x166   : > { %v5560_v8 = vpack.c.bf16 %v1139_v6, %v1139_v6  ;;  %v1564_v13 = vshll.u32 %v5563_v63, 16  ;;  %v6573_v26 = vmul.f32 %v6460_v9, %v2571_v29  ;;  %v6594_v59 = vmul.f32 %v6483_v23, %v4271_v42 }
 0x167   : > { %v1563_v34 = vrot.slane %v1561_v37, 7  ;;  %v1811_v47 = vsel %vm6413_vm12, %v1493_v43, %v1810_v62  ;;  %v1817_v56 = vsel %vm6286_vm4, %v1495_v15, %v1816_v53  ;;  %v5565_v12 = vpack.c.bf16 %v1147_v35, %v1146_v10  ;;  %v908_v43 = vpop.f32.mrf.mxu1  ;;  %v748_v15 = vpop.f32.mrf.mxu0 }
 0x168   : > { %v2791_v3 = vld [vmem:[#allocation2 + $0x120] sm:$0xff]   ;;  %v1536_v38 = vshrl.u32 %v5560_v8, 16  ;;  %1812 = vst [vmem:[#allocation2 + $0x68] sm:$0xf] %v1811_v47  ;;  %1818 = vst [vmem:[#allocation2 + $0x80] sm:$0x1] %v1817_v56  ;;  %v6577_v62 = vmul.f32 %v6463_v11, %v3304_v27  ;;  %v6580_v37 = vmul.f32 %v6463_v11, %v3305_v36  ;;  %v6585_v35 = vmul.f32 %v6483_v23, %v4270_v28 }
 0x169   : > { %v1566_v6 = vor.u32 %v1564_v13, %v1563_v34  ;;  %v1574_v30 = vrot.slane %v1563_v34, 4  ;;  %v1577_v53 = vshrl.u32 %v5565_v12, 16  ;;  %v2807_v29 = vunpack.c.l.bf16 %v2791_v3  ;;  %9151 = vst [vmem:[#allocation34_spill] sm:$0xff] %v6594_v59  ;;  %v1879_v28 = vld [vmem:[#allocation2 + $0x180] sm:$0xff] }
 0x16a   : > { %v2792_v10 = vld [vmem:[#allocation2 + $0x138] sm:$0x1]  ;;  %9150 = vst [vmem:[#allocation33_spill] sm:$0xff] %v6585_v35  ;;  %v1580_v34 = vshll.u32 %v5565_v12, 16  ;;  %v1037_v13 = vmax.f32 %v908_v43, 0.0  ;;  %v1538_v14 = vrot.slane %v1536_v38, 7  ;;  %v3540_v40 = vunpack.c.h.bf16 %v2791_v3 }
 0x16b   : > { %v3525_v47 = vld [vmem:[#allocation2 + $0x13c] sm:$0x1]  ;;  %v1868_v27 = vsel %vm6419_vm14, %v1566_v6, %v1867_v61  ;;  %v1874_v36 = vsel %vm6296_vm6, %v1574_v30, %v1873_v24  ;;  %v1579_v56 = vrot.slane %v1577_v53, 7  ;;  %v2808_v39 = vunpack.c.l.bf16 %v2792_v10  ;;  %v1852_v43 = vld [vmem:[#allocation2 + $0x110] sm:$0x1] }
 0x16c   : > { %1869 = vst [vmem:[#allocation2 + $0x150] sm:$0xff] %v1868_v27  ;;  %1875 = vst [vmem:[#allocation2 + $0x168] sm:$0x11] %v1874_v36  ;;  %v1885_v12 = vld [vmem:[#allocation2 + $0x198] sm:$0x11]  ;;  %v1054_v63 = vmax.f32 %v748_v15, 0.0  ;;  %v6599_v38 = vmul.f32 %v6448_v58, %v2807_v29  ;;  %v3541_v3 = vunpack.c.l.bf16 %v3525_v47  ;;  %v6611_v47 = vmul.f32 %v6455_v5, %v3540_v40 }
 0x16d   : > { %v1582_v61 = vor.u32 %v1580_v34, %v1579_v56  ;;  %v1590_v6 = vrot.slane %v1579_v56, 4  ;;  %v1539_v30 = vshll.u32 %v5560_v8, 16  ;;  %v1543_v24 = vrot.slane %v1538_v14, 4  ;;  %v1846_v10 = vld [vmem:[#allocation2 + $0xf8] sm:$0xf] }
 0x16e   : > { %9153 = vst [vmem:[#allocation36_spill] sm:$0xff] %v6599_v38  ;;  %v1053_v4 = vmax.f32 %v6563_v54, 0.0  ;;  %v1133_v53 = vmin.f32 %v1037_v13, 6.0  ;;  %9154 = vst [vmem:[#allocation37_spill] sm:$0xff] %v6611_v47  ;;  %v1150_v54 = vmin.f32 %v1054_v63, 6.0  ;;  %v2626_v13 = vrot.slane %v6573_v26, 1 }
 0x16f   : > { %v1880_v42 = vsel %vm6419_vm14, %v1582_v61, %v1879_v28  ;;  %v1886_v15 = vsel %vm6296_vm6, %v1590_v6, %v1885_v12  ;;  %v1541_v27 = vor.u32 %v1539_v30, %v1538_v14  ;;  %v1853_v34 = vsel %vm6286_vm4, %v1543_v24, %v1852_v43  ;;  %v4252_v36 = vld [vmem:[#allocation2 + $0x68] sm:$0xf]  ;;  %v4253_v28 = vld [vmem:[#allocation2 + $0x80] sm:$0x1]  ;;  %v6620_v43 = vpop.f32.mrf.mxu1 }
 0x170   : > { %1881 = vst [vmem:[#allocation2 + $0x180] sm:$0xff] %v1880_v42  ;;  %1887 = vst [vmem:[#allocation2 + $0x198] sm:$0x11] %v1886_v15  ;;  %v3358_v56 = vrot.slane %v6577_v62, 1  ;;  %v6616_v14 = vmul.f32 %v6448_v58, %v2808_v39  ;;  %v3359_v40 = vrot.slane %v6580_v37, 1  ;;  %v6624_v61 = vmul.f32 %v6455_v5, %v3541_v3 }
 0x171   : > { %1854 = vst [vmem:[#allocation2 + $0x110] sm:$0x1] %v1853_v34  ;;  %v1847_v12 = vsel %vm6413_vm12, %v1541_v27, %v1846_v10  ;;  %v1149_v26 = vmin.f32 %v1053_v4, 6.0  ;;  %v4268_v24 = vunpack.c.l.bf16 %v4252_v36  ;;  %v6629_v42 = vpack.c.bf16 %v1133_v53, %v1133_v53  ;;  %v6631_v10 = vpop.f32.mrf.mxu0  ;;  %v921_v29 = vpop.f32.mrf.mxu1 }
 0x172   : > { %9155 = vst [vmem:[#allocation38_spill] sm:$0xff] %v6616_v14  ;;  %9156 = vst [vmem:[#allocation39_spill] sm:$0xff] %v6624_v61  ;;  %v4269_v27 = vunpack.c.l.bf16 %v4253_v28  ;;  %v1052_v53 = vmax.f32 %v6620_v43, 0.0  ;;  %v1046_v35 = vmax.f32 %v921_v29, 0.0  ;;  %v9158_v37 = vrot.slane %v6552_v57, 1 }
 0x173   : > { %1848 = vst [vmem:[#allocation2 + $0xf8] sm:$0xf] %v1847_v12  ;;  %v2556_v6 = vld [vmem:[#allocation2 + $0x150] sm:$0xff]   ;;  %v2557_v39 = vld [vmem:[#allocation2 + $0x168] sm:$0x1]  ;;  %v5567_v34 = vpack.c.bf16 %v1150_v54, %v1149_v26  ;;  %v6646_v54 = vsel %vm2618_vm15, %v3358_v56, %v3359_v40  ;;  %v1504_v43 = vshrl.u32 %v6629_v42, 16 }
 0x174   : > { %v2572_v15 = vunpack.c.l.bf16 %v2556_v6  ;;  %v3291_v3 = vld [vmem:[#allocation2 + $0x16c] sm:$0x1]  ;;  %v2573_v4 = vunpack.c.l.bf16 %v2557_v39  ;;  %v3306_v63 = vunpack.c.h.bf16 %v2556_v6  ;;  %v6636_v30 = vld [vmem:[#allocation2 + $0x150] sm:$0xff]   ;;  %v6643_v28 = vsel %vm2618_vm15, %v9158_v37, %v2626_v13  ;;  %9160 = vst [vmem:[#allocation42_spill] sm:$0xff] %v6646_v54  ;;  %v6648_v26 = vld [vmem:[#allocation2 + $0x168] sm:$0x1] }
 0x175   : > { %v3307_v62 = vunpack.c.l.bf16 %v3291_v3  ;;  %9157 = vst [vmem:[#allocation40_spill] sm:$0xff] %v6636_v30  ;;  %9159 = vst [vmem:[#allocation41_spill] sm:$0xff] %v6643_v28  ;;  %v6651_v6 = vmul.f32 %v6483_v23, %v4268_v24  ;;  %v6657_v29 = vld [vmem:[#allocation2 + $0x16c] sm:$0x1]  ;;  %v6660_v57 = vmul.f32 %v6483_v23, %v4269_v27  ;;  %v1507_v56 = vshll.u32 %v6629_v42, 16 }
 0x176   : > { %9161 = vst [vmem:[#allocation43_spill] sm:$0xff] %v6648_v26  ;;  %v6655_v8 = vmul.f32 %v6460_v9, %v2572_v15  ;;  %9163 = vst [vmem:[#allocation45_spill] sm:$0xff] %v6657_v29  ;;  %v1593_v40 = vshrl.u32 %v5567_v34, 16  ;;  %v6664_v37 = vmul.f32 %v6460_v9, %v2573_v4  ;;  %v6667_v24 = vmul.f32 %v6463_v11, %v3306_v63  ;;  %v1891_v63 = vld [vmem:[#allocation2 + $0x1b0] sm:$0xff]  ;;  %v1822_v28 = vld [vmem:[#allocation2 + $0x98] sm:$0xf] }
 0x177   : > { %9162 = vst [vmem:[#allocation44_spill] sm:$0xff] %v6651_v6  ;;  %v2793_v39 = vld [vmem:[#allocation2 + $0x180] sm:$0xff]   ;;  %v2794_v3 = vld [vmem:[#allocation2 + $0x198] sm:$0x1]  ;;  %9164 = vst [vmem:[#allocation46_spill] sm:$0xff] %v6660_v57  ;;  %v6670_v12 = vmul.f32 %v6463_v11, %v3307_v62  ;;  %v1596_v36 = vshll.u32 %v5567_v34, 16 }
 0x178   : > { %v3527_v13 = vld [vmem:[#allocation2 + $0x19c] sm:$0x1]  ;;  %v2809_v47 = vunpack.c.l.bf16 %v2793_v39  ;;  %v2810_v61 = vunpack.c.l.bf16 %v2794_v3  ;;  %v4021_v54 = vld [vmem:[#allocation2 + $0x110] sm:$0x1]  ;;  %v3542_v38 = vunpack.c.h.bf16 %v2793_v39  ;;  %v1595_v4 = vrot.slane %v1593_v40, 7 }
 0x179   : > { %v3543_v14 = vunpack.c.l.bf16 %v3527_v13  ;;  %v4037_v26 = vunpack.c.l.bf16 %v4021_v54  ;;  %v1506_v13 = vrot.slane %v1504_v43, 7  ;;  %v1828_v27 = vld [vmem:[#allocation2 + $0xb0] sm:$0x1]  ;;  %v1148_v59 = vmin.f32 %v1052_v53, 6.0  ;;  %v754_v54 = vpop.f32.mrf.mxu0  ;;  %v1897_v43 = vld [vmem:[#allocation2 + $0x1c8] sm:$0x11] }
 0x17a   : > { %v4020_v15 = vld [vmem:[#allocation2 + $0xf8] sm:$0xf]  ;;  %v6683_v42 = vmul.f32 %v6448_v58, %v2809_v47  ;;  %v6686_v39 = vmul.f32 %v6448_v58, %v2810_v61  ;;  %v6689_v62 = vmul.f32 %v6455_v5, %v3542_v38  ;;  %v1142_v3 = vmin.f32 %v1046_v35, 6.0  ;;  %v4491_v38 = vld [vmem:[#allocation2 + $0x110] sm:$0x1] }
 0x17b   : > { %v4036_v34 = vunpack.c.l.bf16 %v4020_v15  ;;  %v6692_v15 = vmul.f32 %v6455_v5, %v3543_v14  ;;  %v1509_v6 = vor.u32 %v1507_v56, %v1506_v13  ;;  %v1511_v61 = vrot.slane %v1506_v13, 4 }
 0x17c   : > { %9165 = vst [vmem:[#allocation47_spill] sm:$0xff] %v6683_v42  ;;  %9166 = vst [vmem:[#allocation48_spill] sm:$0xff] %v6686_v39  ;;  %v1598_v57 = vor.u32 %v1596_v36, %v1595_v4  ;;  %v6698_v40 = vmul.f32 %v6488_v25, %v4037_v26  ;;  %v1606_v29 = vrot.slane %v1595_v4, 4  ;;  %v5566_v30 = vpack.c.bf16 %v1148_v59, %v1148_v59 }
 0x17d   : > { %9167 = vst [vmem:[#allocation49_spill] sm:$0xff] %v6689_v62  ;;  %9168 = vst [vmem:[#allocation50_spill] sm:$0xff] %v6692_v15  ;;  %v6695_v47 = vmul.f32 %v6488_v25, %v4036_v34  ;;  %v5562_v14 = vpack.c.bf16 %v1142_v3, %v1142_v3  ;;  %v1823_v55 = vsel %vm6413_vm12, %v1509_v6, %v1822_v28  ;;  %v1057_v56 = vmax.f32 %v754_v54, 0.0  ;;  %v5705_v34 = vpop.f32.mrf.mxu1  ;;  %v1888_v28 = vld [vmem:[#allocation2 + $0x1a0] sm:$0x1] }
 0x17e   : > { %v1829_v35 = vsel %vm6286_vm4, %v1511_v61, %v1828_v27  ;;  %v1892_v53 = vsel %vm6419_vm14, %v1598_v57, %v1891_v63  ;;  %1824 = vst [vmem:[#allocation2 + $0x98] sm:$0xf] %v1823_v55  ;;  %v1898_v36 = vsel %vm6296_vm6, %v1606_v29, %v1897_v43  ;;  %v1584_v26 = vshrl.u32 %v5566_v30, 16  ;;  %v1864_v61 = vld [vmem:[#allocation2 + $0x140] sm:$0x1] }
 0x17f   : > { %1830 = vst [vmem:[#allocation2 + $0xb0] sm:$0x1] %v1829_v35  ;;  %1893 = vst [vmem:[#allocation2 + $0x1b0] sm:$0xff] %v1892_v53  ;;  %v1587_v4 = vshll.u32 %v5566_v30, 16  ;;  %v1552_v59 = vshrl.u32 %v5562_v14, 16  ;;  %v4507_v3 = vunpack.c.l.bf16 %v4491_v38  ;;  %v9169_v6 = vmax.f32 %v6631_v10, 0.0  ;;  %v756_v10 = vpop.f32.mrf.mxu0  ;;  %v924_v46 = vpop.f32.mrf.mxu1 }
 0x180   : > { %1899 = vst [vmem:[#allocation2 + $0x1c8] sm:$0x11] %v1898_v36  ;;  %v1555_v13 = vshll.u32 %v5562_v14, 16  ;;  %v1153_v57 = vmin.f32 %v1057_v56, 6.0  ;;  %v1586_v54 = vrot.slane %v1584_v26, 7  ;;  %v4090_v43 = vrot.slane %v6695_v47, 1 }
 0x181   : > { %v1152_v27 = vmin.f32 %v9169_v6, 6.0  ;;  %v1882_v35 = vld [vmem:[#allocation2 + $0x188] sm:$0xf]  ;;  %v1554_v29 = vrot.slane %v1552_v59, 7  ;;  %v1055_v36 = vmax.f32 %v5705_v34, 0.0  ;;  %v4091_v55 = vrot.slane %v6698_v40, 1 }
 0x182   : > { %v1858_v38 = vld [vmem:[#allocation2 + $0x128] sm:$0xf]  ;;  %v1589_v6 = vor.u32 %v1587_v4, %v1586_v54  ;;  %v1591_v14 = vrot.slane %v1586_v54, 4  ;;  %v6717_v63 = vld [vmem:[#allocation2 + $0xf8] sm:$0xf]  ;;  %v6720_v26 = vmul.f32 %v6511_v60, %v4507_v3  ;;  %v1049_v47 = vmax.f32 %v924_v46, 0.0 }
 0x183   : > { %v6714_v53 = vpack.c.bf16 %v1153_v57, %v1152_v27  ;;  %v1557_v52 = vor.u32 %v1555_v13, %v1554_v29  ;;  %v1559_v56 = vrot.slane %v1554_v29, 4  ;;  %9170 = vst [vmem:[#allocation51_spill] sm:$0xff] %v6717_v63  ;;  %v9172_v13 = vrot.slane %v6664_v37, 1 }
 0x184   : > { %9171 = vst [vmem:[#allocation52_spill] sm:$0xff] %v6720_v26  ;;  %v1883_v27 = vsel %vm6413_vm12, %v1589_v6, %v1882_v35  ;;  %v1889_v4 = vsel %vm6286_vm4, %v1591_v14, %v1888_v28  ;;  %v9173_v3 = vrot.slane %v6655_v8, 1  ;;  %v9175_v46 = vrot.slane %v6670_v12, 1  ;;  %v6746_v8 = vpop.f32.mrf.mxu0  ;;  %v1903_v28 = vld [vmem:[#allocation2 + $0x1e0] sm:$0xff] }
 0x185   : > { %v1609_v59 = vshrl.u32 %v6714_v53, 16  ;;  %v1859_v34 = vsel %vm6413_vm12, %v1557_v52, %v1858_v38  ;;  %v1865_v40 = vsel %vm6286_vm4, %v1559_v56, %v1864_v61  ;;  %v9176_v54 = vrot.slane %v6667_v24, 1  ;;  %v4018_v52 = vld [vmem:[#allocation2 + $0x98] sm:$0xf]  ;;  %1884 = vst [vmem:[#allocation2 + $0x188] sm:$0xf] %v1883_v27 }
 0x186   : > { %v6736_v57 = vsel %vm2618_vm15, %v9173_v3, %v9172_v13  ;;  %v4019_v29 = vld [vmem:[#allocation2 + $0xb0] sm:$0x1]  ;;  %1890 = vst [vmem:[#allocation2 + $0x1a0] sm:$0x1] %v1889_v4  ;;  %1860 = vst [vmem:[#allocation2 + $0x128] sm:$0xf] %v1859_v34  ;;  %v4034_v38 = vunpack.c.l.bf16 %v4018_v52  ;;  %v6750_v27 = vsel %vm2618_vm15, %v4090_v43, %v4091_v55  ;;  %v5708_v55 = vpop.f32.mrf.mxu1 }
 0x187   : > { %9174 = vst [vmem:[#allocation53_spill] sm:$0xff] %v6736_v57  ;;  %v6743_v35 = vsel %vm2618_vm15, %v9176_v54, %v9175_v46  ;;  %1866 = vst [vmem:[#allocation2 + $0x140] sm:$0x1] %v1865_v40  ;;  %v1059_v37 = vmax.f32 %v756_v10, 0.0  ;;  %v4035_v12 = vunpack.c.l.bf16 %v4019_v29  ;;  %v4489_v6 = vld [vmem:[#allocation2 + $0xb0] sm:$0x1] }
 0x188   : > { %9177 = vst [vmem:[#allocation54_spill] sm:$0xff] %v6743_v35  ;;  %v2558_v24 = vld [vmem:[#allocation2 + $0x1b0] sm:$0xff]   ;;  %v2559_v14 = vld [vmem:[#allocation2 + $0x1c8] sm:$0x1]  ;;  %v1151_v56 = vmin.f32 %v1055_v36, 6.0  ;;  %v4505_v13 = vunpack.c.l.bf16 %v4489_v6  ;;  %v1145_v54 = vmin.f32 %v1049_v47, 6.0  ;;  %v4054_v52 = vmul.f32 %v6488_v25, %v4034_v38 }
 0x189   : > { %v2574_v3 = vunpack.c.l.bf16 %v2558_v24  ;;  %v2575_v46 = vunpack.c.l.bf16 %v2559_v14  ;;  %v6753_v10 = vld [vmem:[#allocation2 + $0x98] sm:$0xf]  ;;  %v1611_v34 = vrot.slane %v1609_v59, 7  ;;  %v1060_v40 = vmax.f32 %v6746_v8, 0.0  ;;  %v6758_v61 = vld [vmem:[#allocation2 + $0x1b0] sm:$0xff]  }
 0x18a   : > { %9178 = vst [vmem:[#allocation55_spill] sm:$0xff] %v6753_v10  ;;  %v4055_v29 = vmul.f32 %v6488_v25, %v4035_v12  ;;  %9179 = vst [vmem:[#allocation56_spill] sm:$0xff] %v6758_v61  ;;  %v6760_v36 = vld [vmem:[#allocation2 + $0x1c8] sm:$0x1]  ;;  %v3293_v6 = vld [vmem:[#allocation2 + $0x1cc] sm:$0x1]  ;;  %v3308_v47 = vunpack.c.h.bf16 %v2558_v24  ;;  %v6763_v43 = vmul.f32 %v6511_v60, %v4505_v13  ;;  %v5568_v59 = vpack.c.bf16 %v1151_v56, %v1151_v56 }
 0x18b   : > { %9180 = vst [vmem:[#allocation57_spill] sm:$0xff] %v6760_v36  ;;  %v1155_v14 = vmin.f32 %v1059_v37, 6.0  ;;  %v1612_v4 = vshll.u32 %v6714_v53, 16  ;;  %v1064_v30 = vmax.f32 %v5708_v55, 0.0  ;;  %v6768_v38 = vmul.f32 %v6460_v9, %v2574_v3  ;;  %v1909_v56 = vld [vmem:[#allocation2 + $0x1f8] sm:$0x11] }
 0x18c   : > { %9181 = vst [vmem:[#allocation58_spill] sm:$0xff] %v6763_v43  ;;  %v6771_v12 = vmul.f32 %v6460_v9, %v2575_v46  ;;  %v5564_v26 = vpack.c.bf16 %v1145_v54, %v1145_v54  ;;  %v3309_v13 = vunpack.c.l.bf16 %v3293_v6  ;;  %v4258_v63 = vld [vmem:[#allocation2 + $0x188] sm:$0xf]  ;;  %v4087_v55 = vrot.slane %v4054_v52, 1 }
 0x18d   : > { %v4259_v62 = vld [vmem:[#allocation2 + $0x1a0] sm:$0x1]  ;;  %v1614_v53 = vor.u32 %v1612_v4, %v1611_v34  ;;  %v4088_v15 = vrot.slane %v4055_v29, 1  ;;  %v6776_v8 = vmul.f32 %v6463_v11, %v3308_v47  ;;  %v4256_v46 = vld [vmem:[#allocation2 + $0x128] sm:$0xf]  ;;  %v4274_v35 = vunpack.c.l.bf16 %v4258_v63 }
 0x18e   : > { %v4257_v10 = vld [vmem:[#allocation2 + $0x140] sm:$0x1]  ;;  %v1622_v37 = vrot.slane %v1611_v34, 4  ;;  %v2631_v24 = vrot.slane %v6768_v38, 1  ;;  %v2632_v4 = vrot.slane %v6771_v12, 1  ;;  %v4275_v52 = vunpack.c.l.bf16 %v4259_v62 }
 0x18f   : > { %v1904_v6 = vsel %vm6419_vm14, %v1614_v53, %v1903_v28  ;;  %v1600_v29 = vshrl.u32 %v5568_v59, 16  ;;  %v4272_v47 = vunpack.c.l.bf16 %v4256_v46  ;;  %v4273_v36 = vunpack.c.l.bf16 %v4257_v10  ;;  %v1900_v34 = vld [vmem:[#allocation2 + $0x1d0] sm:$0x1]  ;;  %v1894_v53 = vld [vmem:[#allocation2 + $0x1b8] sm:$0xf] }
 0x190   : > { %1905 = vst [vmem:[#allocation2 + $0x1e0] sm:$0xff] %v1904_v6  ;;  %v1910_v3 = vsel %vm6296_vm6, %v1622_v37, %v1909_v56  ;;  %v1603_v61 = vshll.u32 %v5568_v59, 16  ;;  %v6787_v54 = vsel %vm2618_vm15, %v4087_v55, %v4088_v15  ;;  %v3329_v63 = vmul.f32 %v6463_v11, %v3309_v13  ;;  %v6792_v6 = vld [vmem:[#allocation2 + $0x1cc] sm:$0x1] }
 0x191   : > { %1911 = vst [vmem:[#allocation2 + $0x1f8] sm:$0x11] %v1910_v3  ;;  %v1602_v28 = vrot.slane %v1600_v29, 7  ;;  %v1568_v38 = vshrl.u32 %v5564_v26, 16  ;;  %v3364_v12 = vrot.slane %v6776_v8, 1  ;;  %v4294_v62 = vmul.f32 %v6483_v23, %v4274_v35  ;;  %9182 = vst [vmem:[#allocation59_spill] sm:$0xff] %v6792_v6 }
 0x192   : > { %v1571_v46 = vshll.u32 %v5564_v26, 16  ;;  %v1156_v10 = vmin.f32 %v1060_v40, 6.0  ;;  %v4295_v59 = vmul.f32 %v6483_v23, %v4275_v52  ;;  %v4292_v13 = vmul.f32 %v6483_v23, %v4272_v47  ;;  %v1870_v3 = vld [vmem:[#allocation2 + $0x158] sm:$0xf]  ;;  %v1876_v29 = vld [vmem:[#allocation2 + $0x170] sm:$0x1] }
 0x193   : > { %v1605_v37 = vor.u32 %v1603_v61, %v1602_v28  ;;  %v1607_v15 = vrot.slane %v1602_v28, 4  ;;  %v1570_v56 = vrot.slane %v1568_v38, 7  ;;  %v4293_v55 = vmul.f32 %v6483_v23, %v4273_v36  ;;  %v762_v38 = vpop.f32.mrf.mxu0 }
 0x194   : > { %v5571_v43 = vpack.c.bf16 %v1156_v10, %v1155_v14  ;;  %v1160_v8 = vmin.f32 %v1064_v30, 6.0  ;;  %v3365_v52 = vrot.slane %v3329_v63, 1  ;;  %v4329_v39 = vrot.slane %v4294_v62, 1  ;;  %v1915_v62 = vld [vmem:[#allocation2 + $0x210] sm:$0xff] }
 0x195   : > { %v1895_v35 = vsel %vm6413_vm12, %v1605_v37, %v1894_v53  ;;  %v1901_v26 = vsel %vm6286_vm4, %v1607_v15, %v1900_v34  ;;  %v1573_v40 = vor.u32 %v1571_v46, %v1570_v56  ;;  %v1575_v42 = vrot.slane %v1570_v56, 4 }
 0x196   : > { %1896 = vst [vmem:[#allocation2 + $0x1b8] sm:$0xf] %v1895_v35  ;;  %1902 = vst [vmem:[#allocation2 + $0x1d0] sm:$0x1] %v1901_v26  ;;  %v1625_v47 = vshrl.u32 %v5571_v43, 16  ;;  %v5574_v36 = vpack.c.bf16 %v1160_v8, %v1160_v8  ;;  %v4330_v14 = vrot.slane %v4295_v59, 1  ;;  %v6807_v34 = vsel %vm2618_vm15, %v2631_v24, %v2632_v4 }
 0x197   : > { %v2795_v28 = vld [vmem:[#allocation2 + $0x1e0] sm:$0xff]   ;;  %v1871_v30 = vsel %vm6413_vm12, %v1573_v40, %v1870_v3  ;;  %v1877_v53 = vsel %vm6286_vm4, %v1575_v42, %v1876_v29  ;;  %9183 = vst [vmem:[#allocation60_spill] sm:$0xff] %v6807_v34  ;;  %v1628_v10 = vshll.u32 %v5571_v43, 16  ;;  %v4326_v15 = vrot.slane %v4292_v13, 1  ;;  %v1921_v59 = vld [vmem:[#allocation2 + $0x228] sm:$0x11] }
 0x198   : > { %v2796_v63 = vld [vmem:[#allocation2 + $0x1f8] sm:$0x1]  ;;  %1872 = vst [vmem:[#allocation2 + $0x158] sm:$0xf] %v1871_v30  ;;  %1878 = vst [vmem:[#allocation2 + $0x170] sm:$0x1] %v1877_v53  ;;  %v2811_v8 = vunpack.c.l.bf16 %v2795_v28  ;;  %v6810_v24 = vsel %vm2618_vm15, %v3364_v12, %v3365_v52  ;;  %v6813_v4 = vsel %vm2618_vm15, %v4329_v39, %v4330_v14  ;;  %v3544_v43 = vunpack.c.h.bf16 %v2795_v28 }
 0x199   : > { %v1627_v46 = vrot.slane %v1625_v47, 7  ;;  %v1648_v37 = vshrl.u32 %v5574_v36, 16  ;;  %v4327_v56 = vrot.slane %v4293_v55, 1  ;;  %v1062_v35 = vmax.f32 %v762_v38, 0.0  ;;  %v3529_v26 = vld [vmem:[#allocation2 + $0x1fc] sm:$0x1] }
 0x19a   : > { %v1651_v42 = vshll.u32 %v5574_v36, 16  ;;  %9184 = vst [vmem:[#allocation61_spill] sm:$0xff] %v6810_v24  ;;  %9185 = vst [vmem:[#allocation62_spill] sm:$0xff] %v6813_v4  ;;  %v2812_v29 = vunpack.c.l.bf16 %v2796_v63  ;;  %v1930_v47 = vld [vmem:[#allocation2 + $0x248] sm:$0xf]  ;;  %v6823_v12 = vmul.f32 %v6448_v58, %v2811_v8  ;;  %v3545_v39 = vunpack.c.l.bf16 %v3529_v26 }
 0x19b   : > { %v1630_v3 = vor.u32 %v1628_v10, %v1627_v46  ;;  %v1638_v40 = vrot.slane %v1627_v46, 4  ;;  %v1650_v61 = vrot.slane %v1648_v37, 7  ;;  %v1936_v13 = vld [vmem:[#allocation2 + $0x260] sm:$0x1]  ;;  %v6820_v36 = vsel %vm2618_vm15, %v4326_v15, %v4327_v56  ;;  %v6831_v56 = vld [vmem:[#allocation9 + $0xc] sm:$0x11] }
 0x19c   : > { %9186 = vst [vmem:[#allocation63_spill] sm:$0xff] %v6823_v12  ;;  %v6825_v28 = vmin.f32 %v1062_v35, 6.0  ;;  %v6834_v8 = vmul.f32 %v6448_v58, %v2812_v29 }
 0x19d   : > { %v1916_v55 = vsel %vm6419_vm14, %v1630_v3, %v1915_v62  ;;  %v1922_v38 = vsel %vm6296_vm6, %v1638_v40, %v1921_v59  ;;  %v1653_v30 = vor.u32 %v1651_v42, %v1650_v61  ;;  %v1655_v53 = vrot.slane %v1650_v61, 4  ;;  %v4024_v52 = vld [vmem:[#allocation2 + $0x1b8] sm:$0xf]  ;;  %v4025_v14 = vld [vmem:[#allocation2 + $0x1d0] sm:$0x1] }
 0x19e   : > { %1917 = vst [vmem:[#allocation2 + $0x210] sm:$0xff] %v1916_v55  ;;  %1923 = vst [vmem:[#allocation2 + $0x228] sm:$0x11] %v1922_v38  ;;  %v4040_v63 = vunpack.c.l.bf16 %v4024_v52  ;;  %v4041_v46 = vunpack.c.l.bf16 %v4025_v14  ;;  %v4494_v10 = vld [vmem:[#allocation2 + $0x1b8] sm:$0xf]  ;;  %v6837_v62 = vmul.f32 %v6455_v5, %v3544_v43  ;;  %v6844_v52 = vmul.f32 %v6455_v5, %v3545_v39 }
 0x19f   : > { %v4495_v37 = vld [vmem:[#allocation2 + $0x1d0] sm:$0x1]  ;;  %v1931_v61 = vsel %vm6413_vm12, %v1653_v30, %v1930_v47  ;;  %v1937_v15 = vsel %vm6286_vm4, %v1655_v53, %v1936_v13  ;;  %9187 = vst [vmem:[#allocation64_spill] sm:$0xff] %v6834_v8  ;;  %v4510_v59 = vunpack.c.l.bf16 %v4494_v10  ;;  %v4022_v26 = vld [vmem:[#allocation2 + $0x158] sm:$0xf] }
 0x1a0   : > { %9188 = vst [vmem:[#allocation65_spill] sm:$0xff] %v6837_v62  ;;  %v4511_v35 = vunpack.c.l.bf16 %v4495_v37  ;;  %v4023_v3 = vld [vmem:[#allocation2 + $0x170] sm:$0x1]  ;;  %v4492_v40 = vld [vmem:[#allocation2 + $0x158] sm:$0xf]  ;;  %v4060_v42 = vmul.f32 %v6488_v25, %v4040_v63  ;;  %v4061_v47 = vmul.f32 %v6488_v25, %v4041_v46  ;;  %v4038_v13 = vunpack.c.l.bf16 %v4022_v26  ;;  %9189 = vst [vmem:[#allocation66_spill] sm:$0xff] %v6844_v52  ;;  %v764_v26 = vpop.f32.mrf.mxu0 }
 0x1a1   : > { %1932 = vst [vmem:[#allocation2 + $0x248] sm:$0xf] %v1931_v61  ;;  %1938 = vst [vmem:[#allocation2 + $0x260] sm:$0x1] %v1937_v15  ;;  %v4039_v55 = vunpack.c.l.bf16 %v4023_v3  ;;  %v4493_v38 = vld [vmem:[#allocation2 + $0x170] sm:$0x1]  ;;  %v4508_v30 = vunpack.c.l.bf16 %v4492_v40  ;;  %v6847_v14 = vmul.f32 %v6511_v60, %v4510_v59 }
 0x1a2   : > { %v4509_v29 = vunpack.c.l.bf16 %v4493_v38  ;;  %v4058_v10 = vmul.f32 %v6488_v25, %v4038_v13  ;;  %v4096_v37 = vrot.slane %v4060_v42, 1  ;;  %v4097_v61 = vrot.slane %v4061_v47, 1  ;;  %v6855_v3 = vld [vmem:[#allocation9 + $0x14] sm:$0x1]  ;;  %v937_v42 = vpop.f32.mrf.mxu1  ;;  %v766_v4 = vpop.f32.mrf.mxu0 }
 0x1a3   : > { %9190 = vst [vmem:[#allocation67_spill] sm:$0xff] %v6847_v14  ;;  %v4059_v63 = vmul.f32 %v6488_v25, %v4039_v55  ;;  %v6853_v15 = vmul.f32 %v6511_v60, %v4511_v35  ;;  %v6860_v59 = vmul.f32 %v6511_v60, %v4508_v30  ;;  %v1058_v52 = vmax.f32 %v937_v42, 0.0  ;;  %v377_v14 = vld [vmem:[#allocation2 + $0x218] sm:$0x11] }
 0x1a4   : > { %v6863_v13 = vmul.f32 %v6511_v60, %v4509_v29  ;;  %v4093_v47 = vrot.slane %v4058_v10, 1  ;;  %v6871_v29 = vsel %vm2618_vm15, %v4096_v37, %v4097_v61  ;;  %v395_v61 = vld [vmem:[#allocation2 + $0x278] sm:$0x11]  ;;  %v5709_v12 = vpop.f32.mrf.mxu1 }
 0x1a5   : > { %9191 = vst [vmem:[#allocation68_spill] sm:$0xff] %v6853_v15  ;;  %9192 = vst [vmem:[#allocation69_spill] sm:$0xff] %v6860_v59  ;;  %v2560_v55 = vld [vmem:[#allocation2 + $0x210] sm:$0xff]   ;;  %v2561_v38 = vld [vmem:[#allocation2 + $0x228] sm:$0x1]  ;;  %v4094_v46 = vrot.slane %v4059_v63, 1 }
 0x1a6   : > { %9193 = vst [vmem:[#allocation70_spill] sm:$0xff] %v6863_v13  ;;  %v2576_v35 = vunpack.c.l.bf16 %v2560_v55  ;;  %v2577_v43 = vunpack.c.l.bf16 %v2561_v38  ;;  %v3295_v53 = vld [vmem:[#allocation2 + $0x22c] sm:$0x1]  ;;  %v6867_v24 = vld [vmem:[#allocation2 + $0x210] sm:$0xff]   ;;  %v3310_v40 = vunpack.c.h.bf16 %v2560_v55  ;;  %v6880_v38 = vld [vmem:[#allocation2 + $0x228] sm:$0x1] }
 0x1a7   : > { %9194 = vst [vmem:[#allocation71_spill] sm:$0xff] %v6867_v24  ;;  %9195 = vst [vmem:[#allocation72_spill] sm:$0xff] %v6880_v38  ;;  %v3311_v62 = vunpack.c.l.bf16 %v3295_v53  ;;  %v1063_v59 = vmax.f32 %v764_v26, 0.0  ;;  %v1154_v13 = vmin.f32 %v1058_v52, 6.0  ;;  %v1067_v34 = vmax.f32 %v5709_v12, 0.0 }
 0x1a8   : > { %v4262_v30 = vld [vmem:[#allocation2 + $0x248] sm:$0xf]  ;;  %v6875_v10 = vmul.f32 %v6460_v9, %v2576_v35  ;;  %v6878_v63 = vmul.f32 %v6460_v9, %v2577_v43  ;;  %v4263_v39 = vld [vmem:[#allocation2 + $0x260] sm:$0x1]  ;;  %v6885_v37 = vmul.f32 %v6463_v11, %v3310_v40  ;;  %v6888_v35 = vsel %vm2618_vm15, %v4093_v47, %v4094_v46  ;;  %v768_v47 = vpop.f32.mrf.mxu0 }
 0x1a9   : > { %v4278_v15 = vunpack.c.l.bf16 %v4262_v30  ;;  %v4279_v55 = vunpack.c.l.bf16 %v4263_v39  ;;  %v396_v46 = vsel %vm6296_vm6, 0, %v395_v61  ;;  %v6898_v43 = vmul.f32 %v6463_v11, %v3311_v62  ;;  %v940_v39 = vpop.f32.mrf.mxu1  ;;  %v422_v26 = vld [vmem:[#allocation2 + $0x308] sm:$0x11] }
 0x1aa   : > { %v1159_v30 = vmin.f32 %v1063_v59, 6.0  ;;  %397 = vst [vmem:[#allocation2 + $0x278] sm:$0x11] %v396_v46  ;;  %v5570_v53 = vpack.c.bf16 %v1154_v13, %v1154_v13  ;;  %v1065_v40 = vmax.f32 %v766_v4, 0.0  ;;  %v378_v52 = vsel %vm6296_vm6, 0, %v377_v14 }
 0x1ab   : > { %v6902_v8 = vmul.f32 %v6483_v23, %v4278_v15  ;;  %v1163_v38 = vmin.f32 %v1067_v34, 6.0  ;;  %379 = vst [vmem:[#allocation2 + $0x218] sm:$0x11] %v378_v52  ;;  %v1061_v62 = vmax.f32 %v940_v39, 0.0  ;;  %v1066_v24 = vmax.f32 %v768_v47, 0.0  ;;  %v5712_v14 = vpop.f32.mrf.mxu1 }
 0x1ac   : > { %v5573_v61 = vpack.c.bf16 %v1159_v30, %v6825_v28  ;;  %v6908_v59 = vmul.f32 %v6483_v23, %v4279_v55  ;;  %v1616_v12 = vshrl.u32 %v5570_v53, 16  ;;  %v1619_v46 = vshll.u32 %v5570_v53, 16  ;;  %v1912_v28 = vld [vmem:[#allocation2 + $0x200] sm:$0x1]  ;;  %v1906_v47 = vld [vmem:[#allocation2 + $0x1e8] sm:$0xf] }
 0x1ad   : > { %9196 = vst [vmem:[#allocation73_spill] sm:$0xff] %v6902_v8  ;;  %v423_v15 = vsel %vm6296_vm6, 0, %v422_v26  ;;  %v5576_v13 = vpack.c.bf16 %v1163_v38, %v1163_v38  ;;  %v1161_v4 = vmin.f32 %v1065_v40, 6.0  ;;  %v1157_v6 = vmin.f32 %v1061_v62, 6.0  ;;  %v1933_v26 = vld [vmem:[#allocation2 + $0x258] sm:$0x11] }
 0x1ae   : > { %9197 = vst [vmem:[#allocation74_spill] sm:$0xff] %v6908_v59  ;;  %v1641_v42 = vshrl.u32 %v5573_v61, 16  ;;  %424 = vst [vmem:[#allocation2 + $0x308] sm:$0x11] %v423_v15  ;;  %v1618_v57 = vrot.slane %v1616_v12, 7  ;;  %v1644_v34 = vshll.u32 %v5573_v61, 16 }
 0x1af   : > { %v1162_v30 = vmin.f32 %v1066_v24, 6.0  ;;  %v1076_v39 = vmax.f32 %v5712_v14, 0.0  ;;  %v1664_v55 = vshrl.u32 %v5576_v13, 16  ;;  %v1667_v21 = vshll.u32 %v5576_v13, 16 }
 0x1b0   : > { %v1643_v52 = vrot.slane %v1641_v42, 7  ;;  %v5572_v22 = vpack.c.bf16 %v1157_v6, %v1157_v6  ;;  %v1621_v53 = vor.u32 %v1619_v46, %v1618_v57  ;;  %v1623_v51 = vrot.slane %v1618_v57, 4  ;;  %v404_v46 = vld [vmem:[#allocation2 + $0x2a8] sm:$0x11] }
 0x1b1   : > { %v5575_v33 = vpack.c.bf16 %v1162_v30, %v1161_v4  ;;  %v1172_v38 = vmin.f32 %v1076_v39, 6.0  ;;  %v1666_v15 = vrot.slane %v1664_v55, 7  ;;  %v1942_v61 = vld [vmem:[#allocation2 + $0x278] sm:$0xf]  ;;  %v1945_v30 = vld [vmem:[#allocation2 + $0x288] sm:$0x11] }
 0x1b2   : > { %v1646_v40 = vor.u32 %v1644_v34, %v1643_v52  ;;  %v1654_v62 = vrot.slane %v1643_v52, 4  ;;  %v1632_v12 = vshrl.u32 %v5572_v22, 16  ;;  %v1907_v24 = vsel %vm6413_vm12, %v1621_v53, %v1906_v47  ;;  %v401_v39 = vld [vmem:[#allocation2 + $0x2a0] sm:$0x11]  ;;  %v6920_v47 = vld [vmem:[#allocation2 + $0x22c] sm:$0x1]  ;;  %v6922_v53 = vpop.f32.mrf.mxu0 }
 0x1b3   : > { %v1913_v42 = vsel %vm6286_vm4, %v1623_v51, %v1912_v28  ;;  %v1635_v13 = vshll.u32 %v5572_v22, 16  ;;  %v1657_v6 = vshrl.u32 %v5575_v33, 16  ;;  %1908 = vst [vmem:[#allocation2 + $0x1e8] sm:$0xf] %v1907_v24  ;;  %v1669_v14 = vor.u32 %v1667_v21, %v1666_v15  ;;  %9198 = vst [vmem:[#allocation75_spill] sm:$0xff] %v6920_v47  ;;  %v1939_v52 = vld [vmem:[#allocation2 + $0x270] sm:$0xff] }
 0x1b4   : > { %1914 = vst [vmem:[#allocation2 + $0x200] sm:$0x1] %v1913_v42  ;;  %v1928_v57 = vsel %vm6419_vm14, %v1646_v40, %v1927_v1  ;;  %v1934_v4 = vsel %vm6296_vm6, %v1654_v62, %v1933_v26  ;;  %v1671_v34 = vrot.slane %v1666_v15, 4  ;;  %v1634_v51 = vrot.slane %v1632_v12, 7  ;;  %v1918_v40 = vld [vmem:[#allocation2 + $0x218] sm:$0xf] }
 0x1b5   : > { %1929 = vst [vmem:[#allocation2 + $0x240] sm:$0xff] %v1928_v57  ;;  %1935 = vst [vmem:[#allocation2 + $0x258] sm:$0x11] %v1934_v4  ;;  %v1659_v22 = vrot.slane %v1657_v6, 7  ;;  %v1660_v28 = vshll.u32 %v5575_v33, 16  ;;  %v5582_v55 = vpack.c.bf16 %v1172_v38, %v1172_v38  ;;  %v3368_v1 = vrot.slane %v6898_v43, 1 }
 0x1b6   : > { %v1943_v26 = vsel %vm6413_vm12, %v1669_v14, %v1942_v61  ;;  %v1949_v21 = vsel %vm6286_vm4, %v1671_v34, %v1948_v49  ;;  %v1924_v62 = vld [vmem:[#allocation2 + $0x230] sm:$0x1]  ;;  %v405_v15 = vsel %vm6296_vm6, 0, %v404_v46  ;;  %v1637_v33 = vor.u32 %v1635_v13, %v1634_v51  ;;  %v431_v42 = vld [vmem:[#allocation2 + $0x338] sm:$0x11]  ;;  %v6942_v34 = vpop.f32.mrf.mxu0 }
 0x1b7   : > { %1944 = vst [vmem:[#allocation2 + $0x278] sm:$0xf] %v1943_v26  ;;  %1950 = vst [vmem:[#allocation2 + $0x290] sm:$0x1] %v1949_v21  ;;  %v1639_v12 = vrot.slane %v1634_v51, 4  ;;  %v1662_v38 = vor.u32 %v1660_v28, %v1659_v22  ;;  %v1670_v24 = vrot.slane %v1659_v22, 4 }
 0x1b8   : > { %406 = vst [vmem:[#allocation2 + $0x2a8] sm:$0x11] %v405_v15  ;;  %v1712_v6 = vshrl.u32 %v5582_v55, 16  ;;  %v1715_v61 = vshll.u32 %v5582_v55, 16  ;;  %v402_v49 = vsel %vm6296_vm6, 0, %v401_v39  ;;  %v1919_v57 = vsel %vm6413_vm12, %v1637_v33, %v1918_v40  ;;  %v953_v55 = vpop.f32.mrf.mxu1 }
 0x1b9   : > { %v1925_v46 = vsel %vm6286_vm4, %v1639_v12, %v1924_v62  ;;  %v1940_v13 = vsel %vm6419_vm14, %v1662_v38, %v1939_v52  ;;  %v1946_v4 = vsel %vm6296_vm6, %v1670_v24, %v1945_v30  ;;  %v1984_v14 = vld [vmem:[#allocation2 + $0x320] sm:$0x1]  ;;  %403 = vst [vmem:[#allocation2 + $0x2a0] sm:$0x11] %v402_v49  ;;  %1920 = vst [vmem:[#allocation2 + $0x218] sm:$0xf] %v1919_v57 }
 0x1ba   : > { %1926 = vst [vmem:[#allocation2 + $0x230] sm:$0x1] %v1925_v46  ;;  %1941 = vst [vmem:[#allocation2 + $0x270] sm:$0xff] %v1940_v13  ;;  %v1714_v22 = vrot.slane %v1712_v6, 7  ;;  %v1978_v28 = vld [vmem:[#allocation2 + $0x308] sm:$0xf] }
 0x1bb   : > { %1947 = vst [vmem:[#allocation2 + $0x288] sm:$0x11] %v1946_v4  ;;  %v432_v52 = vsel %vm6296_vm6, 0, %v431_v42  ;;  %v9199_v30 = vrot.slane %v6878_v63, 1  ;;  %v9200_v26 = vrot.slane %v6875_v10, 1  ;;  %v9202_v40 = vrot.slane %v6885_v37, 1 }
 0x1bc   : > { %v4260_v15 = vld [vmem:[#allocation2 + $0x1e8] sm:$0xf]  ;;  %v4261_v33 = vld [vmem:[#allocation2 + $0x200] sm:$0x1]  ;;  %v1068_v12 = vmax.f32 %v6922_v53, 0.0  ;;  %v1070_v38 = vmax.f32 %v953_v55, 0.0  ;;  %v1717_v10 = vor.u32 %v1715_v61, %v1714_v22 }
 0x1bd   : > { %v6953_v21 = vsel %vm2618_vm15, %v9200_v26, %v9199_v30  ;;  %v6958_v62 = vsel %vm2618_vm15, %v9202_v40, %v3368_v1  ;;  %433 = vst [vmem:[#allocation2 + $0x338] sm:$0x11] %v432_v52  ;;  %v4276_v24 = vunpack.c.l.bf16 %v4260_v15  ;;  %v4277_v42 = vunpack.c.l.bf16 %v4261_v33  ;;  %v2797_v6 = vld [vmem:[#allocation2 + $0x240] sm:$0xff]   ;;  %v2798_v63 = vld [vmem:[#allocation2 + $0x258] sm:$0x1]  ;;  %v6961_v30 = vpop.f32.mrf.mxu0 }
 0x1be   : > { %9201 = vst [vmem:[#allocation76_spill] sm:$0xff] %v6953_v21  ;;  %9203 = vst [vmem:[#allocation77_spill] sm:$0xff] %v6958_v62  ;;  %v3531_v49 = vld [vmem:[#allocation2 + $0x25c] sm:$0x1]  ;;  %v1719_v57 = vrot.slane %v1714_v22, 4  ;;  %v2813_v46 = vunpack.c.l.bf16 %v2797_v6  ;;  %v2814_v13 = vunpack.c.l.bf16 %v2798_v63  ;;  %v3546_v4 = vunpack.c.h.bf16 %v2797_v6 }
 0x1bf   : > { %v3547_v37 = vunpack.c.l.bf16 %v3531_v49  ;;  %v6964_v1 = vmul.f32 %v6483_v23, %v4276_v24  ;;  %v6967_v53 = vmul.f32 %v6483_v23, %v4277_v42  ;;  %v4028_v55 = vld [vmem:[#allocation2 + $0x278] sm:$0xf]  ;;  %v4029_v52 = vld [vmem:[#allocation2 + $0x290] sm:$0x1]  ;;  %v1979_v26 = vsel %vm6413_vm12, %v1717_v10, %v1978_v28  ;;  %v5713_v42 = vpop.f32.mrf.mxu1 }
 0x1c0   : > { %v1985_v61 = vsel %vm6286_vm4, %v1719_v57, %v1984_v14  ;;  %v6974_v22 = vmul.f32 %v6448_v58, %v2813_v46  ;;  %v4499_v40 = vld [vmem:[#allocation2 + $0x290] sm:$0x1]  ;;  %1980 = vst [vmem:[#allocation2 + $0x308] sm:$0xf] %v1979_v26  ;;  %v6976_v15 = vmin.f32 %v1068_v12, 6.0  ;;  %v1166_v33 = vmin.f32 %v1070_v38, 6.0 }
 0x1c1   : > { %9204 = vst [vmem:[#allocation78_spill] sm:$0xff] %v6964_v1  ;;  %9205 = vst [vmem:[#allocation79_spill] sm:$0xff] %v6967_v53  ;;  %v1069_v24 = vmax.f32 %v6942_v34, 0.0  ;;  %v4044_v6 = vunpack.c.l.bf16 %v4028_v55  ;;  %v4045_v63 = vunpack.c.l.bf16 %v4029_v52  ;;  %v1079_v49 = vmax.f32 %v5713_v42, 0.0  ;;  %v4026_v38 = vld [vmem:[#allocation2 + $0x218] sm:$0xf] }
 0x1c2   : > { %9206 = vst [vmem:[#allocation80_spill] sm:$0xff] %v6974_v22  ;;  %1986 = vst [vmem:[#allocation2 + $0x320] sm:$0x1] %v1985_v61  ;;  %v6982_v14 = vmul.f32 %v6448_v58, %v2814_v13  ;;  %v6985_v57 = vmul.f32 %v6455_v5, %v3546_v4  ;;  %v6988_v12 = vmul.f32 %v6455_v5, %v3547_v37  ;;  %v4515_v52 = vunpack.c.l.bf16 %v4499_v40  ;;  %v4027_v26 = vld [vmem:[#allocation2 + $0x230] sm:$0x1] }
 0x1c3   : > { %v4064_v46 = vmul.f32 %v6488_v25, %v4044_v6  ;;  %v4065_v55 = vmul.f32 %v6488_v25, %v4045_v63  ;;  %v4497_v61 = vld [vmem:[#allocation2 + $0x230] sm:$0x1]  ;;  %v4042_v13 = vunpack.c.l.bf16 %v4026_v38  ;;  %v4043_v51 = vunpack.c.l.bf16 %v4027_v26  ;;  %v2563_v10 = vld [vmem:[#allocation2 + $0x288] sm:$0x1]  ;;  %v6994_v28 = vld [vmem:[#allocation2 + $0x278] sm:$0xf] }
 0x1c4   : > { %9207 = vst [vmem:[#allocation81_spill] sm:$0xff] %v6982_v14  ;;  %9208 = vst [vmem:[#allocation82_spill] sm:$0xff] %v6985_v57  ;;  %v4513_v39 = vunpack.c.l.bf16 %v4497_v61  ;;  %v2562_v4 = vld [vmem:[#allocation2 + $0x270] sm:$0xff]   ;;  %v6997_v34 = vmul.f32 %v6511_v60, %v4515_v52  ;;  %v6999_v6 = vld [vmem:[#allocation2 + $0x218] sm:$0xf]  ;;  %v2579_v26 = vunpack.c.l.bf16 %v2563_v10  ;;  %v1165_v57 = vmin.f32 %v1069_v24, 6.0 }
 0x1c5   : > { %9209 = vst [vmem:[#allocation83_spill] sm:$0xff] %v6988_v12  ;;  %v4102_v43 = vrot.slane %v4064_v46, 1  ;;  %v4103_v37 = vrot.slane %v4065_v55, 1  ;;  %9210 = vst [vmem:[#allocation84_spill] sm:$0xff] %v6994_v28  ;;  %v2578_v63 = vunpack.c.l.bf16 %v2562_v4  ;;  %v4062_v40 = vmul.f32 %v6488_v25, %v4042_v13  ;;  %v3297_v61 = vld [vmem:[#allocation2 + $0x28c] sm:$0x1]  ;;  %v956_v12 = vpop.f32.mrf.mxu1 }
 0x1c6   : > { %9211 = vst [vmem:[#allocation85_spill] sm:$0xff] %v6997_v34  ;;  %9212 = vst [vmem:[#allocation86_spill] sm:$0xff] %v6999_v6  ;;  %v4063_v8 = vmul.f32 %v6488_v25, %v4043_v51  ;;  %v7004_v38 = vmul.f32 %v6511_v60, %v4513_v39  ;;  %v7012_v59 = vld [vmem:[#allocation2 + $0x270] sm:$0xff]   ;;  %v7020_v55 = vmul.f32 %v6460_v9, %v2579_v26  ;;  %v7022_v42 = vld [vmem:[#allocation2 + $0x288] sm:$0x1]  ;;  %v3313_v47 = vunpack.c.l.bf16 %v3297_v61 }
 0x1c7   : > { %v7010_v52 = vmul.f32 %v6460_v9, %v2578_v63  ;;  %9214 = vst [vmem:[#allocation88_spill] sm:$0xff] %v7012_v59  ;;  %v7015_v13 = vsel %vm2618_vm15, %v4102_v43, %v4103_v37  ;;  %v4099_v39 = vrot.slane %v4062_v40, 1  ;;  %v4266_v1 = vld [vmem:[#allocation2 + $0x308] sm:$0xf]  ;;  %9215 = vst [vmem:[#allocation89_spill] sm:$0xff] %v7022_v42  ;;  %v3312_v63 = vunpack.c.h.bf16 %v2562_v4 }
 0x1c8   : > { %9213 = vst [vmem:[#allocation87_spill] sm:$0xff] %v7004_v38  ;;  %v4100_v46 = vrot.slane %v4063_v8, 1  ;;  %v7028_v51 = vld [vmem:[#allocation2 + $0x28c] sm:$0x1]  ;;  %v7034_v8 = vmul.f32 %v6463_v11, %v3313_v47  ;;  %v4282_v26 = vunpack.c.l.bf16 %v4266_v1  ;;  %v5578_v61 = vpack.c.bf16 %v1166_v33, %v1166_v33  ;;  %v410_v4 = vld [vmem:[#allocation2 + $0x2d0] sm:$0x11] }
 0x1c9   : > { %v4267_v53 = vld [vmem:[#allocation2 + $0x320] sm:$0x1]  ;;  %9216 = vst [vmem:[#allocation90_spill] sm:$0xff] %v7028_v51  ;;  %v7031_v10 = vmul.f32 %v6463_v11, %v3312_v63  ;;  %v1175_v34 = vmin.f32 %v1079_v49, 6.0  ;;  %v5577_v47 = vpack.c.bf16 %v1165_v57, %v6976_v15  ;;  %v778_v15 = vpop.f32.mrf.mxu0  ;;  %v317_v57 = vld [vmem:[#allocation2 + $0xd0] sm:$0x11] }
 0x1ca   : > { %v4283_v28 = vunpack.c.l.bf16 %v4267_v53  ;;  %v7038_v43 = vsel %vm2618_vm15, %v4099_v39, %v4100_v46  ;;  %v1680_v38 = vshrl.u32 %v5578_v61, 16  ;;  %v1683_v6 = vshll.u32 %v5578_v61, 16  ;;  %v413_v53 = vld [vmem:[#allocation2 + $0x2d8] sm:$0x11]  ;;  %v1960_v39 = vld [vmem:[#allocation2 + $0x2c0] sm:$0x1] }
 0x1cb   : > { %v5584_v1 = vpack.c.bf16 %v1175_v34, %v1175_v34  ;;  %v7047_v49 = vmul.f32 %v6483_v23, %v4282_v26  ;;  %v1673_v37 = vshrl.u32 %v5577_v47, 16  ;;  %v1676_v61 = vshll.u32 %v5577_v47, 16  ;;  %v1954_v34 = vld [vmem:[#allocation2 + $0x2a8] sm:$0xf]  ;;  %v1957_v59 = vld [vmem:[#allocation2 + $0x2b8] sm:$0x11] }
 0x1cc   : > { %v7050_v46 = vmul.f32 %v6483_v23, %v4283_v28  ;;  %v1682_v63 = vrot.slane %v1680_v38, 7  ;;  %v414_v33 = vsel %vm6296_vm6, 0, %v413_v53  ;;  %v1073_v62 = vmax.f32 %v956_v12, 0.0  ;;  %v5716_v38 = vpop.f32.mrf.mxu1  ;;  %v1951_v47 = vld [vmem:[#allocation2 + $0x2a0] sm:$0xff] }
 0x1cd   : > { %9217 = vst [vmem:[#allocation91_spill] sm:$0xff] %v7047_v49  ;;  %v1728_v40 = vshrl.u32 %v5584_v1, 16  ;;  %v1731_v51 = vshll.u32 %v5584_v1, 16  ;;  %v411_v26 = vsel %vm6296_vm6, 0, %v410_v4  ;;  %v1675_v28 = vrot.slane %v1673_v37, 7 }
 0x1ce   : > { %9218 = vst [vmem:[#allocation92_spill] sm:$0xff] %v7050_v46  ;;  %v1685_v24 = vor.u32 %v1683_v6, %v1682_v63  ;;  %v1687_v42 = vrot.slane %v1682_v63, 4  ;;  %415 = vst [vmem:[#allocation2 + $0x2d8] sm:$0x11] %v414_v33  ;;  %v1169_v14 = vmin.f32 %v1073_v62, 6.0  ;;  %v1072_v21 = vmax.f32 %v778_v15, 0.0 }
 0x1cf   : > { %v1730_v22 = vrot.slane %v1728_v40, 7  ;;  %412 = vst [vmem:[#allocation2 + $0x2d0] sm:$0x11] %v411_v26  ;;  %v318_v1 = vsel %vm6296_vm6, 0, %v317_v57  ;;  %v1088_v41 = vmax.f32 %v5716_v38, 0.0  ;;  %v1678_v4 = vor.u32 %v1676_v61, %v1675_v28  ;;  %v782_v61 = vpop.f32.mrf.mxu0 }
 0x1d0   : > { %v1955_v12 = vsel %vm6413_vm12, %v1685_v24, %v1954_v34  ;;  %v1961_v6 = vsel %vm6286_vm4, %v1687_v42, %v1960_v39  ;;  %v1686_v37 = vrot.slane %v1675_v28, 4  ;;  %v1990_v63 = vld [vmem:[#allocation2 + $0x338] sm:$0xf]  ;;  %v1996_v40 = vld [vmem:[#allocation2 + $0x350] sm:$0x1]  ;;  %v5580_v33 = vpack.c.bf16 %v1169_v14, %v1169_v14 }
 0x1d1   : > { %319 = vst [vmem:[#allocation2 + $0xd0] sm:$0x11] %v318_v1  ;;  %1956 = vst [vmem:[#allocation2 + $0x2a8] sm:$0xf] %v1955_v12  ;;  %v1733_v53 = vor.u32 %v1731_v51, %v1730_v22  ;;  %v1735_v62 = vrot.slane %v1730_v22, 4  ;;  %v1168_v15 = vmin.f32 %v1072_v21, 6.0  ;;  %v1952_v57 = vsel %vm6419_vm14, %v1678_v4, %v1951_v47 }
 0x1d2   : > { %1962 = vst [vmem:[#allocation2 + $0x2c0] sm:$0x1] %v1961_v6  ;;  %v1958_v24 = vsel %vm6296_vm6, %v1686_v37, %v1957_v59  ;;  %v9219_v34 = vmax.f32 %v6961_v30, 0.0  ;;  %v1184_v39 = vmin.f32 %v1088_v41, 6.0  ;;  %v299_v26 = vld [vmem:[#allocation2 + $0x70] sm:$0x11] }
 0x1d3   : > { %1953 = vst [vmem:[#allocation2 + $0x2a0] sm:$0xff] %v1952_v57  ;;  %1959 = vst [vmem:[#allocation2 + $0x2b8] sm:$0x11] %v1958_v24  ;;  %v1991_v51 = vsel %vm6413_vm12, %v1733_v53, %v1990_v63  ;;  %v1997_v21 = vsel %vm6286_vm4, %v1735_v62, %v1996_v40  ;;  %v1696_v22 = vshrl.u32 %v5580_v33, 16  ;;  %v1699_v14 = vshll.u32 %v5580_v33, 16 }
 0x1d4   : > { %v1167_v42 = vmin.f32 %v9219_v34, 6.0  ;;  %1992 = vst [vmem:[#allocation2 + $0x338] sm:$0xf] %v1991_v51  ;;  %1998 = vst [vmem:[#allocation2 + $0x350] sm:$0x1] %v1997_v21  ;;  %v5590_v41 = vpack.c.bf16 %v1184_v39, %v1184_v39  ;;  %v7075_v1 = vsub.s32 3, %v6423_v48 }
 0x1d5   : > { %v1698_v38 = vrot.slane %v1696_v22, 7  ;;  %v1972_v47 = vld [vmem:[#allocation2 + $0x2f0] sm:$0x1]  ;;  %v1074_v12 = vmax.f32 %v782_v61, 0.0  ;;  %v300_v6 = vsel %vm6296_vm6, 0, %v299_v26  ;;  %v7080_v53 = vsub.s32 5, %v6423_v48 }
 0x1d6   : > { %v5579_v30 = vpack.c.bf16 %v1168_v15, %v1167_v42  ;;  %v1966_v4 = vld [vmem:[#allocation2 + $0x2d8] sm:$0xf]  ;;  %v2039_v40 = vshrl.u32 %v5590_v41, 16  ;;  %301 = vst [vmem:[#allocation2 + $0x70] sm:$0x11] %v300_v6  ;;  %v2042_v15 = vshll.u32 %v5590_v41, 16 }
 0x1d7   : > { %v1701_v62 = vor.u32 %v1699_v14, %v1698_v38  ;;  %v1703_v33 = vrot.slane %v1698_v38, 4  ;;  %v7082_v57 = vmin.f32 %v1074_v12, 6.0  ;;  %v9220_v24 = vrot.slane %v7020_v55, 1  ;;  %v419_v59 = vld [vmem:[#allocation2 + $0x300] sm:$0x11] }
 0x1d8   : > { %v1689_v37 = vshrl.u32 %v5579_v30, 16  ;;  %v1692_v63 = vshll.u32 %v5579_v30, 16  ;;  %v9221_v34 = vrot.slane %v7010_v52, 1  ;;  %v9223_v39 = vrot.slane %v7034_v8, 1  ;;  %v4264_v51 = vld [vmem:[#allocation2 + $0x2a8] sm:$0xf] }
 0x1d9   : > { %v9224_v61 = vrot.slane %v7031_v10, 1  ;;  %v4265_v21 = vld [vmem:[#allocation2 + $0x2c0] sm:$0x1]  ;;  %v2041_v14 = vrot.slane %v2039_v40, 7  ;;  %v4280_v30 = vunpack.c.l.bf16 %v4264_v51  ;;  %v1967_v55 = vsel %vm6413_vm12, %v1701_v62, %v1966_v4  ;;  %v1969_v51 = vld [vmem:[#allocation2 + $0x2e8] sm:$0x11] }
 0x1da   : > { %v7089_v42 = vsel %vm2618_vm15, %v9221_v34, %v9220_v24  ;;  %v1691_v22 = vrot.slane %v1689_v37, 7  ;;  %v4281_v41 = vunpack.c.l.bf16 %v4265_v21  ;;  %v1973_v52 = vsel %vm6286_vm4, %v1703_v33, %v1972_v47  ;;  %v2799_v38 = vld [vmem:[#allocation2 + $0x2a0] sm:$0xff]   ;;  %v2800_v12 = vld [vmem:[#allocation2 + $0x2b8] sm:$0x1]  ;;  %v3533_v8 = vld [vmem:[#allocation2 + $0x2bc] sm:$0x1] }
 0x1db   : > { %9222 = vst [vmem:[#allocation93_spill] sm:$0xff] %v7089_v42  ;;  %v7096_v26 = vsel %vm2618_vm15, %v9224_v61, %v9223_v39  ;;  %1968 = vst [vmem:[#allocation2 + $0x2d8] sm:$0xf] %v1967_v55  ;;  %v7104_v24 = vrot.slane %v6457_v7, %v7075_v1  ;;  %v7108_v37 = vrot.slane %v6457_v7, %v7080_v53  ;;  %v2815_v40 = vunpack.c.l.bf16 %v2799_v38  ;;  %v4503_v33 = vld [vmem:[#allocation2 + $0x350] sm:$0x1] }
 0x1dc   : > { %9225 = vst [vmem:[#allocation94_spill] sm:$0xff] %v7096_v26  ;;  %1974 = vst [vmem:[#allocation2 + $0x2f0] sm:$0x1] %v1973_v52  ;;  %v1694_v10 = vor.u32 %v1692_v63, %v1691_v22  ;;  %v1702_v6 = vrot.slane %v1691_v22, 4  ;;  %v7111_v4 = vmul.f32 %v6483_v23, %v4280_v30  ;;  %v7114_v47 = vmul.f32 %v6483_v23, %v4281_v41  ;;  %v1963_v34 = vld [vmem:[#allocation2 + $0x2d0] sm:$0xff] }
 0x1dd   : > { %v2816_v62 = vunpack.c.l.bf16 %v2800_v12  ;;  %v3548_v63 = vunpack.c.h.bf16 %v2799_v38  ;;  %v3549_v39 = vunpack.c.l.bf16 %v3533_v8  ;;  %v4519_v61 = vunpack.c.l.bf16 %v4503_v33  ;;  %v2346_v23 = vld [vmem:[#allocation2 + $0xd4] sm:$0xf]  ;;  %v7130_v12 = vld [vmem:[#allocation2 + $0x338] sm:$0xf]  ;;  %v326_v33 = vld [vmem:[#allocation2 + $0x100] sm:$0x11] }
 0x1de   : > { %9226 = vst [vmem:[#allocation95_spill] sm:$0xff] %v7111_v4  ;;  %9227 = vst [vmem:[#allocation96_spill] sm:$0xff] %v7114_v47  ;;  %v2044_v21 = vor.u32 %v2042_v15, %v2041_v14  ;;  %v7119_v52 = vmul.f32 %v6448_v58, %v2815_v40  ;;  %v1964_v8 = vsel %vm6419_vm14, %v1694_v10, %v1963_v34  ;;  %v2352_v40 = vld [vmem:[#allocation2 + $0xec] sm:$0x1]  ;;  %v2046_v28 = vrot.slane %v2041_v14, 4  ;;  %v5869_v22 = vld [vmem:[#allocation10 + $0x78] sm:$0xff]   ;;  %v784_v34 = vpop.f32.mrf.mxu0 }
 0x1df   : > { %v7122_v30 = vmul.f32 %v6448_v58, %v2816_v62  ;;  %v7125_v41 = vmul.f32 %v6455_v5, %v3548_v63  ;;  %v7128_v38 = vmul.f32 %v6455_v5, %v3549_v39  ;;  %9232 = vst [vmem:[#allocation101_spill] sm:$0xff] %v7130_v12  ;;  %v7133_v15 = vmul.f32 %v6511_v60, %v4519_v61  ;;  %v969_v39 = vpop.f32.mrf.mxu1 }
 0x1e0   : > { %9228 = vst [vmem:[#allocation97_spill] sm:$0xff] %v7119_v52  ;;  %1965 = vst [vmem:[#allocation2 + $0x2d0] sm:$0xff] %v1964_v8  ;;  %v1970_v63 = vsel %vm6296_vm6, %v1702_v6, %v1969_v51  ;;  %v2347_v10 = vsel %vm6413_vm12, %v2044_v21, %v2346_v23  ;;  %v5870_v8 = vld [vmem:[#allocation10 + $0x38] sm:$0xff]   ;;  %v2353_v55 = vsel %vm6286_vm4, %v2046_v28, %v2352_v40  ;;  %5638 = vmatprep.subr.bf16.mxu1 %v5869_v22 }
 0x1e1   : > { %9229 = vst [vmem:[#allocation98_spill] sm:$0xff] %v7122_v30  ;;  %9230 = vst [vmem:[#allocation99_spill] sm:$0xff] %v7125_v41  ;;  %v7153_v49 = vrot.slane %v6437_v31, %v7080_v53  ;;  %v7157_v21 = vrot.slane %v6441_v44, %v7080_v53  ;;  %5639 = vmatpush3.bf16.msra.mxu1 %v5870_v8  ;;  %v420_v28 = vsel %vm6296_vm6, 0, %v419_v59  ;;  %v1075_v40 = vmax.f32 %v784_v34, 0.0  ;;  %v5717_v46 = vpop.f32.mrf.mxu1 }
 0x1e2   : > { %9231 = vst [vmem:[#allocation100_spill] sm:$0xff] %v7128_v38  ;;  %9233 = vst [vmem:[#allocation102_spill] sm:$0xff] %v7133_v15  ;;  %v4030_v6 = vld [vmem:[#allocation2 + $0x2d8] sm:$0xf]  ;;  %v1082_v15 = vmax.f32 %v969_v39, 0.0  ;;  %v327_v12 = vsel %vm6296_vm6, 0, %v326_v33 }
 0x1e3   : > { %1971 = vst [vmem:[#allocation2 + $0x2e8] sm:$0x11] %v1970_v63  ;;  %v4031_v14 = vld [vmem:[#allocation2 + $0x2f0] sm:$0x1]  ;;  %v7147_v51 = vld [vmem:[#allocation2 + $0x2d8] sm:$0xf]  ;;  %v4046_v23 = vunpack.c.l.bf16 %v4030_v6 }
 0x1e4   : > { %9234 = vst [vmem:[#allocation103_spill] sm:$0xff] %v7147_v51  ;;  %2348 = vst [vmem:[#allocation2 + $0xd4] sm:$0xf] %v2347_v10  ;;  %v4047_v63 = vunpack.c.l.bf16 %v4031_v14  ;;  %v4501_v62 = vld [vmem:[#allocation2 + $0x2f0] sm:$0x1]  ;;  %v1178_v6 = vmin.f32 %v1082_v15, 6.0 }
 0x1e5   : > { %2354 = vst [vmem:[#allocation2 + $0xec] sm:$0x1] %v2353_v55  ;;  %v4517_v10 = vunpack.c.l.bf16 %v4501_v62  ;;  %v4066_v53 = vmul.f32 %v6488_v25, %v4046_v23  ;;  %421 = vst [vmem:[#allocation2 + $0x300] sm:$0x11] %v420_v28  ;;  %v1091_v14 = vmax.f32 %v5717_v46, 0.0  ;;  %v1171_v62 = vmin.f32 %v1075_v40, 6.0 }
 0x1e6   : > { %v4067_v22 = vmul.f32 %v6488_v25, %v4047_v63  ;;  %328 = vst [vmem:[#allocation2 + $0x100] sm:$0x11] %v327_v12  ;;  %v7170_v39 = vsub.s32 0, %v6423_v48  ;;  %v7173_v59 = vsub.s32 2, %v6423_v48  ;;  %v5586_v63 = vpack.c.bf16 %v1178_v6, %v1178_v6  ;;  %v7191_v25 = vpop.f32.mrf.mxu0  ;;  %v5872_v38 = vld [vmem:[#allocation10 + $0x30] sm:$0xff]  }
 0x1e7   : > { %v7167_v55 = vmul.f32 %v6511_v60, %v4517_v10  ;;  %v4105_v33 = vrot.slane %v4066_v53, 1  ;;  %v2564_v8 = vld [vmem:[#allocation2 + $0x2d0] sm:$0xff]   ;;  %v1187_v15 = vmin.f32 %v1091_v14, 6.0 }
 0x1e8   : > { %v4106_v34 = vrot.slane %v4067_v22, 1  ;;  %v7175_v23 = vld [vmem:[#allocation2 + $0x2d0] sm:$0xff]   ;;  %v2580_v28 = vunpack.c.l.bf16 %v2564_v8  ;;  %v3314_v61 = vunpack.c.h.bf16 %v2564_v8  ;;  %v2007_v41 = vshrl.u32 %v5586_v63, 16 }
 0x1e9   : > { %9235 = vst [vmem:[#allocation104_spill] sm:$0xff] %v7167_v55  ;;  %9236 = vst [vmem:[#allocation105_spill] sm:$0xff] %v7175_v23  ;;  %v308_v23 = vld [vmem:[#allocation2 + $0xa0] sm:$0x11] }
 0x1ea   : > { %v2565_v46 = vld [vmem:[#allocation2 + $0x2e8] sm:$0x1]  ;;  %v7182_v51 = vsel %vm2618_vm15, %v4105_v33, %v4106_v34  ;;  %v3299_v22 = vld [vmem:[#allocation2 + $0x2ec] sm:$0x1]  ;;  %v2600_v12 = vmul.f32 %v6460_v9, %v2580_v28  ;;  %v3334_v60 = vmul.f32 %v6463_v11, %v3314_v61  ;;  %v2010_v28 = vshll.u32 %v5586_v63, 16 }
 0x1eb   : > { %v7178_v10 = vld [vmem:[#allocation2 + $0x2e8] sm:$0x1]  ;;  %v2581_v4 = vunpack.c.l.bf16 %v2565_v46  ;;  %v7185_v47 = vld [vmem:[#allocation2 + $0x2ec] sm:$0x1]  ;;  %v4217_v14 = vld [vmem:[#allocation2 + $0xd4] sm:$0xf]  ;;  %v3315_v55 = vunpack.c.l.bf16 %v3299_v22 }
 0x1ec   : > { %9237 = vst [vmem:[#allocation106_spill] sm:$0xff] %v7178_v10  ;;  %9238 = vst [vmem:[#allocation107_spill] sm:$0xff] %v7185_v47  ;;  %v4361_v8 = vld [vmem:[#allocation2 + $0xec] sm:$0x1]  ;;  %v4225_v46 = vunpack.c.l.bf16 %v4217_v14  ;;  %v2640_v26 = vrot.slane %v2600_v12, 1  ;;  %v3373_v10 = vrot.slane %v3334_v60, 1  ;;  %v5581_v12 = vpack.c.bf16 %v1171_v62, %v7082_v57 }
 0x1ed   : > { %v5871_v33 = vld [vmem:[#allocation10 + $0x70] sm:$0xff]   ;;  %v2601_v34 = vmul.f32 %v6460_v9, %v2581_v4  ;;  %v4369_v53 = vunpack.c.l.bf16 %v4361_v8  ;;  %v3335_v6 = vmul.f32 %v6463_v11, %v3315_v55  ;;  %v2009_v14 = vrot.slane %v2007_v41, 7  ;;  %v7205_v55 = vpop.f32.mrf.mxu0 }
 0x1ee   : > { %5640 = vmatprep.subr.bf16.mxu1 %v5871_v33  ;;  %v7196_v61 = vmul.f32 %v7104_v24, %v4225_v46  ;;  %v7199_v40 = vmul.f32 %v7108_v37, %v4225_v46  ;;  %v5592_v8 = vpack.c.bf16 %v1187_v15, %v1187_v15  ;;  %v2328_v46 = vld [vmem:[#allocation2 + $0x8c] sm:$0x1]  ;;  %v1705_v15 = vshrl.u32 %v5581_v12, 16 }
 0x1ef   : > { %v2641_v22 = vrot.slane %v2601_v34, 1  ;;  %v7202_v47 = vmul.f32 %v7108_v37, %v4369_v53  ;;  %5641 = vmatpush3.bf16.msra.mxu1 %v5872_v38  ;;  %v3374_v4 = vrot.slane %v3335_v6, 1  ;;  %v2322_v34 = vld [vmem:[#allocation2 + $0x74] sm:$0xf]  ;;  %v9243_v53 = vunpack.c.l.bf16 %v6831_v56  ;;  %v972_v6 = vpop.f32.mrf.mxu1 }
 0x1f0   : > { %9239 = vst [vmem:[#allocation108_spill] sm:$0xff] %v7196_v61  ;;  %9240 = vst [vmem:[#allocation109_spill] sm:$0xff] %v7199_v40  ;;  %v2012_v57 = vor.u32 %v2010_v28, %v2009_v14  ;;  %v2014_v62 = vrot.slane %v2009_v14, 4  ;;  %v1981_v61 = vld [vmem:[#allocation2 + $0x318] sm:$0x11]  ;;  %v2055_v63 = vshrl.u32 %v5592_v8, 16  ;;  %v9246_v33 = vunpack.c.h.bf16 %v6831_v56 }
 0x1f1   : > { %9241 = vst [vmem:[#allocation110_spill] sm:$0xff] %v7202_v47  ;;  %v7208_v60 = vsel %vm2618_vm15, %v2640_v26, %v2641_v22  ;;  %v7215_v38 = vrot.slane %v9243_v53, %v7170_v39  ;;  %v7218_v41 = vsel %vm2618_vm15, %v3373_v10, %v3374_v4  ;;  %v5873_v26 = vld [vmem:[#allocation10 + $0x68] sm:$0xff]   ;;  %v1708_v22 = vshll.u32 %v5581_v12, 16  ;;  %v2364_v14 = vld [vmem:[#allocation2 + $0x11c] sm:$0x1] }
 0x1f2   : > { %9242 = vst [vmem:[#allocation111_spill] sm:$0xff] %v7208_v60  ;;  %9245 = vst [vmem:[#allocation113_spill] sm:$0xff] %v7218_v41  ;;  %v2058_v40 = vshll.u32 %v5592_v8, 16  ;;  %v7223_v47 = vrot.slane %v9246_v33, %v7170_v39  ;;  %v5874_v53 = vld [vmem:[#allocation10 + $0x28] sm:$0xff]   ;;  %v2323_v10 = vsel %vm6413_vm12, %v2012_v57, %v2322_v34  ;;  %v2329_v28 = vsel %vm6286_vm4, %v2014_v62, %v2328_v46  ;;  %v428_v8 = vld [vmem:[#allocation2 + $0x330] sm:$0x11]  ;;  %v7233_v41 = vpop.f32.mrf.mxu0 }
 0x1f3   : > { %9244 = vst [vmem:[#allocation112_spill] sm:$0xff] %v7215_v38  ;;  %v1707_v4 = vrot.slane %v1705_v15, 7  ;;  %v7231_v12 = vrot.slane %v6457_v7, %v7170_v39  ;;  %5642 = vmatprep.subr.bf16.mxu1 %v5873_v26  ;;  %2324 = vst [vmem:[#allocation2 + $0x74] sm:$0xf] %v2323_v10  ;;  %v1975_v56 = vld [vmem:[#allocation2 + $0x300] sm:$0xff]  ;;  %v2057_v33 = vrot.slane %v2055_v63, 7  ;;  %v7237_v34 = vrot.slane %v6457_v7, %v7173_v59 }
 0x1f4   : > { %9247 = vst [vmem:[#allocation114_spill] sm:$0xff] %v7223_v47  ;;  %2330 = vst [vmem:[#allocation2 + $0x8c] sm:$0x1] %v2329_v28  ;;  %v9250_v46 = vunpack.c.l.bf16 %v6855_v3  ;;  %v1077_v62 = vmax.f32 %v7191_v25, 0.0  ;;  %v353_v15 = vld [vmem:[#allocation2 + $0x190] sm:$0x11]  ;;  %5643 = vmatpush3.bf16.msra.mxu1 %v5874_v53  ;;  %v5720_v28 = vpop.f32.mrf.mxu1 }
 0x1f5   : > { %9248 = vst [vmem:[#allocation115_spill] sm:$0xff] %v7231_v12  ;;  %9249 = vst [vmem:[#allocation116_spill] sm:$0xff] %v7237_v34  ;;  %v1710_v52 = vor.u32 %v1708_v22, %v1707_v4  ;;  %v1718_v30 = vrot.slane %v1707_v4, 4  ;;  %v2358_v26 = vld [vmem:[#allocation2 + $0x104] sm:$0xf]  ;;  %v309_v10 = vsel %vm6296_vm6, 0, %v308_v23  ;;  %v2060_v60 = vor.u32 %v2058_v40, %v2057_v33 }
 0x1f6   : > { %v7242_v57 = vrot.slane %v9250_v46, %v7170_v39  ;;  %v1085_v63 = vmax.f32 %v972_v6, 0.0  ;;  %v2062_v42 = vrot.slane %v2057_v33, 4  ;;  %v1173_v47 = vmin.f32 %v1077_v62, 6.0  ;;  %310 = vst [vmem:[#allocation2 + $0xa0] sm:$0x11] %v309_v10  ;;  %v7254_v6 = vpop.f32.mrf.mxu0  ;;  %v5875_v4 = vld [vmem:[#allocation10 + $0x60] sm:$0xff]  }
 0x1f7   : > { %v429_v3 = vsel %vm6296_vm6, 0, %v428_v8  ;;  %v335_v46 = vld [vmem:[#allocation2 + $0x130] sm:$0x11]  ;;  %v1976_v25 = vsel %vm6419_vm14, %v1710_v52, %v1975_v56  ;;  %v1982_v22 = vsel %vm6296_vm6, %v1718_v30, %v1981_v61  ;;  %v1078_v23 = vmax.f32 %v7205_v55, 0.0  ;;  %v362_v40 = vld [vmem:[#allocation2 + $0x1c0] sm:$0x11]  ;;  %5644 = vmatprep.subr.bf16.mxu1 %v5875_v4 }
 0x1f8   : > { %9251 = vst [vmem:[#allocation117_spill] sm:$0xff] %v7242_v57  ;;  %v1181_v53 = vmin.f32 %v1085_v63, 6.0  ;;  %430 = vst [vmem:[#allocation2 + $0x330] sm:$0x11] %v429_v3  ;;  %v2359_v8 = vsel %vm6413_vm12, %v2060_v60, %v2358_v26  ;;  %v2365_v33 = vsel %vm6286_vm4, %v2062_v42, %v2364_v14  ;;  %v354_v52 = vsel %vm6296_vm6, 0, %v353_v15  ;;  %v5876_v61 = vld [vmem:[#allocation10 + $0x20] sm:$0xff]   ;;  %v985_v63 = vpop.f32.mrf.mxu1 }
 0x1f9   : > { %1977 = vst [vmem:[#allocation2 + $0x300] sm:$0xff] %v1976_v25  ;;  %1983 = vst [vmem:[#allocation2 + $0x318] sm:$0x11] %v1982_v22  ;;  %v1100_v30 = vmax.f32 %v5720_v28, 0.0  ;;  %v1174_v56 = vmin.f32 %v1078_v23, 6.0  ;;  %v1080_v62 = vmax.f32 %v7233_v41, 0.0  ;;  %5645 = vmatpush3.bf16.msra.mxu1 %v5876_v61  ;;  %v7272_v41 = vrot.slane %v6437_v31, %v7173_v59 }
 0x1fa   : > { %2360 = vst [vmem:[#allocation2 + $0x104] sm:$0xf] %v2359_v8  ;;  %2366 = vst [vmem:[#allocation2 + $0x11c] sm:$0x1] %v2365_v33  ;;  %v5588_v55 = vpack.c.bf16 %v1181_v53, %v1181_v53  ;;  %v336_v10 = vsel %vm6296_vm6, 0, %v335_v46  ;;  %v1094_v42 = vmax.f32 %v985_v63, 0.0 }
 0x1fb   : > { %355 = vst [vmem:[#allocation2 + $0x190] sm:$0x11] %v354_v52  ;;  %v1196_v60 = vmin.f32 %v1100_v30, 6.0  ;;  %337 = vst [vmem:[#allocation2 + $0x130] sm:$0x11] %v336_v10  ;;  %v363_v15 = vsel %vm6296_vm6, 0, %v362_v40  ;;  %v7268_v22 = vpack.c.bf16 %v1174_v56, %v1173_v47 }
 0x1fc   : > { %v4216_v26 = vld [vmem:[#allocation2 + $0x74] sm:$0xf]  ;;  %v4360_v28 = vld [vmem:[#allocation2 + $0x8c] sm:$0x1]  ;;  %v2023_v3 = vshrl.u32 %v5588_v55, 16  ;;  %v2026_v25 = vshll.u32 %v5588_v55, 16 }
 0x1fd   : > { %364 = vst [vmem:[#allocation2 + $0x1c0] sm:$0x11] %v363_v15  ;;  %v4224_v46 = vunpack.c.l.bf16 %v4216_v26  ;;  %v4368_v53 = vunpack.c.l.bf16 %v4360_v28  ;;  %v7274_v23 = vpack.c.bf16 %v1196_v60, %v1196_v60  ;;  %v7276_v4 = vmin.f32 %v1080_v62, 6.0  ;;  %v2334_v55 = vld [vmem:[#allocation2 + $0xa4] sm:$0xf] }
 0x1fe   : > { %v2025_v8 = vrot.slane %v2023_v3, 7  ;;  %v1721_v40 = vshrl.u32 %v7268_v22, 16  ;;  %v1190_v52 = vmin.f32 %v1094_v42, 6.0  ;;  %v7294_v42 = vrot.slane %v6441_v44, %v7173_v59 }
 0x1ff   : > { %v7281_v47 = vmul.f32 %v7104_v24, %v4224_v46  ;;  %v7284_v30 = vmul.f32 %v7108_v37, %v4224_v46  ;;  %v7287_v61 = vmul.f32 %v7108_v37, %v4368_v53  ;;  %v2103_v56 = vshrl.u32 %v7274_v23, 16 }
 0x200   : > { %v2801_v62 = vld [vmem:[#allocation2 + $0x300] sm:$0xff]   ;;  %v2802_v10 = vld [vmem:[#allocation2 + $0x318] sm:$0x1]  ;;  %v3535_v63 = vld [vmem:[#allocation2 + $0x31c] sm:$0x1]  ;;  %v2028_v60 = vor.u32 %v2026_v25, %v2025_v8  ;;  %v2030_v15 = vrot.slane %v2025_v8, 4  ;;  %v7290_v26 = vpack.c.bf16 %v1190_v52, %v1190_v52 }
 0x201   : > { %9252 = vst [vmem:[#allocation118_spill] sm:$0xff] %v7281_v47  ;;  %9253 = vst [vmem:[#allocation119_spill] sm:$0xff] %v7284_v30  ;;  %v2817_v46 = vunpack.c.l.bf16 %v2801_v62  ;;  %v2818_v53 = vunpack.c.l.bf16 %v2802_v10  ;;  %v3990_v33 = vld [vmem:[#allocation2 + $0x104] sm:$0xf]  ;;  %v4126_v14 = vld [vmem:[#allocation2 + $0x11c] sm:$0x1]  ;;  %v3550_v47 = vunpack.c.h.bf16 %v2801_v62  ;;  %v3551_v11 = vunpack.c.l.bf16 %v3535_v63 }
 0x202   : > { %9254 = vst [vmem:[#allocation120_spill] sm:$0xff] %v7287_v61  ;;  %v3998_v38 = vunpack.c.l.bf16 %v3990_v33  ;;  %v4134_v16 = vunpack.c.l.bf16 %v4126_v14  ;;  %v7298_v25 = vld [vmem:[#allocation2 + $0x11c] sm:$0x1]  ;;  %v2335_v10 = vsel %vm6413_vm12, %v2028_v60, %v2334_v55  ;;  %v5877_v60 = vld [vmem:[#allocation10 + $0x58] sm:$0xff]   ;;  %v5721_v61 = vpop.f32.mrf.mxu1 }
 0x203   : > { %9255 = vst [vmem:[#allocation121_spill] sm:$0xff] %v7298_v25  ;;  %v2340_v8 = vld [vmem:[#allocation2 + $0xbc] sm:$0x1]  ;;  %v7301_v52 = vmul.f32 %v6448_v58, %v2817_v46  ;;  %v7304_v59 = vmul.f32 %v6448_v58, %v2818_v53  ;;  %v7310_v3 = vmul.f32 %v6455_v5, %v3550_v47  ;;  %v7313_v33 = vmul.f32 %v6455_v5, %v3551_v11  ;;  %v5878_v47 = vld [vmem:[#allocation10 + $0x18] sm:$0xff]  }
 0x204   : > { %v4010_v14 = vmul.f32 %v7231_v12, %v3998_v38  ;;  %v4148_v62 = vmul.f32 %v7237_v34, %v3998_v38  ;;  %2336 = vst [vmem:[#allocation2 + $0xa4] sm:$0xf] %v2335_v10  ;;  %v4149_v46 = vmul.f32 %v7237_v34, %v4134_v16  ;;  %v2341_v55 = vsel %vm6286_vm4, %v2030_v15, %v2340_v8  ;;  %v1993_v38 = vld [vmem:[#allocation2 + $0x348] sm:$0x11]  ;;  %v2394_v30 = vld [vmem:[#allocation2 + $0x194] sm:$0xf] }
 0x205   : > { %9256 = vst [vmem:[#allocation122_spill] sm:$0xff] %v7301_v52  ;;  %9257 = vst [vmem:[#allocation123_spill] sm:$0xff] %v7304_v59  ;;  %v5879_v10 = vld [vmem:[#allocation10 + $0x50] sm:$0xff]   ;;  %v1723_v25 = vrot.slane %v1721_v40, 7  ;;  %v2105_v58 = vrot.slane %v2103_v56, 7  ;;  %v2106_v16 = vshll.u32 %v7274_v23, 16  ;;  %5646 = vmatprep.subr.bf16.mxu1 %v5877_v60 }
 0x206   : > { %9258 = vst [vmem:[#allocation124_spill] sm:$0xff] %v7310_v3  ;;  %9259 = vst [vmem:[#allocation125_spill] sm:$0xff] %v7313_v33  ;;  %v4118_v11 = vadd.f32 %v6750_v27, %v4010_v14  ;;  %v4182_v28 = vrot.slane %v4148_v62, 1  ;;  %v4183_v63 = vrot.slane %v4149_v46, 1  ;;  %v1987_v15 = vld [vmem:[#allocation2 + $0x330] sm:$0xff]  ;;  %v2071_v8 = vshrl.u32 %v7290_v26, 16  ;;  %5647 = vmatpush3.bf16.msra.mxu1 %v5878_v47 }
 0x207   : > { %2342 = vst [vmem:[#allocation2 + $0xbc] sm:$0x1] %v2341_v55  ;;  %v2074_v53 = vshll.u32 %v7290_v26, 16  ;;  %v9260_v5 = vmax.f32 %v7254_v6, 0.0  ;;  %v1103_v14 = vmax.f32 %v5721_v61, 0.0  ;;  %v5880_v62 = vld [vmem:[#allocation10 + $0x10] sm:$0xff]   ;;  %v2108_v55 = vor.u32 %v2106_v16, %v2105_v58  ;;  %5648 = vmatprep.subr.bf16.mxu1 %v5879_v10 }
 0x208   : > { %v4184_v46 = vsel %vm2618_vm15, %v4182_v28, %v4183_v63  ;;  %v9261_v40 = vshll.u32 %v7268_v22, 16  ;;  %v1734_v23 = vrot.slane %v1723_v25, 4  ;;  %v2400_v3 = vld [vmem:[#allocation2 + $0x1ac] sm:$0x1]  ;;  %v2110_v33 = vrot.slane %v2105_v58, 4  ;;  %v5881_v6 = vld [vmem:[#allocation10 + $0x48] sm:$0xff]  }
 0x209   : > { %v1177_v27 = vmin.f32 %v9260_v5, 6.0  ;;  %v7333_v60 = vadd.f32 %v4184_v46, %v4118_v11  ;;  %v2073_v52 = vrot.slane %v2071_v8, 7  ;;  %v2395_v22 = vsel %vm6413_vm12, %v2108_v55, %v2394_v30  ;;  %v2370_v11 = vld [vmem:[#allocation2 + $0x134] sm:$0xf]  ;;  %v2376_v10 = vld [vmem:[#allocation2 + $0x14c] sm:$0x1] }
 0x20a   : > { %v1726_v56 = vor.u32 %v9261_v40, %v1723_v25  ;;  %v1994_v28 = vsel %vm6296_vm6, %v1734_v23, %v1993_v38  ;;  %v1199_v25 = vmin.f32 %v1103_v14, 6.0  ;;  %2396 = vst [vmem:[#allocation2 + $0x194] sm:$0xf] %v2395_v22  ;;  %v2401_v58 = vsel %vm6286_vm4, %v2110_v33, %v2400_v3  ;;  %5649 = vmatpush3.bf16.msra.mxu1 %v5880_v62  ;;  %v5882_v16 = vld [vmem:[#allocation10 + $0x8] sm:$0xff]   ;;  %v5883_v40 = vld [vmem:[#allocation10 + $0x40] sm:$0xff]   ;;  %v2319_v22 = vld [vmem:[#allocation2 + $0x6c] sm:$0xff] }
 0x20b   : > { %v5585_v26 = vpack.c.bf16 %v1177_v27, %v7276_v4  ;;  %v3989_v5 = vld [vmem:[#allocation2 + $0xa4] sm:$0xf]  ;;  %1995 = vst [vmem:[#allocation2 + $0x348] sm:$0x11] %v1994_v28  ;;  %v2076_v4 = vor.u32 %v2074_v53, %v2073_v52  ;;  %v2078_v47 = vrot.slane %v2073_v52, 4  ;;  %5650 = vmatprep.subr.bf16.mxu1 %v5881_v6  ;;  %v9263_v14 = vrot.slane %v6474_v18, 1  ;;  %v988_v6 = vpop.f32.mrf.mxu1 }
 0x20c   : > { %v1988_v61 = vsel %vm6419_vm14, %v1726_v56, %v1987_v15  ;;  %v3997_v63 = vunpack.c.l.bf16 %v3989_v5  ;;  %2402 = vst [vmem:[#allocation2 + $0x1ac] sm:$0x1] %v2401_v58  ;;  %v5600_v27 = vpack.c.bf16 %v1199_v25, %v1199_v25  ;;  %v9264_v46 = vrot.slane %v6471_v17, 1  ;;  %v796_v17 = vpop.f32.mrf.mxu0  ;;  %v2325_v25 = vld [vmem:[#allocation2 + $0x84] sm:$0x11]  ;;  %v5884_v58 = vld [vmem:[#allocation10] sm:$0xff]  }
 0x20d   : > { %1989 = vst [vmem:[#allocation2 + $0x330] sm:$0xff] %v1988_v61  ;;  %v2000_v38 = vshrl.u32 %v5585_v26, 16  ;;  %v2003_v30 = vshll.u32 %v5585_v26, 16  ;;  %v2371_v56 = vsel %vm6413_vm12, %v2076_v4, %v2370_v11  ;;  %v2377_v23 = vsel %vm6286_vm4, %v2078_v47, %v2376_v10  ;;  %v344_v26 = vld [vmem:[#allocation2 + $0x160] sm:$0x11] }
 0x20e   : > { %v4125_v15 = vld [vmem:[#allocation2 + $0xbc] sm:$0x1]  ;;  %v7351_v3 = vsel %vm2618_vm15, %v9264_v46, %v9263_v14  ;;  %v4009_v52 = vmul.f32 %v7231_v12, %v3997_v63  ;;  %v4146_v53 = vmul.f32 %v7237_v34, %v3997_v63  ;;  %v2119_v55 = vshrl.u32 %v5600_v27, 16  ;;  %2372 = vst [vmem:[#allocation2 + $0x134] sm:$0xf] %v2371_v56  ;;  %5651 = vmatpush3.bf16.msra.mxu1 %v5882_v16 }
 0x20f   : > { %v7344_v8 = vld [vmem:[#allocation2 + $0xbc] sm:$0x1]  ;;  %9265 = vst [vmem:[#allocation127_spill] sm:$0xff] %v7351_v3  ;;  %v4133_v33 = vunpack.c.l.bf16 %v4125_v15  ;;  %v2002_v18 = vrot.slane %v2000_v38, 7  ;;  %2378 = vst [vmem:[#allocation2 + $0x14c] sm:$0x1] %v2377_v23  ;;  %5652 = vmatprep.subr.bf16.mxu1 %v5883_v40 }
 0x210   : > { %9262 = vst [vmem:[#allocation126_spill] sm:$0xff] %v7344_v8  ;;  %v7361_v5 = vadd.f32 %v6787_v54, %v4009_v52  ;;  %v4179_v28 = vrot.slane %v4146_v53, 1  ;;  %v2122_v63 = vshll.u32 %v5600_v27, 16  ;;  %v2121_v11 = vrot.slane %v2119_v55, 7  ;;  %v2412_v10 = vld [vmem:[#allocation2 + $0x1dc] sm:$0x1] }
 0x211   : > { %v4147_v61 = vmul.f32 %v7237_v34, %v4133_v33  ;;  %v2005_v4 = vor.u32 %v2003_v30, %v2002_v18  ;;  %v2013_v47 = vrot.slane %v2002_v18, 4  ;;  %v7365_v15 = vsub.s32 6, %v6423_v48  ;;  %v2406_v38 = vld [vmem:[#allocation2 + $0x1c4] sm:$0xf] }
 0x212   : > { %9266 = vst [vmem:[#allocation128_spill] sm:$0xff] %v7361_v5  ;;  %v1083_v14 = vmax.f32 %v796_v17, 0.0  ;;  %v345_v46 = vsel %vm6296_vm6, 0, %v344_v26  ;;  %v1097_v52 = vmax.f32 %v988_v6, 0.0  ;;  %v7371_v27 = vld [vmem:[#allocation2 + $0x348] sm:$0x1]  ;;  %v2124_v40 = vor.u32 %v2122_v63, %v2121_v11  ;;  %5653 = vmatpush3.bf16.msra.mxu1 %v5884_v58 }
 0x213   : > { %v4180_v54 = vrot.slane %v4147_v61, 1  ;;  %9268 = vst [vmem:[#allocation130_spill] sm:$0xff] %v7371_v27  ;;  %v7373_v16 = vld [vmem:[#allocation2 + $0x34c] sm:$0x1]  ;;  %v2320_v30 = vsel %vm6419_vm14, %v2005_v4, %v2319_v22  ;;  %v2326_v53 = vsel %vm6296_vm6, %v2013_v47, %v2325_v25  ;;  %v2126_v56 = vrot.slane %v2121_v11, 4  ;;  %v798_v61 = vpop.f32.mrf.mxu0 }
 0x214   : > { %v7369_v33 = vld [vmem:[#allocation2 + $0x330] sm:$0xff]   ;;  %9269 = vst [vmem:[#allocation131_spill] sm:$0xff] %v7373_v16  ;;  %346 = vst [vmem:[#allocation2 + $0x160] sm:$0x11] %v345_v46  ;;  %v4363_v6 = vld [vmem:[#allocation2 + $0x1ac] sm:$0x1]  ;;  %v7392_v11 = vrot.slane %v6457_v7, %v7365_v15 }
 0x215   : > { %9267 = vst [vmem:[#allocation129_spill] sm:$0xff] %v7369_v33  ;;  %v7380_v23 = vsel %vm2618_vm15, %v4179_v28, %v4180_v54  ;;  %v4219_v26 = vld [vmem:[#allocation2 + $0x194] sm:$0xf]  ;;  %2321 = vst [vmem:[#allocation2 + $0x6c] sm:$0xff] %v2320_v30  ;;  %v4371_v63 = vunpack.c.l.bf16 %v4363_v6  ;;  %v2407_v28 = vsel %vm6413_vm12, %v2124_v40, %v2406_v38  ;;  %v2413_v47 = vsel %vm6286_vm4, %v2126_v56, %v2412_v10  ;;  %v5724_v56 = vpop.f32.mrf.mxu1 }
 0x216   : > { %9270 = vst [vmem:[#allocation132_spill] sm:$0xff] %v7380_v23  ;;  %2327 = vst [vmem:[#allocation2 + $0x84] sm:$0x11] %v2326_v53  ;;  %v4227_v25 = vunpack.c.l.bf16 %v4219_v26  ;;  %v389_v4 = vld [vmem:[#allocation2 + $0x250] sm:$0x11]  ;;  %v1179_v54 = vmin.f32 %v1083_v14, 6.0 }
 0x217   : > { %2408 = vst [vmem:[#allocation2 + $0x1c4] sm:$0xf] %v2407_v28  ;;  %9271 = vst [vmem:[#allocation133_spill] sm:$0xff] %v7392_v11  ;;  %v1193_v46 = vmin.f32 %v1097_v52, 6.0  ;;  %v4387_v53 = vmul.f32 %v7108_v37, %v4371_v63  ;;  %v4218_v26 = vld [vmem:[#allocation2 + $0x134] sm:$0xf] }
 0x218   : > { %v7395_v58 = vmul.f32 %v7104_v24, %v4227_v25  ;;  %v4386_v30 = vmul.f32 %v7108_v37, %v4227_v25  ;;  %v4362_v38 = vld [vmem:[#allocation2 + $0x14c] sm:$0x1]  ;;  %2414 = vst [vmem:[#allocation2 + $0x1dc] sm:$0x1] %v2413_v47  ;;  %v1084_v40 = vmax.f32 %v798_v61, 0.0  ;;  %v4226_v6 = vunpack.c.l.bf16 %v4218_v26  ;;  %v7404_v61 = vpop.f32.mrf.mxu0 }
 0x219   : > { %v4370_v28 = vunpack.c.l.bf16 %v4362_v38  ;;  %v5596_v10 = vpack.c.bf16 %v1193_v46, %v1193_v46  ;;  %v390_v7 = vsel %vm6296_vm6, 0, %v389_v4  ;;  %v4422_v52 = vrot.slane %v4387_v53, 1 }
 0x21a   : > { %v4421_v14 = vrot.slane %v4386_v30, 1  ;;  %v1180_v62 = vmin.f32 %v1084_v40, 6.0  ;;  %391 = vst [vmem:[#allocation2 + $0x250] sm:$0x11] %v390_v7  ;;  %v1112_v22 = vmax.f32 %v5724_v56, 0.0  ;;  %v4238_v25 = vmul.f32 %v7104_v24, %v4226_v6 }
 0x21b   : > { %v4384_v63 = vmul.f32 %v7108_v37, %v4226_v6  ;;  %v4385_v17 = vmul.f32 %v7108_v37, %v4370_v28  ;;  %v2087_v47 = vshrl.u32 %v5596_v10, 16  ;;  %v2090_v38 = vshll.u32 %v5596_v10, 16 }
 0x21c   : > { %v7407_v46 = vsel %vm2618_vm15, %v4421_v14, %v4422_v52  ;;  %v5587_v30 = vpack.c.bf16 %v1180_v62, %v1179_v54  ;;  %v1208_v53 = vmin.f32 %v1112_v22, 6.0  ;;  %v4246_v40 = vadd.f32 %v4238_v25, %v7333_v60  ;;  %v804_v54 = vpop.f32.mrf.mxu0 }
 0x21d   : > { %9272 = vst [vmem:[#allocation134_spill] sm:$0xff] %v7407_v46  ;;  %v2895_v26 = vld [vmem:[#allocation2 + $0x84] sm:$0x1]  ;;  %v3628_v4 = vld [vmem:[#allocation2 + $0x88] sm:$0x1]  ;;  %v4418_v7 = vrot.slane %v4384_v63, 1 }
 0x21e   : > { %v4419_v56 = vrot.slane %v4385_v17, 1  ;;  %v2903_v55 = vunpack.c.l.bf16 %v2895_v26  ;;  %v3636_v18 = vunpack.c.l.bf16 %v3628_v4  ;;  %v3992_v6 = vld [vmem:[#allocation2 + $0x1c4] sm:$0xf]  ;;  %v2089_v28 = vrot.slane %v2087_v47, 7  ;;  %v1001_v26 = vpop.f32.mrf.mxu1 }
 0x21f   : > { %v4455_v48 = vld [vmem:[#allocation2 + $0x1c4] sm:$0xf]  ;;  %v2016_v8 = vshrl.u32 %v5587_v30, 16  ;;  %v7410_v23 = vpack.c.bf16 %v1208_v53, %v1208_v53  ;;  %v4354_v14 = vadd.f32 %v6820_v36, %v4246_v40  ;;  %v4000_v62 = vunpack.c.l.bf16 %v3992_v6  ;;  %v4128_v22 = vld [vmem:[#allocation2 + $0x1dc] sm:$0x1]  ;;  %v806_v40 = vpop.f32.mrf.mxu0 }
 0x220   : > { %v4420_v52 = vsel %vm2618_vm15, %v4418_v7, %v4419_v56  ;;  %v7415_v10 = vmul.f32 %v7153_v49, %v2903_v55  ;;  %v4599_v60 = vld [vmem:[#allocation2 + $0x1dc] sm:$0x1]  ;;  %v7418_v17 = vmul.f32 %v7157_v21, %v3636_v18  ;;  %v4136_v25 = vunpack.c.l.bf16 %v4128_v22 }
 0x221   : > { %v4463_v63 = vunpack.c.l.bf16 %v4455_v48  ;;  %v4607_v47 = vunpack.c.l.bf16 %v4599_v60  ;;  %v7420_v4 = vadd.f32 %v4420_v52, %v4354_v14  ;;  %v4012_v53 = vmul.f32 %v7231_v12, %v4000_v62  ;;  %v2382_v48 = vld [vmem:[#allocation2 + $0x164] sm:$0xf]  ;;  %v2337_v60 = vld [vmem:[#allocation2 + $0xb4] sm:$0x11] }
 0x222   : > { %9273 = vst [vmem:[#allocation135_spill] sm:$0xff] %v7418_v17  ;;  %v4152_v55 = vmul.f32 %v7237_v34, %v4000_v62  ;;  %v4153_v7 = vmul.f32 %v7237_v34, %v4136_v25  ;;  %v2092_v22 = vor.u32 %v2090_v38, %v2089_v28  ;;  %v2388_v62 = vld [vmem:[#allocation2 + $0x17c] sm:$0x1]  ;;  %v2094_v46 = vrot.slane %v2089_v28, 4  ;;  %v2349_v17 = vld [vmem:[#allocation2 + $0xe4] sm:$0x11] }
 0x223   : > { %9274 = vst [vmem:[#allocation136_spill] sm:$0xff] %v7420_v4  ;;  %v7428_v56 = vmul.f32 %v7392_v11, %v4463_v63  ;;  %v7431_v18 = vmul.f32 %v7242_v57, %v4463_v63  ;;  %v7434_v6 = vadd.f32 %v6871_v29, %v4012_v53  ;;  %v7437_v52 = vmul.f32 %v7242_v57, %v4607_v47  ;;  %v371_v4 = vld [vmem:[#allocation2 + $0x1f0] sm:$0x11]  ;;  %v5725_v63 = vpop.f32.mrf.mxu1 }
 0x224   : > { %v4188_v14 = vrot.slane %v4152_v55, 1  ;;  %v4189_v36 = vrot.slane %v4153_v7, 1  ;;  %v2383_v29 = vsel %vm6413_vm12, %v2092_v22, %v2382_v48  ;;  %v2019_v53 = vshll.u32 %v5587_v30, 16  ;;  %v398_v55 = vld [vmem:[#allocation2 + $0x280] sm:$0x11] }
 0x225   : > { %9275 = vst [vmem:[#allocation137_spill] sm:$0xff] %v7428_v56  ;;  %9276 = vst [vmem:[#allocation138_spill] sm:$0xff] %v7431_v18  ;;  %v2018_v56 = vrot.slane %v2016_v8, 7  ;;  %v2167_v47 = vshrl.u32 %v7410_v23, 16  ;;  %v2389_v7 = vsel %vm6286_vm4, %v2094_v46, %v2388_v62  ;;  %v2331_v8 = vld [vmem:[#allocation2 + $0x9c] sm:$0xff]  ;;  %v2170_v25 = vshll.u32 %v7410_v23, 16 }
 0x226   : > { %9277 = vst [vmem:[#allocation139_spill] sm:$0xff] %v7434_v6  ;;  %9278 = vst [vmem:[#allocation140_spill] sm:$0xff] %v7437_v52  ;;  %v7445_v38 = vsel %vm2618_vm15, %v4188_v14, %v4189_v36  ;;  %v380_v6 = vld [vmem:[#allocation2 + $0x220] sm:$0x11]  ;;  %v2448_v48 = vld [vmem:[#allocation2 + $0x26c] sm:$0x1]  ;;  %v7453_v36 = vpop.f32.mrf.mxu0 }
 0x227   : > { %9279 = vst [vmem:[#allocation141_spill] sm:$0xff] %v7445_v38  ;;  %2384 = vst [vmem:[#allocation2 + $0x164] sm:$0xf] %v2383_v29  ;;  %v2029_v28 = vrot.slane %v2018_v56, 4  ;;  %v2021_v5 = vor.u32 %v2019_v53, %v2018_v56  ;;  %v2169_v18 = vrot.slane %v2167_v47, 7  ;;  %v1086_v30 = vmax.f32 %v7404_v61, 0.0  ;;  %v1004_v56 = vpop.f32.mrf.mxu1 }
 0x228   : > { %2390 = vst [vmem:[#allocation2 + $0x17c] sm:$0x1] %v2389_v7  ;;  %v372_v22 = vsel %vm6296_vm6, 0, %v371_v4  ;;  %v2442_v46 = vld [vmem:[#allocation2 + $0x254] sm:$0xf]  ;;  %v1106_v62 = vmax.f32 %v1001_v26, 0.0 }
 0x229   : > { %v2338_v14 = vsel %vm6296_vm6, %v2029_v28, %v2337_v60  ;;  %373 = vst [vmem:[#allocation2 + $0x1f0] sm:$0x11] %v372_v22  ;;  %v1087_v29 = vmax.f32 %v804_v54, 0.0  ;;  %v399_v23 = vsel %vm6296_vm6, 0, %v398_v55  ;;  %v2332_v53 = vsel %vm6419_vm14, %v2021_v5, %v2331_v8  ;;  %v7461_v22 = vld [vmem:[#allocation2 + $0x3c] sm:$0xff]  }
 0x22a   : > { %2339 = vst [vmem:[#allocation2 + $0xb4] sm:$0x11] %v2338_v14  ;;  %v2172_v61 = vor.u32 %v2170_v25, %v2169_v18  ;;  %v2174_v47 = vrot.slane %v2169_v18, 4  ;;  %v1182_v4 = vmin.f32 %v1086_v30, 6.0  ;;  %400 = vst [vmem:[#allocation2 + $0x280] sm:$0x11] %v399_v23  ;;  %v7469_v18 = vpop.f32.mrf.mxu0 }
 0x22b   : > { %2333 = vst [vmem:[#allocation2 + $0x9c] sm:$0xff] %v2332_v53  ;;  %v1202_v7 = vmin.f32 %v1106_v62, 6.0  ;;  %v1183_v38 = vmin.f32 %v1087_v29, 6.0  ;;  %v1115_v60 = vmax.f32 %v5725_v63, 0.0  ;;  %v1089_v28 = vmax.f32 %v806_v40, 0.0 }
 0x22c   : > { %v2443_v54 = vsel %vm6413_vm12, %v2172_v61, %v2442_v46  ;;  %v2449_v26 = vsel %vm6286_vm4, %v2174_v47, %v2448_v48  ;;  %v381_v5 = vsel %vm6296_vm6, 0, %v380_v6  ;;  %v1109_v25 = vmax.f32 %v1004_v56, 0.0 }
 0x22d   : > { %2444 = vst [vmem:[#allocation2 + $0x254] sm:$0xf] %v2443_v54  ;;  %2450 = vst [vmem:[#allocation2 + $0x26c] sm:$0x1] %v2449_v26  ;;  %v7471_v55 = vpack.c.bf16 %v1202_v7, %v1202_v7  ;;  %v7473_v63 = vpack.c.bf16 %v1183_v38, %v1182_v4  ;;  %v1211_v40 = vmin.f32 %v1115_v60, 6.0  ;;  %v7475_v8 = vmin.f32 %v1089_v28, 6.0  ;;  %v7487_v28 = vpop.f32.mrf.mxu0 }
 0x22e   : > { %382 = vst [vmem:[#allocation2 + $0x220] sm:$0x11] %v381_v5  ;;  %v3991_v30 = vld [vmem:[#allocation2 + $0x164] sm:$0xf]  ;;  %v1205_v46 = vmin.f32 %v1109_v25, 6.0  ;;  %v7481_v62 = vrot.slane %v6437_v31, %v7170_v39 }
 0x22f   : > { %v4454_v14 = vld [vmem:[#allocation2 + $0x164] sm:$0xf]  ;;  %v3999_v29 = vunpack.c.l.bf16 %v3991_v30  ;;  %v4127_v23 = vld [vmem:[#allocation2 + $0x17c] sm:$0x1]  ;;  %v2135_v53 = vshrl.u32 %v7471_v55, 16  ;;  %v2138_v61 = vshll.u32 %v7471_v55, 16  ;;  %v7516_v27 = vpop.f32.mrf.mxu0 }
 0x230   : > { %9280 = vst [vmem:[#allocation142_spill] sm:$0xff] %v7481_v62  ;;  %v4462_v56 = vunpack.c.l.bf16 %v4454_v14  ;;  %v4598_v38 = vld [vmem:[#allocation2 + $0x17c] sm:$0x1]  ;;  %v4135_v47 = vunpack.c.l.bf16 %v4127_v23  ;;  %v2032_v7 = vshrl.u32 %v7473_v63, 16  ;;  %v2035_v60 = vshll.u32 %v7473_v63, 16 }
 0x231   : > { %v4606_v4 = vunpack.c.l.bf16 %v4598_v38  ;;  %v4011_v54 = vmul.f32 %v7231_v12, %v3999_v29  ;;  %v4150_v26 = vmul.f32 %v7237_v34, %v3999_v29  ;;  %v2660_v30 = vld [vmem:[#allocation2 + $0xb4] sm:$0x1]  ;;  %v3393_v29 = vld [vmem:[#allocation2 + $0xb8] sm:$0x1] }
 0x232   : > { %v7492_v5 = vmul.f32 %v7392_v11, %v4462_v56  ;;  %v7495_v25 = vmul.f32 %v7242_v57, %v4462_v56  ;;  %v7497_v55 = vld [vmem:[#allocation2 + $0xb4] sm:$0x1]  ;;  %v4151_v14 = vmul.f32 %v7237_v34, %v4135_v47  ;;  %v7503_v63 = vld [vmem:[#allocation2 + $0x9c] sm:$0xff]   ;;  %v2668_v38 = vunpack.c.l.bf16 %v2660_v30  ;;  %v7506_v48 = vld [vmem:[#allocation2 + $0xb8] sm:$0x1] }
 0x233   : > { %v7501_v23 = vmul.f32 %v7242_v57, %v4606_v4  ;;  %9284 = vst [vmem:[#allocation146_spill] sm:$0xff] %v7506_v48  ;;  %v4119_v52 = vadd.f32 %v6888_v35, %v4011_v54  ;;  %v4185_v56 = vrot.slane %v4150_v26, 1  ;;  %v9041_v11 = vunpack.c.l.bf16 %v7503_v63 }
 0x234   : > { %9281 = vst [vmem:[#allocation143_spill] sm:$0xff] %v7492_v5  ;;  %9282 = vst [vmem:[#allocation144_spill] sm:$0xff] %v7495_v25  ;;  %v4186_v16 = vrot.slane %v4151_v14, 1  ;;  %v7513_v4 = vmul.f32 %v7272_v41, %v2668_v38  ;;  %v9042_v30 = vunpack.c.h.bf16 %v7503_v63  ;;  %v4221_v57 = vld [vmem:[#allocation2 + $0x254] sm:$0xf]  ;;  %v3401_v54 = vunpack.c.l.bf16 %v3393_v29 }
 0x235   : > { %9283 = vst [vmem:[#allocation145_spill] sm:$0xff] %v7501_v23  ;;  %v4365_v6 = vld [vmem:[#allocation2 + $0x26c] sm:$0x1]  ;;  %v7521_v35 = vmul.f32 %v7272_v41, %v9041_v11  ;;  %v4229_v14 = vunpack.c.l.bf16 %v4221_v57  ;;  %v2034_v26 = vrot.slane %v2032_v7, 7  ;;  %v5608_v38 = vpack.c.bf16 %v1211_v40, %v1211_v40  ;;  %v425_v7 = vld [vmem:[#allocation2 + $0x310] sm:$0x11]  ;;  %v5728_v40 = vpop.f32.mrf.mxu1 }
 0x236   : > { %v4187_v5 = vsel %vm2618_vm15, %v4185_v56, %v4186_v16  ;;  %v7529_v47 = vmul.f32 %v7294_v42, %v9042_v30  ;;  %v4373_v25 = vunpack.c.l.bf16 %v4365_v6  ;;  %v7532_v33 = vmul.f32 %v7294_v42, %v3401_v54  ;;  %v2424_v56 = vld [vmem:[#allocation2 + $0x20c] sm:$0x1]  ;;  %v7543_v30 = vpop.f32.mrf.mxu0  ;;  %v2418_v54 = vld [vmem:[#allocation2 + $0x1f4] sm:$0xf] }
 0x237   : > { %v4211_v23 = vadd.f32 %v4187_v5, %v4119_v52  ;;  %v7535_v11 = vmul.f32 %v7104_v24, %v4229_v14  ;;  %v7538_v29 = vmul.f32 %v7108_v37, %v4229_v14  ;;  %v2137_v16 = vrot.slane %v2135_v53, 7 }
 0x238   : > { %9285 = vst [vmem:[#allocation147_spill] sm:$0xff] %v7529_v47  ;;  %9286 = vst [vmem:[#allocation148_spill] sm:$0xff] %v7532_v33  ;;  %v7541_v57 = vmul.f32 %v7108_v37, %v4373_v25  ;;  %v5604_v14 = vpack.c.bf16 %v1205_v46, %v1205_v46  ;;  %v2037_v53 = vor.u32 %v2035_v60, %v2034_v26  ;;  %v2045_v47 = vrot.slane %v2034_v26, 4  ;;  %v2436_v60 = vld [vmem:[#allocation2 + $0x23c] sm:$0x1]  ;;  %v7557_v59 = vpop.f32.mrf.mxu0 }
 0x239   : > { %9287 = vst [vmem:[#allocation149_spill] sm:$0xff] %v7535_v11  ;;  %9288 = vst [vmem:[#allocation150_spill] sm:$0xff] %v7538_v29  ;;  %v7546_v52 = vadd.f32 %v7395_v58, %v4211_v23  ;;  %v2343_v11 = vld [vmem:[#allocation2 + $0xcc] sm:$0xff]  ;;  %v2140_v25 = vor.u32 %v2138_v61, %v2137_v16  ;;  %v2142_v48 = vrot.slane %v2137_v16, 4  ;;  %v2183_v3 = vshrl.u32 %v5608_v38, 16 }
 0x23a   : > { %9289 = vst [vmem:[#allocation151_spill] sm:$0xff] %v7541_v57  ;;  %v2186_v44 = vshll.u32 %v5608_v38, 16  ;;  %v2151_v58 = vshrl.u32 %v5604_v14, 16  ;;  %v407_v23 = vld [vmem:[#allocation2 + $0x2b0] sm:$0x11]  ;;  %v2344_v46 = vsel %vm6419_vm14, %v2037_v53, %v2343_v11  ;;  %v2154_v16 = vshll.u32 %v5604_v14, 16 }
 0x23b   : > { %9290 = vst [vmem:[#allocation152_spill] sm:$0xff] %v7546_v52  ;;  %v2419_v6 = vsel %vm6413_vm12, %v2140_v25, %v2418_v54  ;;  %v2425_v5 = vsel %vm6286_vm4, %v2142_v48, %v2424_v56  ;;  %v2460_v61 = vld [vmem:[#allocation2 + $0x29c] sm:$0x1]  ;;  %2345 = vst [vmem:[#allocation2 + $0xcc] sm:$0xff] %v2344_v46  ;;  %v2350_v26 = vsel %vm6296_vm6, %v2045_v47, %v2349_v17  ;;  %v2185_v38 = vrot.slane %v2183_v3, 7 }
 0x23c   : > { %2420 = vst [vmem:[#allocation2 + $0x1f4] sm:$0xf] %v2419_v6  ;;  %2426 = vst [vmem:[#allocation2 + $0x20c] sm:$0x1] %v2425_v5  ;;  %v2454_v29 = vld [vmem:[#allocation2 + $0x284] sm:$0xf]  ;;  %v1017_v5 = vpop.f32.mrf.mxu1 }
 0x23d   : > { %v2153_v54 = vrot.slane %v2151_v58, 7  ;;  %v9291_v25 = vmax.f32 %v7453_v36, 0.0  ;;  %2351 = vst [vmem:[#allocation2 + $0xe4] sm:$0x11] %v2350_v26  ;;  %v2430_v56 = vld [vmem:[#allocation2 + $0x224] sm:$0xf]  ;;  %v2188_v46 = vor.u32 %v2186_v44, %v2185_v38 }
 0x23e   : > { %v426_v11 = vsel %vm6296_vm6, 0, %v425_v7  ;;  %v1124_v14 = vmax.f32 %v5728_v40, 0.0  ;;  %v1092_v53 = vmax.f32 %v7469_v18, 0.0  ;;  %v408_v6 = vsel %vm6296_vm6, 0, %v407_v23  ;;  %v434_v57 = vld [vmem:[#allocation2 + $0x340] sm:$0x11]  ;;  %v7569_v7 = vpop.f32.mrf.mxu0 }
 0x23f   : > { %v1186_v48 = vmin.f32 %v9291_v25, 6.0  ;;  %v2190_v17 = vrot.slane %v2185_v38, 4  ;;  %v2156_v3 = vor.u32 %v2154_v16, %v2153_v54  ;;  %v2158_v47 = vrot.slane %v2153_v54, 4  ;;  %427 = vst [vmem:[#allocation2 + $0x310] sm:$0x11] %v426_v11 }
 0x240   : > { %409 = vst [vmem:[#allocation2 + $0x2b0] sm:$0x11] %v408_v6  ;;  %v1220_v58 = vmin.f32 %v1124_v14, 6.0  ;;  %v1188_v26 = vmin.f32 %v1092_v53, 6.0  ;;  %v1118_v25 = vmax.f32 %v1017_v5, 0.0  ;;  %v2455_v18 = vsel %vm6413_vm12, %v2188_v46, %v2454_v29  ;;  %v2355_v29 = vld [vmem:[#allocation2 + $0xfc] sm:$0xff] }
 0x241   : > { %v5591_v36 = vpack.c.bf16 %v1186_v48, %v7475_v8  ;;  %v2461_v40 = vsel %vm6286_vm4, %v2190_v17, %v2460_v61  ;;  %v2431_v44 = vsel %vm6413_vm12, %v2156_v3, %v2430_v56  ;;  %v2437_v23 = vsel %vm6286_vm4, %v2158_v47, %v2436_v60  ;;  %2456 = vst [vmem:[#allocation2 + $0x284] sm:$0xf] %v2455_v18  ;;  %v7579_v48 = vpop.f32.mrf.mxu1  ;;  %v2361_v11 = vld [vmem:[#allocation2 + $0x114] sm:$0x11]  ;;  %v7588_v3 = vpop.f32.mrf.mxu0  ;;  %v2496_v52 = vld [vmem:[#allocation2 + $0x32c] sm:$0x1] }
 0x242   : > { %2462 = vst [vmem:[#allocation2 + $0x29c] sm:$0x1] %v2461_v40  ;;  %2432 = vst [vmem:[#allocation2 + $0x224] sm:$0xf] %v2431_v44  ;;  %v5614_v38 = vpack.c.bf16 %v1220_v58, %v1220_v58  ;;  %v1214_v54 = vmin.f32 %v1118_v25, 6.0  ;;  %v1093_v61 = vmax.f32 %v7487_v28, 0.0  ;;  %v9292_v47 = vunpack.c.l.bf16 %v7461_v22 }
 0x243   : > { %2438 = vst [vmem:[#allocation2 + $0x23c] sm:$0x1] %v2437_v23  ;;  %v2048_v8 = vshrl.u32 %v5591_v36, 16  ;;  %v2051_v16 = vshll.u32 %v5591_v36, 16  ;;  %v435_v56 = vsel %vm6296_vm6, 0, %v434_v57 }
 0x244   : > { %v4220_v53 = vld [vmem:[#allocation2 + $0x1f4] sm:$0xf]  ;;  %v4364_v6 = vld [vmem:[#allocation2 + $0x20c] sm:$0x1]  ;;  %v2231_v46 = vshrl.u32 %v5614_v38, 16  ;;  %v7586_v17 = vpack.c.bf16 %v1214_v54, %v1214_v54  ;;  %v7593_v28 = vmul.f32 %v7481_v62, %v9292_v47  ;;  %v2234_v18 = vshll.u32 %v5614_v38, 16 }
 0x245   : > { %v2050_v5 = vrot.slane %v2048_v8, 7  ;;  %436 = vst [vmem:[#allocation2 + $0x340] sm:$0x11] %v435_v56  ;;  %v4228_v36 = vunpack.c.l.bf16 %v4220_v53  ;;  %v4372_v57 = vunpack.c.l.bf16 %v4364_v6  ;;  %v2896_v58 = vld [vmem:[#allocation2 + $0xe4] sm:$0x1]  ;;  %v1189_v40 = vmin.f32 %v1093_v61, 6.0 }
 0x246   : > { %v3629_v25 = vld [vmem:[#allocation2 + $0xe8] sm:$0x1]  ;;  %v2904_v44 = vunpack.c.l.bf16 %v2896_v58  ;;  %v2233_v47 = vrot.slane %v2231_v46, 7  ;;  %v2490_v6 = vld [vmem:[#allocation2 + $0x314] sm:$0xf] }
 0x247   : > { %v3637_v23 = vunpack.c.l.bf16 %v3629_v25  ;;  %v2053_v8 = vor.u32 %v2051_v16, %v2050_v5  ;;  %v2061_v60 = vrot.slane %v2050_v5, 4  ;;  %v7596_v54 = vmul.f32 %v7104_v24, %v4228_v36  ;;  %v7614_v5 = vpop.f32.mrf.mxu0 }
 0x248   : > { %v7599_v56 = vmul.f32 %v7108_v37, %v4228_v36  ;;  %v7602_v14 = vmul.f32 %v7108_v37, %v4372_v57  ;;  %v7605_v53 = vmul.f32 %v7153_v49, %v2904_v44  ;;  %v2550_v36 = vld [vmem:[#allocation2 + $0x30] sm:$0xff]   ;;  %v3994_v58 = vld [vmem:[#allocation2 + $0x284] sm:$0xf]  ;;  %v2236_v44 = vor.u32 %v2234_v18, %v2233_v47 }
 0x249   : > { %9293 = vst [vmem:[#allocation153_spill] sm:$0xff] %v7596_v54  ;;  %v7608_v38 = vmul.f32 %v7157_v21, %v3637_v23  ;;  %v2356_v16 = vsel %vm6419_vm14, %v2053_v8, %v2355_v29  ;;  %v2362_v61 = vsel %vm6296_vm6, %v2061_v60, %v2361_v11  ;;  %v4130_v25 = vld [vmem:[#allocation2 + $0x29c] sm:$0x1]  ;;  %v7618_v23 = vpack.c.bf16 %v1189_v40, %v1188_v26  ;;  %v3993_v57 = vld [vmem:[#allocation2 + $0x224] sm:$0xf]  ;;  %v7637_v29 = vpop.f32.mrf.mxu0 }
 0x24a   : > { %9294 = vst [vmem:[#allocation154_spill] sm:$0xff] %v7599_v56  ;;  %9295 = vst [vmem:[#allocation155_spill] sm:$0xff] %v7602_v14  ;;  %v4002_v11 = vunpack.c.l.bf16 %v3994_v58  ;;  %v4138_v60 = vunpack.c.l.bf16 %v4130_v25  ;;  %v7622_v54 = vld [vmem:[#allocation2 + $0x29c] sm:$0x1]  ;;  %v2491_v46 = vsel %vm6413_vm12, %v2236_v44, %v2490_v6  ;;  %v2566_v18 = vunpack.c.l.bf16 %v2550_v36 }
 0x24b   : > { %9296 = vst [vmem:[#allocation156_spill] sm:$0xff] %v7608_v38  ;;  %2357 = vst [vmem:[#allocation2 + $0xfc] sm:$0xff] %v2356_v16  ;;  %v4129_v56 = vld [vmem:[#allocation2 + $0x23c] sm:$0x1]  ;;  %v9298_v16 = vunpack.c.l.bf16 %v7503_v63  ;;  %v4001_v25 = vunpack.c.l.bf16 %v3993_v57 }
 0x24c   : > { %2363 = vst [vmem:[#allocation2 + $0x114] sm:$0x11] %v2362_v61  ;;  %9297 = vst [vmem:[#allocation157_spill] sm:$0xff] %v7622_v54  ;;  %v4014_v40 = vmul.f32 %v7231_v12, %v4002_v11  ;;  %v4156_v61 = vmul.f32 %v7237_v34, %v4002_v11  ;;  %v4157_v58 = vmul.f32 %v7237_v34, %v4138_v60  ;;  %v7635_v8 = vld [vmem:[#allocation2 + $0x23c] sm:$0x1]  ;;  %v4137_v6 = vunpack.c.l.bf16 %v4129_v56 }
 0x24d   : > { %v7630_v26 = vmul.f32 %v7481_v62, %v9298_v16  ;;  %9299 = vst [vmem:[#allocation158_spill] sm:$0xff] %v7635_v8  ;;  %2492 = vst [vmem:[#allocation2 + $0x314] sm:$0xf] %v2491_v46  ;;  %v2238_v54 = vrot.slane %v2233_v47, 4  ;;  %v2199_v16 = vshrl.u32 %v7586_v17, 16  ;;  %v4013_v60 = vmul.f32 %v7231_v12, %v4001_v25 }
 0x24e   : > { %v7642_v36 = vadd.f32 %v7015_v13, %v4014_v40  ;;  %v4194_v14 = vrot.slane %v4156_v61, 1  ;;  %v4195_v11 = vrot.slane %v4157_v58, 1  ;;  %v4154_v57 = vmul.f32 %v7237_v34, %v4001_v25  ;;  %v7660_v25 = vpop.f32.mrf.mxu0 }
 0x24f   : > { %v4155_v46 = vmul.f32 %v7237_v34, %v4137_v6  ;;  %v2497_v62 = vsel %vm6286_vm4, %v2238_v54, %v2496_v52  ;;  %v2201_v56 = vrot.slane %v2199_v16, 7  ;;  %v7653_v47 = vadd.f32 %v7038_v43, %v4013_v60  ;;  %v2472_v60 = vld [vmem:[#allocation2 + $0x2cc] sm:$0x1] }
 0x250   : > { %9300 = vst [vmem:[#allocation159_spill] sm:$0xff] %v7642_v36  ;;  %v7650_v44 = vsel %vm2618_vm15, %v4194_v14, %v4195_v11  ;;  %2498 = vst [vmem:[#allocation2 + $0x32c] sm:$0x1] %v2497_v62  ;;  %v2202_v58 = vshll.u32 %v7586_v17, 16  ;;  %v7663_v6 = vmul.f32 %v6460_v9, %v2566_v18  ;;  %v4191_v52 = vrot.slane %v4154_v57, 1 }
 0x251   : > { %9301 = vst [vmem:[#allocation160_spill] sm:$0xff] %v7650_v44  ;;  %9302 = vst [vmem:[#allocation161_spill] sm:$0xff] %v7653_v47  ;;  %v4192_v54 = vrot.slane %v4155_v46, 1  ;;  %v2466_v36 = vld [vmem:[#allocation2 + $0x2b4] sm:$0xf]  ;;  %v7690_v47 = vpop.f32.mrf.mxu0 }
 0x252   : > { %v7655_v13 = vld [vmem:[#allocation2 + $0xfc] sm:$0xff]  }
 0x253   : > { %9303 = vst [vmem:[#allocation162_spill] sm:$0xff] %v7655_v13  ;;  %v2661_v40 = vld [vmem:[#allocation2 + $0x114] sm:$0x1]  ;;  %v9056_v14 = vunpack.c.l.bf16 %v7655_v13  ;;  %v3394_v43 = vld [vmem:[#allocation2 + $0x118] sm:$0x1]  ;;  %v9059_v44 = vunpack.c.h.bf16 %v7655_v13  ;;  %v7672_v8 = vsel %vm2618_vm15, %v4191_v52, %v4192_v54  ;;  %v2206_v54 = vrot.slane %v2201_v56, 4  ;;  %v1020_v13 = vpop.f32.mrf.mxu1 }
 0x254   : > { %v7657_v61 = vld [vmem:[#allocation2 + $0x114] sm:$0x1]  ;;  %v2669_v16 = vunpack.c.l.bf16 %v2661_v40  ;;  %v7666_v11 = vld [vmem:[#allocation2 + $0x118] sm:$0x1]  ;;  %v3402_v62 = vunpack.c.l.bf16 %v3394_v43  ;;  %9305 = vst [vmem:[#allocation164_spill] sm:$0xff] %v7672_v8  ;;  %v2204_v40 = vor.u32 %v2202_v58, %v2201_v56  ;;  %v2064_v58 = vshrl.u32 %v7618_v23, 16 }
 0x255   : > { %9304 = vst [vmem:[#allocation163_spill] sm:$0xff] %v7666_v11  ;;  %v7677_v18 = vmul.f32 %v7272_v41, %v9056_v14  ;;  %v4223_v46 = vld [vmem:[#allocation2 + $0x314] sm:$0xf]  ;;  %v7685_v43 = vmul.f32 %v7294_v42, %v9059_v44  ;;  %v416_v8 = vld [vmem:[#allocation2 + $0x2e0] sm:$0x11]  ;;  %v1121_v11 = vmax.f32 %v1020_v13, 0.0 }
 0x256   : > { %v7680_v57 = vmul.f32 %v7272_v41, %v2669_v16  ;;  %v7688_v17 = vmul.f32 %v7294_v42, %v3402_v62  ;;  %v4231_v52 = vunpack.c.l.bf16 %v4223_v46  ;;  %v2467_v16 = vsel %vm6413_vm12, %v2204_v40, %v2466_v36 }
 0x257   : > { %9306 = vst [vmem:[#allocation165_spill] sm:$0xff] %v7677_v18  ;;  %9308 = vst [vmem:[#allocation167_spill] sm:$0xff] %v7685_v43  ;;  %v2067_v18 = vshll.u32 %v7618_v23, 16  ;;  %v2473_v46 = vsel %vm6286_vm4, %v2206_v54, %v2472_v60  ;;  %v4367_v14 = vld [vmem:[#allocation2 + $0x32c] sm:$0x1]  ;;  %v2066_v36 = vrot.slane %v2064_v58, 7  ;;  %v7714_v54 = vpop.f32.mrf.mxu0 }
 0x258   : > { %9307 = vst [vmem:[#allocation166_spill] sm:$0xff] %v7680_v57  ;;  %9309 = vst [vmem:[#allocation168_spill] sm:$0xff] %v7688_v17  ;;  %v7699_v62 = vmul.f32 %v7104_v24, %v4231_v52  ;;  %v7702_v56 = vmul.f32 %v7108_v37, %v4231_v52  ;;  %v9312_v40 = vmax.f32 %v7579_v48, 0.0  ;;  %v9313_v23 = vmax.f32 %v7516_v27, 0.0  ;;  %v2367_v17 = vld [vmem:[#allocation2 + $0x12c] sm:$0xff] }
 0x259   : > { %2468 = vst [vmem:[#allocation2 + $0x2b4] sm:$0xf] %v2467_v16  ;;  %2474 = vst [vmem:[#allocation2 + $0x2cc] sm:$0x1] %v2473_v46  ;;  %v417_v44 = vsel %vm6296_vm6, 0, %v416_v8  ;;  %v1096_v60 = vmax.f32 %v7543_v30, 0.0  ;;  %v2069_v58 = vor.u32 %v2067_v18, %v2066_v36 }
 0x25a   : > { %9310 = vst [vmem:[#allocation169_spill] sm:$0xff] %v7699_v62  ;;  %9311 = vst [vmem:[#allocation170_spill] sm:$0xff] %v7702_v56  ;;  %v1223_v43 = vmin.f32 %v9312_v40, 6.0  ;;  %v1191_v57 = vmin.f32 %v9313_v23, 6.0  ;;  %v4375_v62 = vunpack.c.l.bf16 %v4367_v14  ;;  %v2373_v16 = vld [vmem:[#allocation2 + $0x144] sm:$0x11] }
 0x25b   : > { %418 = vst [vmem:[#allocation2 + $0x2e0] sm:$0x11] %v417_v44  ;;  %v2077_v48 = vrot.slane %v2066_v36, 4  ;;  %v1098_v27 = vmax.f32 %v7557_v59, 0.0  ;;  %v1217_v8 = vmin.f32 %v1121_v11, 6.0  ;;  %v1192_v14 = vmin.f32 %v1096_v60, 6.0  ;;  %v7726_v60 = vpop.f32.mrf.mxu0 }
 0x25c   : > { %v5616_v46 = vpack.c.bf16 %v1223_v43, %v1223_v43  ;;  %v7718_v40 = vmul.f32 %v7108_v37, %v4375_v62  ;;  %v1099_v23 = vmax.f32 %v7569_v7, 0.0  ;;  %v2368_v44 = vsel %vm6419_vm14, %v2069_v58, %v2367_v17  ;;  %v2502_v59 = vld [vmem:[#allocation2 + $0x344] sm:$0xf]  ;;  %v2508_v43 = vld [vmem:[#allocation2 + $0x35c] sm:$0x1] }
 0x25d   : > { %v2374_v30 = vsel %vm6296_vm6, %v2077_v48, %v2373_v16  ;;  %2369 = vst [vmem:[#allocation2 + $0x12c] sm:$0xff] %v2368_v44  ;;  %v5612_v62 = vpack.c.bf16 %v1217_v8, %v1217_v8  ;;  %v5595_v36 = vpack.c.bf16 %v1192_v14, %v1191_v57  ;;  %v1194_v11 = vmin.f32 %v1098_v27, 6.0 }
 0x25e   : > { %9314 = vst [vmem:[#allocation171_spill] sm:$0xff] %v7718_v40  ;;  %v2247_v13 = vshrl.u32 %v5616_v46, 16  ;;  %v2250_v52 = vshll.u32 %v5616_v46, 16  ;;  %2375 = vst [vmem:[#allocation2 + $0x144] sm:$0x11] %v2374_v30  ;;  %v1195_v38 = vmin.f32 %v1099_v23, 6.0 }
 0x25f   : > { %v1101_v17 = vmax.f32 %v7588_v3, 0.0  ;;  %v1102_v16 = vmax.f32 %v7614_v5, 0.0  ;;  %v2215_v46 = vshrl.u32 %v5612_v62, 16  ;;  %v2218_v18 = vshll.u32 %v5612_v62, 16  ;;  %v7736_v3 = vpop.f32.mrf.mxu0  ;;  %v2484_v62 = vld [vmem:[#allocation2 + $0x2fc] sm:$0x1] }
 0x260   : > { %v4222_v7 = vld [vmem:[#allocation2 + $0x2b4] sm:$0xf]  ;;  %v2249_v56 = vrot.slane %v2247_v13, 7  ;;  %v4366_v48 = vld [vmem:[#allocation2 + $0x2cc] sm:$0x1]  ;;  %v2080_v44 = vshrl.u32 %v5595_v36, 16 }
 0x261   : > { %v4230_v58 = vunpack.c.l.bf16 %v4222_v7  ;;  %v4374_v30 = vunpack.c.l.bf16 %v4366_v48  ;;  %v2083_v8 = vshll.u32 %v5595_v36, 16  ;;  %v2217_v14 = vrot.slane %v2215_v46, 7  ;;  %v2379_v46 = vld [vmem:[#allocation2 + $0x15c] sm:$0xff] }
 0x262   : > { %v2252_v40 = vor.u32 %v2250_v52, %v2249_v56  ;;  %v2254_v33 = vrot.slane %v2249_v56, 4  ;;  %v2082_v23 = vrot.slane %v2080_v44, 7  ;;  %v2478_v52 = vld [vmem:[#allocation2 + $0x2e4] sm:$0xf]  ;;  %v2385_v44 = vld [vmem:[#allocation2 + $0x174] sm:$0x11] }
 0x263   : > { %v7731_v57 = vmul.f32 %v7104_v24, %v4230_v58  ;;  %v7734_v27 = vmul.f32 %v7108_v37, %v4230_v58  ;;  %v7739_v5 = vmul.f32 %v7108_v37, %v4374_v30  ;;  %v5597_v24 = vpack.c.bf16 %v1195_v38, %v1194_v11 }
 0x264   : > { %v2503_v13 = vsel %vm6413_vm12, %v2252_v40, %v2502_v59  ;;  %v2509_v56 = vsel %vm6286_vm4, %v2254_v33, %v2508_v43  ;;  %v2220_v7 = vor.u32 %v2218_v18, %v2217_v14  ;;  %v2222_v58 = vrot.slane %v2217_v14, 4  ;;  %v7760_v14 = vpop.f32.mrf.mxu0 }
 0x265   : > { %9315 = vst [vmem:[#allocation172_spill] sm:$0xff] %v7731_v57  ;;  %9316 = vst [vmem:[#allocation173_spill] sm:$0xff] %v7734_v27  ;;  %v2085_v48 = vor.u32 %v2083_v8, %v2082_v23  ;;  %v2897_v30 = vld [vmem:[#allocation2 + $0x144] sm:$0x1]  ;;  %v3630_v57 = vld [vmem:[#allocation2 + $0x148] sm:$0x1]  ;;  %v7749_v33 = vadd.f32 %v6535_v50, %v7630_v26  ;;  %v9318_v38 = vunpack.c.l.bf16 %v7461_v22 }
 0x266   : > { %9317 = vst [vmem:[#allocation174_spill] sm:$0xff] %v7739_v5  ;;  %2504 = vst [vmem:[#allocation2 + $0x344] sm:$0xf] %v2503_v13  ;;  %v2093_v40 = vrot.slane %v2082_v23, 4  ;;  %v2905_v43 = vunpack.c.l.bf16 %v2897_v30  ;;  %v3638_v18 = vunpack.c.l.bf16 %v3630_v57  ;;  %v2479_v11 = vsel %vm6413_vm12, %v2220_v7, %v2478_v52 }
 0x267   : > { %2510 = vst [vmem:[#allocation2 + $0x35c] sm:$0x1] %v2509_v56  ;;  %v7754_v59 = vmul.f32 %v7272_v41, %v9318_v38  ;;  %v2485_v8 = vsel %vm6286_vm4, %v2222_v58, %v2484_v62  ;;  %2480 = vst [vmem:[#allocation2 + $0x2e4] sm:$0xf] %v2479_v11  ;;  %v2380_v50 = vsel %vm6419_vm14, %v2085_v48, %v2379_v46  ;;  %v2096_v26 = vshrl.u32 %v5597_v24, 16  ;;  %v7772_v56 = vld [vmem:[#allocation2 + $0x6c] sm:$0xff]  }
 0x268   : > { %2486 = vst [vmem:[#allocation2 + $0x2fc] sm:$0x1] %v2485_v8  ;;  %v2386_v22 = vsel %vm6296_vm6, %v2093_v40, %v2385_v44  ;;  %v2099_v23 = vshll.u32 %v5597_v24, 16  ;;  %v7767_v57 = vmul.f32 %v7153_v49, %v2905_v43  ;;  %v7770_v32 = vmul.f32 %v7157_v21, %v3638_v18  ;;  %2381 = vst [vmem:[#allocation2 + $0x15c] sm:$0xff] %v2380_v50  ;;  %v2391_v46 = vld [vmem:[#allocation2 + $0x18c] sm:$0xff] }
 0x269   : > { %2387 = vst [vmem:[#allocation2 + $0x174] sm:$0x11] %v2386_v22  ;;  %v1197_v0 = vmin.f32 %v1101_v17, 6.0  ;;  %v1198_v13 = vmin.f32 %v1102_v16, 6.0  ;;  %v2098_v52 = vrot.slane %v2096_v26, 7  ;;  %v1104_v62 = vmax.f32 %v7637_v29, 0.0  ;;  %v7780_v17 = vpop.f32.mrf.mxu0 }
 0x26a   : > { %9319 = vst [vmem:[#allocation175_spill] sm:$0xff] %v7770_v32  ;;  %v1105_v7 = vmax.f32 %v7660_v25, 0.0  ;;  %v1107_v58 = vmax.f32 %v7690_v47, 0.0  ;;  %v2397_v44 = vld [vmem:[#allocation2 + $0x1a4] sm:$0x11]  ;;  %v1108_v40 = vmax.f32 %v7714_v54, 0.0 }
 0x26b   : > { %v5599_v30 = vpack.c.bf16 %v1198_v13, %v1197_v0  ;;  %v2101_v38 = vor.u32 %v2099_v23, %v2098_v52  ;;  %v2109_v43 = vrot.slane %v2098_v52, 4  ;;  %v1200_v29 = vmin.f32 %v1104_v62, 6.0  ;;  %v7784_v18 = vld [vmem:[#allocation2 + $0xcc] sm:$0xff]   ;;  %v7794_v62 = vpop.f32.mrf.mxu0 }
 0x26c   : > { %v1201_v50 = vmin.f32 %v1105_v7, 6.0  ;;  %v1203_v26 = vmin.f32 %v1107_v58, 6.0  ;;  %v1204_v0 = vmin.f32 %v1108_v40, 6.0  ;;  %v7799_v7 = vrot.slane %v6437_v31, %v7075_v1  ;;  %v2439_v32 = vld [vmem:[#allocation2 + $0x24c] sm:$0xff] }
 0x26d   : > { %v2112_v11 = vshrl.u32 %v5599_v30, 16  ;;  %v2115_v8 = vshll.u32 %v5599_v30, 16  ;;  %v2392_v22 = vsel %vm6419_vm14, %v2101_v38, %v2391_v46  ;;  %v2398_v54 = vsel %vm6296_vm6, %v2109_v43, %v2397_v44  ;;  %v7838_v24 = vpop.f32.mrf.mxu0 }
 0x26e   : > { %v7782_v16 = vld [vmem:[#allocation2 + $0x35c] sm:$0x1]  ;;  %v3995_v23 = vld [vmem:[#allocation2 + $0x2e4] sm:$0xf]  ;;  %2393 = vst [vmem:[#allocation2 + $0x18c] sm:$0xff] %v2392_v22  ;;  %v7792_v52 = vpack.c.bf16 %v1201_v50, %v1200_v29  ;;  %v9321_v46 = vrot.slane %v6525_v20, 1  ;;  %v7812_v22 = vpack.c.bf16 %v1204_v0, %v1203_v26 }
 0x26f   : > { %9320 = vst [vmem:[#allocation176_spill] sm:$0xff] %v7782_v16  ;;  %v4131_v13 = vld [vmem:[#allocation2 + $0x2fc] sm:$0x1]  ;;  %2399 = vst [vmem:[#allocation2 + $0x1a4] sm:$0x11] %v2398_v54  ;;  %v9322_v44 = vrot.slane %v6522_v19, 1  ;;  %v4003_v30 = vunpack.c.l.bf16 %v3995_v23 }
 0x270   : > { %v4139_v40 = vunpack.c.l.bf16 %v4131_v13  ;;  %v7808_v38 = vld [vmem:[#allocation2 + $0x2fc] sm:$0x1]  ;;  %v2662_v29 = vld [vmem:[#allocation2 + $0x174] sm:$0x1]  ;;  %v2114_v50 = vrot.slane %v2112_v11, 7 }
 0x271   : > { %v7806_v58 = vsel %vm2618_vm15, %v9322_v44, %v9321_v46  ;;  %9323 = vst [vmem:[#allocation177_spill] sm:$0xff] %v7808_v38  ;;  %v7810_v43 = vld [vmem:[#allocation2 + $0x15c] sm:$0xff]   ;;  %v2670_v20 = vunpack.c.l.bf16 %v2662_v29  ;;  %v7816_v37 = vld [vmem:[#allocation2 + $0x174] sm:$0x1]  ;;  %v3395_v46 = vld [vmem:[#allocation2 + $0x178] sm:$0x1]  ;;  %v4015_v13 = vmul.f32 %v7231_v12, %v4003_v30  ;;  %v4158_v44 = vmul.f32 %v7237_v34, %v4003_v30 }
 0x272   : > { %v9067_v36 = vunpack.c.l.bf16 %v7810_v43  ;;  %9324 = vst [vmem:[#allocation178_spill] sm:$0xff] %v7816_v37  ;;  %v9070_v19 = vunpack.c.h.bf16 %v7810_v43  ;;  %v7819_v23 = vld [vmem:[#allocation2 + $0x178] sm:$0x1]  ;;  %v4159_v11 = vmul.f32 %v7237_v34, %v4139_v40  ;;  %v3403_v54 = vunpack.c.l.bf16 %v3395_v46  ;;  %v2427_v34 = vld [vmem:[#allocation2 + $0x21c] sm:$0xff] }
 0x273   : > { %9325 = vst [vmem:[#allocation179_spill] sm:$0xff] %v7819_v23  ;;  %v7831_v29 = vmul.f32 %v7272_v41, %v2670_v20  ;;  %v7841_v30 = vadd.f32 %v7182_v51, %v4015_v13  ;;  %v4197_v40 = vrot.slane %v4158_v44, 1  ;;  %v2117_v46 = vor.u32 %v2115_v8, %v2114_v50  ;;  %v2409_v38 = vld [vmem:[#allocation2 + $0x1d4] sm:$0x11] }
 0x274   : > { %v7828_v0 = vmul.f32 %v7272_v41, %v9067_v36  ;;  %v7836_v48 = vmul.f32 %v7294_v42, %v9070_v19  ;;  %v4198_v26 = vrot.slane %v4159_v11, 1  ;;  %v2403_v36 = vld [vmem:[#allocation2 + $0x1bc] sm:$0xff]  ;;  %v7846_v20 = vmul.f32 %v7294_v42, %v3403_v54 }
 0x275   : > { %9327 = vst [vmem:[#allocation181_spill] sm:$0xff] %v7841_v30  ;;  %v2125_v16 = vrot.slane %v2114_v50, 4  ;;  %v2128_v51 = vshrl.u32 %v7792_v52, 16  ;;  %v2131_v13 = vshll.u32 %v7792_v52, 16  ;;  %v9330_v44 = vunpack.c.l.bf16 %v7772_v56  ;;  %v2433_v30 = vld [vmem:[#allocation2 + $0x234] sm:$0x11] }
 0x276   : > { %9326 = vst [vmem:[#allocation180_spill] sm:$0xff] %v7836_v48  ;;  %9328 = vst [vmem:[#allocation182_spill] sm:$0xff] %v7846_v20  ;;  %v7849_v19 = vsel %vm2618_vm15, %v4197_v40, %v4198_v26  ;;  %v2898_v27 = vld [vmem:[#allocation2 + $0x1a4] sm:$0x1]  ;;  %v3631_v5 = vld [vmem:[#allocation2 + $0x1a8] sm:$0x1]  ;;  %v2404_v50 = vsel %vm6419_vm14, %v2117_v46, %v2403_v36  ;;  %v7861_v26 = vpop.f32.mrf.mxu0 }
 0x277   : > { %9329 = vst [vmem:[#allocation183_spill] sm:$0xff] %v7849_v19  ;;  %v7856_v11 = vmul.f32 %v7799_v7, %v9330_v44  ;;  %v2906_v25 = vunpack.c.l.bf16 %v2898_v27  ;;  %v3639_v8 = vunpack.c.l.bf16 %v3631_v5  ;;  %2405 = vst [vmem:[#allocation2 + $0x1bc] sm:$0xff] %v2404_v50  ;;  %v2410_v40 = vsel %vm6296_vm6, %v2125_v16, %v2409_v38  ;;  %v7867_v44 = vld [vmem:[#allocation10 + $0xb8] sm:$0xff]   ;;  %v2421_v36 = vld [vmem:[#allocation2 + $0x204] sm:$0x11] }
 0x278   : > { %v2130_v47 = vrot.slane %v2128_v51, 7  ;;  %v2144_v52 = vshrl.u32 %v7812_v22, 16  ;;  %v2147_v19 = vshll.u32 %v7812_v22, 16  ;;  %9331 = vst [vmem:[#allocation184_spill] sm:$0xff] %v7867_v44  ;;  %2411 = vst [vmem:[#allocation2 + $0x1d4] sm:$0x11] %v2410_v40  ;;  %5730 = vmatprep.subr.bf16.mxu1 %v7867_v44  ;;  %v7881_v23 = vpop.f32.mrf.mxu0 }
 0x279   : > { %v7870_v54 = vmul.f32 %v7153_v49, %v2906_v25  ;;  %v7873_v27 = vmul.f32 %v7157_v21, %v3639_v8  ;;  %v2415_v5 = vld [vmem:[#allocation2 + $0x1ec] sm:$0xff]  ;;  %v1110_v46 = vmax.f32 %v7726_v60, 0.0  ;;  %v1111_v16 = vmax.f32 %v7736_v3, 0.0  ;;  %v2445_v44 = vld [vmem:[#allocation2 + $0x264] sm:$0x11] }
 0x27a   : > { %v2133_v38 = vor.u32 %v2131_v13, %v2130_v47  ;;  %v2141_v51 = vrot.slane %v2130_v47, 4  ;;  %v2146_v50 = vrot.slane %v2144_v52, 7  ;;  %v1113_v22 = vmax.f32 %v7760_v14, 0.0 }
 0x27b   : > { %9332 = vst [vmem:[#allocation185_spill] sm:$0xff] %v7870_v54  ;;  %9333 = vst [vmem:[#allocation186_spill] sm:$0xff] %v7873_v27  ;;  %v1206_v40 = vmin.f32 %v1110_v46, 6.0  ;;  %v1207_v12 = vmin.f32 %v1111_v16, 6.0  ;;  %v1114_v25 = vmax.f32 %v7780_v17, 0.0  ;;  %v1116_v8 = vmax.f32 %v7794_v62, 0.0  ;;  %v7899_v62 = vpop.f32.mrf.mxu0 }
 0x27c   : > { %v2416_v60 = vsel %vm6419_vm14, %v2133_v38, %v2415_v5  ;;  %v2422_v3 = vsel %vm6296_vm6, %v2141_v51, %v2421_v36  ;;  %v2149_v47 = vor.u32 %v2147_v19, %v2146_v50  ;;  %v2157_v13 = vrot.slane %v2146_v50, 4  ;;  %v7918_v36 = vld [vmem:[#allocation2 + $0x9c] sm:$0xff]  }
 0x27d   : > { %2417 = vst [vmem:[#allocation2 + $0x1ec] sm:$0xff] %v2416_v60  ;;  %2423 = vst [vmem:[#allocation2 + $0x204] sm:$0x11] %v2422_v3  ;;  %v5605_v14 = vpack.c.bf16 %v1207_v12, %v1206_v40  ;;  %v1209_v52 = vmin.f32 %v1113_v22, 6.0  ;;  %v1210_v51 = vmin.f32 %v1114_v25, 6.0  ;;  %v7897_v17 = vmin.f32 %v1116_v8, 6.0 }
 0x27e   : > { %v2428_v46 = vsel %vm6419_vm14, %v2149_v47, %v2427_v34  ;;  %v2434_v16 = vsel %vm6296_vm6, %v2157_v13, %v2433_v30  ;;  %v7895_v19 = vld [vmem:[#allocation2 + $0x1bc] sm:$0xff]   ;;  %v9336_v60 = vunpack.c.l.bf16 %v7784_v18  ;;  %v9337_v47 = vunpack.c.l.bf16 %v7772_v56 }
 0x27f   : > { %9334 = vst [vmem:[#allocation187_spill] sm:$0xff] %v7895_v19  ;;  %2429 = vst [vmem:[#allocation2 + $0x21c] sm:$0xff] %v2428_v46  ;;  %v2160_v12 = vshrl.u32 %v5605_v14, 16  ;;  %v2163_v38 = vshll.u32 %v5605_v14, 16  ;;  %v9080_v34 = vunpack.c.l.bf16 %v7895_v19  ;;  %v2663_v50 = vld [vmem:[#allocation2 + $0x1d4] sm:$0x1]  ;;  %v9083_v30 = vunpack.c.h.bf16 %v7895_v19 }
 0x280   : > { %2435 = vst [vmem:[#allocation2 + $0x234] sm:$0x11] %v2434_v16  ;;  %v7902_v22 = vld [vmem:[#allocation2 + $0x1d4] sm:$0x1]  ;;  %v3396_v40 = vld [vmem:[#allocation2 + $0x1d8] sm:$0x1]  ;;  %v7908_v3 = vmul.f32 %v7799_v7, %v9336_v60  ;;  %v7913_v25 = vmul.f32 %v7153_v49, %v9337_v47  ;;  %v2671_v8 = vunpack.c.l.bf16 %v2663_v50  ;;  %v5607_v47 = vpack.c.bf16 %v1210_v51, %v1209_v52 }
 0x281   : > { %9335 = vst [vmem:[#allocation188_spill] sm:$0xff] %v7902_v22  ;;  %v3404_v14 = vunpack.c.l.bf16 %v3396_v40  ;;  %v7916_v46 = vld [vmem:[#allocation2 + $0x1d8] sm:$0x1]  ;;  %v2162_v16 = vrot.slane %v2160_v12, 7  ;;  %v7923_v5 = vmul.f32 %v7272_v41, %v9080_v34  ;;  %v7928_v60 = vmul.f32 %v7294_v42, %v9083_v30  ;;  %v7937_v34 = vpop.f32.mrf.mxu0  ;;  %v2475_v54 = vld [vmem:[#allocation2 + $0x2dc] sm:$0xff] }
 0x282   : > { %9338 = vst [vmem:[#allocation189_spill] sm:$0xff] %v7916_v46  ;;  %v7932_v40 = vmul.f32 %v7272_v41, %v2671_v8  ;;  %v2179_v20 = vshll.u32 %v5607_v47, 16  ;;  %v9343_v52 = vunpack.c.l.bf16 %v7784_v18  ;;  %v2457_v8 = vld [vmem:[#allocation2 + $0x294] sm:$0x11] }
 0x283   : > { %9339 = vst [vmem:[#allocation190_spill] sm:$0xff] %v7923_v5  ;;  %9340 = vst [vmem:[#allocation191_spill] sm:$0xff] %v7928_v60  ;;  %v7935_v12 = vmul.f32 %v7294_v42, %v3404_v14  ;;  %v2165_v13 = vor.u32 %v2163_v38, %v2162_v16  ;;  %v2173_v27 = vrot.slane %v2162_v16, 4  ;;  %v7939_v5 = vld [vmem:[#allocation2 + $0xfc] sm:$0xff]   ;;  %v2176_v60 = vshrl.u32 %v5607_v47, 16 }
 0x284   : > { %9341 = vst [vmem:[#allocation192_spill] sm:$0xff] %v7932_v40  ;;  %v2899_v19 = vld [vmem:[#allocation2 + $0x204] sm:$0x1]  ;;  %v3632_v30 = vld [vmem:[#allocation2 + $0x208] sm:$0x1]  ;;  %v7944_v51 = vmul.f32 %v7153_v49, %v9343_v52 }
 0x285   : > { %9342 = vst [vmem:[#allocation193_spill] sm:$0xff] %v7935_v12  ;;  %v2907_v16 = vunpack.c.l.bf16 %v2899_v19  ;;  %v3640_v50 = vunpack.c.l.bf16 %v3632_v30  ;;  %v2440_v47 = vsel %vm6419_vm14, %v2165_v13, %v2439_v32  ;;  %v2446_v52 = vsel %vm6296_vm6, %v2173_v27, %v2445_v44  ;;  %v866_v32 = vpop.f32.mrf.mxu0 }
 0x286   : > { %v7949_v46 = vld [vmem:[#allocation2 + $0x21c] sm:$0xff]   ;;  %v2178_v37 = vrot.slane %v2176_v60, 7  ;;  %2441 = vst [vmem:[#allocation2 + $0x24c] sm:$0xff] %v2440_v47  ;;  %2447 = vst [vmem:[#allocation2 + $0x264] sm:$0x11] %v2446_v52 }
 0x287   : > { %9344 = vst [vmem:[#allocation194_spill] sm:$0xff] %v7949_v46  ;;  %v2664_v48 = vld [vmem:[#allocation2 + $0x234] sm:$0x1]  ;;  %v7959_v38 = vmul.f32 %v7153_v49, %v2907_v16  ;;  %v7962_v19 = vmul.f32 %v7157_v21, %v3640_v50  ;;  %v9090_v30 = vunpack.c.l.bf16 %v7949_v46  ;;  %v3397_v12 = vld [vmem:[#allocation2 + $0x238] sm:$0x1]  ;;  %v9095_v27 = vunpack.c.h.bf16 %v7949_v46  ;;  %v2451_v52 = vld [vmem:[#allocation2 + $0x27c] sm:$0xff] }
 0x288   : > { %v7951_v22 = vld [vmem:[#allocation2 + $0x234] sm:$0x1]  ;;  %v2672_v14 = vunpack.c.l.bf16 %v2664_v48  ;;  %v7965_v40 = vld [vmem:[#allocation2 + $0x238] sm:$0x1]  ;;  %v3405_v13 = vunpack.c.l.bf16 %v3397_v12  ;;  %v2181_v44 = vor.u32 %v2179_v20, %v2178_v37  ;;  %v2189_v50 = vrot.slane %v2178_v37, 4 }
 0x289   : > { %9345 = vst [vmem:[#allocation195_spill] sm:$0xff] %v7951_v22  ;;  %9346 = vst [vmem:[#allocation196_spill] sm:$0xff] %v7959_v38  ;;  %v7975_v48 = vmul.f32 %v7272_v41, %v9090_v30  ;;  %v7983_v12 = vmul.f32 %v7294_v42, %v9095_v27  ;;  %v9353_v30 = vmax.f32 %v7838_v24, 0.0  ;;  %v1120_v22 = vmax.f32 %v7881_v23, 0.0  ;;  %v868_v38 = vpop.f32.mrf.mxu0  ;;  %v283_v23 = vld [vmem:[#allocation2 + $0x48] sm:$0x11] }
 0x28a   : > { %9347 = vst [vmem:[#allocation197_spill] sm:$0xff] %v7962_v19  ;;  %9348 = vst [vmem:[#allocation198_spill] sm:$0xff] %v7965_v40  ;;  %v7978_v47 = vmul.f32 %v7272_v41, %v2672_v14  ;;  %v7986_v60 = vmul.f32 %v7294_v42, %v3405_v13  ;;  %v9354_v14 = vmax.f32 %v7861_v26, 0.0  ;;  %v2452_v27 = vsel %vm6419_vm14, %v2181_v44, %v2451_v52  ;;  %v286_v46 = vld [vmem:[#allocation2 + $0x50] sm:$0x11] }
 0x28b   : > { %9349 = vst [vmem:[#allocation199_spill] sm:$0xff] %v7975_v48  ;;  %9351 = vst [vmem:[#allocation201_spill] sm:$0xff] %v7983_v12  ;;  %v1213_v40 = vmin.f32 %v9353_v30, 6.0  ;;  %v2458_v20 = vsel %vm6296_vm6, %v2189_v50, %v2457_v8  ;;  %v1122_v37 = vmax.f32 %v7899_v62, 0.0  ;;  %v1216_v30 = vmin.f32 %v1120_v22, 6.0  ;;  %v9355_v8 = vld [vmem:[#allocation20_spill] sm:$0xff] }
 0x28c   : > { %9350 = vst [vmem:[#allocation200_spill] sm:$0xff] %v7978_v47  ;;  %9352 = vst [vmem:[#allocation202_spill] sm:$0xff] %v7986_v60  ;;  %v1215_v19 = vmin.f32 %v9354_v14, 6.0  ;;  %v1123_v26 = vmax.f32 %v7937_v34, 0.0  ;;  %v1125_v13 = vmax.f32 %v866_v32, 0.0  ;;  %v1126_v60 = vmax.f32 %v868_v38, 0.0 }
 0x28d   : > { %2453 = vst [vmem:[#allocation2 + $0x27c] sm:$0xff] %v2452_v27  ;;  %2459 = vst [vmem:[#allocation2 + $0x294] sm:$0x11] %v2458_v20  ;;  %v5609_v24 = vpack.c.bf16 %v1213_v40, %v7897_v17  ;;  %v2900_v14 = vld [vmem:[#allocation2 + $0x264] sm:$0x1]  ;;  %v1218_v48 = vmin.f32 %v1122_v37, 6.0  ;;  %v8004_v44 = vrot.slane %v6437_v31, %v7365_v15  ;;  %v8008_v62 = vrot.slane %v6437_v31, %v9355_v8 }
 0x28e   : > { %v3633_v16 = vld [vmem:[#allocation2 + $0x268] sm:$0x1]  ;;  %v2908_v27 = vunpack.c.l.bf16 %v2900_v14  ;;  %v5611_v40 = vpack.c.bf16 %v1216_v30, %v1215_v19  ;;  %v1219_v34 = vmin.f32 %v1123_v26, 6.0  ;;  %v1221_v32 = vmin.f32 %v1125_v13, 6.0  ;;  %v2463_v26 = vld [vmem:[#allocation2 + $0x2ac] sm:$0xff] }
 0x28f   : > { %v3641_v50 = vunpack.c.l.bf16 %v3633_v16  ;;  %v2192_v17 = vshrl.u32 %v5609_v24, 16  ;;  %v2195_v22 = vshll.u32 %v5609_v24, 16  ;;  %v1222_v52 = vmin.f32 %v1126_v60, 6.0  ;;  %v2469_v13 = vld [vmem:[#allocation2 + $0x2c4] sm:$0x11] }
 0x290   : > { %v8011_v20 = vmul.f32 %v7153_v49, %v2908_v27  ;;  %v284_v12 = vsel %vm6296_vm6, 0, %v283_v23  ;;  %v2208_v31 = vshrl.u32 %v5611_v40, 16  ;;  %v2211_v47 = vshll.u32 %v5611_v40, 16 }
 0x291   : > { %v8014_v38 = vmul.f32 %v7157_v21, %v3641_v50  ;;  %v2194_v37 = vrot.slane %v2192_v17, 7  ;;  %v5613_v14 = vpack.c.bf16 %v1219_v34, %v1218_v48  ;;  %v8018_v16 = vpack.c.bf16 %v1222_v52, %v1221_v32  ;;  %285 = vst [vmem:[#allocation2 + $0x48] sm:$0x11] %v284_v12 }
 0x292   : > { %9356 = vst [vmem:[#allocation20_spill] sm:$0xff] %v8011_v20  ;;  %v2210_v23 = vrot.slane %v2208_v31, 7  ;;  %v9360_v40 = vunpack.c.l.bf16 %v7918_v36  ;;  %v9361_v12 = vunpack.c.l.bf16 %v7939_v5 }
 0x293   : > { %9357 = vst [vmem:[#allocation203_spill] sm:$0xff] %v8014_v38  ;;  %v2197_v24 = vor.u32 %v2195_v22, %v2194_v37  ;;  %v2205_v30 = vrot.slane %v2194_v37, 4  ;;  %v9362_v22 = vld [vmem:[#allocation24_spill] sm:$0xff] }
 0x294   : > { %v8022_v27 = vld [vmem:[#allocation2 + $0x27c] sm:$0xff]   ;;  %v2665_v50 = vld [vmem:[#allocation2 + $0x294] sm:$0x1]  ;;  %v8029_v48 = vmul.f32 %v8004_v44, %v9360_v40  ;;  %v8034_v34 = vmul.f32 %v8004_v44, %v9361_v12  ;;  %v9363_v32 = vunpack.c.l.bf16 %v9362_v22  ;;  %v3398_v38 = vld [vmem:[#allocation2 + $0x298] sm:$0x1] }
 0x295   : > { %9358 = vst [vmem:[#allocation204_spill] sm:$0xff] %v8022_v27  ;;  %v8024_v17 = vld [vmem:[#allocation2 + $0x294] sm:$0x1]  ;;  %v9104_v37 = vunpack.c.l.bf16 %v8022_v27  ;;  %v2673_v60 = vunpack.c.l.bf16 %v2665_v50  ;;  %v9107_v19 = vunpack.c.h.bf16 %v8022_v27  ;;  %v8044_v40 = vld [vmem:[#allocation2 + $0x298] sm:$0x1]  ;;  %v3406_v20 = vunpack.c.l.bf16 %v3398_v38 }
 0x296   : > { %9359 = vst [vmem:[#allocation205_spill] sm:$0xff] %v8024_v17  ;;  %v8039_v52 = vmul.f32 %v8008_v62, %v9363_v32  ;;  %9364 = vst [vmem:[#allocation24_spill] sm:$0xff] %v8044_v40  ;;  %v2464_v12 = vsel %vm6419_vm14, %v2197_v24, %v2463_v26  ;;  %v2470_v32 = vsel %vm6296_vm6, %v2205_v30, %v2469_v13  ;;  %v2481_v26 = vld [vmem:[#allocation2 + $0x2f4] sm:$0x11]  ;;  %v2221_v13 = vrot.slane %v2210_v23, 4 }
 0x297   : > { %v8054_v50 = vmul.f32 %v7272_v41, %v9104_v37  ;;  %v8057_v31 = vmul.f32 %v7272_v41, %v2673_v60  ;;  %v8062_v38 = vmul.f32 %v7294_v42, %v9107_v19  ;;  %2465 = vst [vmem:[#allocation2 + $0x2ac] sm:$0xff] %v2464_v12  ;;  %2471 = vst [vmem:[#allocation2 + $0x2c4] sm:$0x11] %v2470_v32  ;;  %v2224_v40 = vshrl.u32 %v5613_v14, 16  ;;  %v2487_v60 = vld [vmem:[#allocation2 + $0x30c] sm:$0xff] }
 0x298   : > { %v2213_v24 = vor.u32 %v2211_v47, %v2210_v23  ;;  %v8065_v30 = vmul.f32 %v7294_v42, %v3406_v20  ;;  %v2227_v37 = vshll.u32 %v5613_v14, 16  ;;  %v2240_v19 = vshrl.u32 %v8018_v16, 16  ;;  %v2551_v32 = vld [vmem:[#allocation2 + $0x48] sm:$0x1]  ;;  %v2505_v17 = vld [vmem:[#allocation2 + $0x354] sm:$0x11] }
 0x299   : > { %9365 = vst [vmem:[#allocation206_spill] sm:$0xff] %v8054_v50  ;;  %9366 = vst [vmem:[#allocation207_spill] sm:$0xff] %v8057_v31  ;;  %v289_v50 = vld [vmem:[#allocation2 + $0x58] sm:$0x11]  ;;  %v2243_v12 = vshll.u32 %v8018_v16, 16  ;;  %v2482_v20 = vsel %vm6296_vm6, %v2221_v13, %v2481_v26  ;;  %v2226_v23 = vrot.slane %v2224_v40, 7  ;;  %v2567_v16 = vunpack.c.l.bf16 %v2551_v32 }
 0x29a   : > { %9367 = vst [vmem:[#allocation208_spill] sm:$0xff] %v8062_v38  ;;  %9368 = vst [vmem:[#allocation209_spill] sm:$0xff] %v8065_v30  ;;  %v2476_v27 = vsel %vm6419_vm14, %v2213_v24, %v2475_v54  ;;  %v287_v14 = vsel %vm6296_vm6, 0, %v286_v46  ;;  %v2493_v38 = vld [vmem:[#allocation2 + $0x324] sm:$0x11]  ;;  %v2242_v31 = vrot.slane %v2240_v19, 7 }
 0x29b   : > { %2477 = vst [vmem:[#allocation2 + $0x2dc] sm:$0xff] %v2476_v27  ;;  %2483 = vst [vmem:[#allocation2 + $0x2f4] sm:$0x11] %v2482_v20  ;;  %v290_v54 = vsel %vm6296_vm6, 0, %v289_v50  ;;  %v2619_v24 = vrot.slane %v7663_v6, 1  ;;  %v2229_v47 = vor.u32 %v2227_v37, %v2226_v23  ;;  %v2237_v27 = vrot.slane %v2226_v23, 4 }
 0x29c   : > { %288 = vst [vmem:[#allocation2 + $0x50] sm:$0x11] %v287_v14  ;;  %v2499_v30 = vld [vmem:[#allocation2 + $0x33c] sm:$0xff]  ;;  %291 = vst [vmem:[#allocation2 + $0x58] sm:$0x11] %v290_v54  ;;  %v2711_v40 = vrot.slane %v7754_v59, 1  ;;  %v2245_v26 = vor.u32 %v2243_v12, %v2242_v31  ;;  %v2587_v19 = vmul.f32 %v6460_v9, %v2567_v16 }
 0x29d   : > { %v2714_v46 = vrot.slane %v7521_v35, 1  ;;  %v2253_v13 = vrot.slane %v2242_v31, 4  ;;  %v2947_v20 = vrot.slane %v7913_v25, 1  ;;  %v2488_v6 = vsel %vm6419_vm14, %v2229_v47, %v2487_v60 }
 0x29e   : > { %v2901_v14 = vld [vmem:[#allocation2 + $0x2c4] sm:$0x1]  ;;  %v3634_v50 = vld [vmem:[#allocation2 + $0x2c8] sm:$0x1]  ;;  %v2494_v37 = vsel %vm6296_vm6, %v2237_v27, %v2493_v38  ;;  %v9369_v32 = vrot.slane %v7513_v4, 1  ;;  %v2950_v35 = vrot.slane %v7944_v51, 1  ;;  %v2500_v9 = vsel %vm6419_vm14, %v2245_v26, %v2499_v30 }
 0x29f   : > { %v2909_v12 = vunpack.c.l.bf16 %v2901_v14  ;;  %v3642_v31 = vunpack.c.l.bf16 %v3634_v50  ;;  %2489 = vst [vmem:[#allocation2 + $0x30c] sm:$0xff] %v2488_v6  ;;  %2495 = vst [vmem:[#allocation2 + $0x324] sm:$0x11] %v2494_v37  ;;  %v2506_v25 = vsel %vm6296_vm6, %v2253_v13, %v2505_v17  ;;  %v2620_v60 = vrot.slane %v2587_v19, 1  ;;  %v9372_v30 = vld [vmem:[#allocation25_spill] sm:$0xff] }
 0x2a0   : > { %v2716_v23 = vsel %vm2618_vm15, %v2714_v46, %v9369_v32  ;;  %2501 = vst [vmem:[#allocation2 + $0x33c] sm:$0xff] %v2500_v9  ;;  %2507 = vst [vmem:[#allocation2 + $0x354] sm:$0x11] %v2506_v25  ;;  %v9370_v4 = vrot.slane %v7415_v10, 1  ;;  %v9371_v51 = vrot.slane %v7605_v53, 1  ;;  %v9373_v16 = vunpack.c.l.bf16 %v9372_v30  ;;  %v9374_v10 = vld [vmem:[#allocation28_spill] sm:$0xff] }
 0x2a1   : > { %v2744_v38 = vadd.f32 %v2716_v23, %v7749_v33  ;;  %v8106_v45 = vmul.f32 %v7153_v49, %v2909_v12  ;;  %v8109_v2 = vmul.f32 %v7157_v21, %v3642_v31  ;;  %v9375_v27 = vunpack.c.l.bf16 %v9374_v10 }
 0x2a2   : > { %v8100_v47 = vsel %vm2618_vm15, %v2947_v20, %v9370_v4  ;;  %v2952_v54 = vsel %vm2618_vm15, %v2950_v35, %v9371_v51  ;;  %v8111_v17 = vld [vmem:[#allocation2 + $0x2dc] sm:$0xff]   ;;  %v3061_v33 = vmul.f32 %v8008_v62, %v9373_v16  ;;  %v2666_v26 = vld [vmem:[#allocation2 + $0x2f4] sm:$0x1]  ;;  %v3399_v20 = vld [vmem:[#allocation2 + $0x2f8] sm:$0x1]  ;;  %v2621_v14 = vsel %vm2618_vm15, %v2619_v24, %v2620_v60 }
 0x2a3   : > { %v3062_v46 = vmul.f32 %v8008_v62, %v9375_v27  ;;  %v9112_v53 = vunpack.c.l.bf16 %v8111_v17  ;;  %v8120_v13 = vld [vmem:[#allocation2 + $0x2f4] sm:$0x1]  ;;  %v9111_v19 = vunpack.c.h.bf16 %v8111_v17  ;;  %v2780_v50 = vadd.f32 %v7908_v3, %v2744_v38  ;;  %v8128_v35 = vld [vmem:[#allocation2 + $0x2f8] sm:$0x1] }
 0x2a4   : > { %v2674_v32 = vunpack.c.l.bf16 %v2666_v26  ;;  %v2659_v12 = vld [vmem:[#allocation2 + $0x54] sm:$0x1]  ;;  %v3407_v9 = vunpack.c.l.bf16 %v3399_v20  ;;  %v2651_v60 = vadd.f32 %v2621_v14, %v7593_v28  ;;  %v3092_v37 = vrot.slane %v8039_v52, 1 }
 0x2a5   : > { %v8133_v31 = vmul.f32 %v7272_v41, %v9112_v53  ;;  %v8138_v3 = vmul.f32 %v7294_v42, %v9111_v19  ;;  %v2667_v38 = vunpack.c.l.bf16 %v2659_v12  ;;  %v2888_v4 = vadd.f32 %v7806_v58, %v2780_v50  ;;  %v9376_v27 = vld [vmem:[#allocation32_spill] sm:$0xff]  ;;  %v9384_v53 = vld [vmem:[#allocation127_spill] sm:$0xff] }
 0x2a6   : > { %v8142_v25 = vmul.f32 %v7272_v41, %v2674_v32  ;;  %v8147_v51 = vmul.f32 %v7294_v42, %v3407_v9  ;;  %v2902_v30 = vld [vmem:[#allocation2 + $0x324] sm:$0x1]  ;;  %v3635_v16 = vld [vmem:[#allocation2 + $0x328] sm:$0x1]  ;;  %v9377_v26 = vunpack.c.l.bf16 %v9376_v27  ;;  %v3093_v24 = vrot.slane %v3061_v33, 1  ;;  %v9379_v50 = vld [vmem:[#allocation112_spill] sm:$0xff] }
 0x2a7   : > { %v2910_v19 = vunpack.c.l.bf16 %v2902_v30  ;;  %v3643_v23 = vunpack.c.l.bf16 %v3635_v16  ;;  %v8154_v28 = vld [vmem:[#allocation2 + $0x354] sm:$0x1]  ;;  %v8156_v14 = vld [vmem:[#allocation2 + $0x358] sm:$0x1]  ;;  %v2680_v58 = vmul.f32 %v7272_v41, %v2667_v38  ;;  %v2980_v27 = vadd.f32 %v2952_v54, %v2888_v4 }
 0x2a8   : > { %v3063_v20 = vmul.f32 %v8008_v62, %v9377_v26  ;;  %v3094_v16 = vsel %vm2618_vm15, %v3092_v37, %v3093_v24  ;;  %v3095_v6 = vrot.slane %v3062_v46, 1  ;;  %v9378_v38 = vunpack.c.l.bf16 %v7918_v36 }
 0x2a9   : > { %v8163_v52 = vmul.f32 %v7153_v49, %v2910_v19  ;;  %v8166_v33 = vmul.f32 %v7157_v21, %v3643_v23  ;;  %v2712_v30 = vrot.slane %v2680_v58, 1  ;;  %v3017_v26 = vadd.f32 %v8034_v34, %v2980_v27  ;;  %v3285_v27 = vld [vmem:[#allocation2 + $0x4c] sm:$0x1] }
 0x2aa   : > { %v3096_v41 = vrot.slane %v3063_v20, 1  ;;  %v3152_v12 = vmul.f32 %v9379_v50, %v9378_v38  ;;  %v9380_v23 = vunpack.c.l.bf16 %v7497_v55  ;;  %v9381_v46 = vunpack.c.l.bf16 %v7939_v5  ;;  %v3392_v38 = vld [vmem:[#allocation2 + $0x58] sm:$0x1] }
 0x2ab   : > { %v2713_v19 = vsel %vm2618_vm15, %v2711_v40, %v2712_v30  ;;  %v9382_v20 = vunpack.c.l.bf16 %v7657_v61  ;;  %v5909_v30 = vld [vmem:[#allocation2 + $0x3c] sm:$0xff]   ;;  %v5910_v61 = vld [vmem:[#allocation2 + $0x30] sm:$0xff]   ;;  %v3400_v32 = vunpack.c.l.bf16 %v3392_v38 }
 0x2ac   : > { %v3153_v37 = vmul.f32 %v9379_v50, %v9380_v23  ;;  %v2743_v24 = vadd.f32 %v2713_v19, %v2651_v60  ;;  %v3097_v34 = vsel %vm2618_vm15, %v3095_v6, %v3096_v41  ;;  %v3154_v4 = vmul.f32 %v9379_v50, %v9381_v46  ;;  %v9383_v6 = vld [vmem:[#allocation18_spill] sm:$0xff]  ;;  %v9387_v38 = vld [vmem:[#allocation29_spill] sm:$0xff] }
 0x2ad   : > { %v3155_v58 = vmul.f32 %v9379_v50, %v9382_v20  ;;  %v3125_v59 = vadd.f32 %v3097_v34, %v3017_v26  ;;  %v3184_v54 = vrot.slane %v3152_v12, 1  ;;  %v3264_v55 = vunpack.c.h.bf16 %v5909_v30  ;;  %v9388_v30 = vld [vmem:[#allocation147_spill] sm:$0xff] }
 0x2ae   : > { %v3185_v40 = vrot.slane %v3153_v37, 1  ;;  %v2779_v23 = vadd.f32 %v7856_v11, %v2743_v24  ;;  %v3187_v60 = vrot.slane %v3154_v4, 1  ;;  %v8191_v41 = vrot.slane %v9383_v6, %v7170_v39  ;;  %v9386_v4 = vld [vmem:[#allocation19_spill] sm:$0xff] }
 0x2af   : > { %v3188_v19 = vrot.slane %v3155_v58, 1  ;;  %v3300_v9 = vunpack.c.h.bf16 %v5910_v61  ;;  %v3301_v20 = vunpack.c.l.bf16 %v3285_v27  ;;  %v9385_v11 = vunpack.c.h.bf16 %v7503_v63 }
 0x2b0   : > { %v3186_v46 = vsel %vm2618_vm15, %v3184_v54, %v3185_v40  ;;  %v2887_v26 = vadd.f32 %v9384_v53, %v2779_v23  ;;  %v3276_v37 = vmul.f32 %v8191_v41, %v3264_v55  ;;  %v3412_v54 = vmul.f32 %v7294_v42, %v3264_v55 }
 0x2b1   : > { %v3189_v12 = vsel %vm2618_vm15, %v3187_v60, %v3188_v19  ;;  %v3277_v24 = vmul.f32 %v8191_v41, %v9385_v11  ;;  %v3320_v39 = vmul.f32 %v9386_v4, %v3300_v9  ;;  %v3321_v58 = vmul.f32 %v9386_v4, %v3301_v20  ;;  %v9389_v9 = vld [vmem:[#allocation148_spill] sm:$0xff] }
 0x2b2   : > { %v3217_v34 = vadd.f32 %v3189_v12, %v3125_v59  ;;  %v2979_v27 = vadd.f32 %v8100_v47, %v2887_v26  ;;  %v3413_v53 = vmul.f32 %v7294_v42, %v3400_v32  ;;  %v3447_v23 = vrot.slane %v9388_v30, 1 }
 0x2b3   : > { %v3385_v40 = vadd.f32 %v9387_v38, %v3277_v24  ;;  %v3352_v19 = vrot.slane %v3320_v39, 1  ;;  %v3353_v63 = vrot.slane %v3321_v58, 1  ;;  %v3444_v61 = vrot.slane %v3412_v54, 1  ;;  %v9391_v58 = vld [vmem:[#allocation22_spill] sm:$0xff] }
 0x2b4   : > { %v3225_v60 = vmax.f32 %v3217_v34, 0.0  ;;  %v3016_v59 = vadd.f32 %v8029_v48, %v2979_v27  ;;  %v3445_v12 = vrot.slane %v3413_v53, 1  ;;  %v9390_v11 = vrot.slane %v9389_v9, 1  ;;  %v9393_v27 = vld [vmem:[#allocation21_spill] sm:$0xff]  ;;  %v9395_v53 = vld [vmem:[#allocation31_spill] sm:$0xff] }
 0x2b5   : > { %v3492_v55 = vunpack.c.h.bf16 %v7772_v56  ;;  %v3354_v26 = vsel %vm2618_vm15, %v3352_v19, %v3353_v63  ;;  %v3493_v42 = vunpack.c.h.bf16 %v7784_v18  ;;  %v8217_v48 = vrot.slane %v9383_v6, %v7075_v1 }
 0x2b6   : > { %v3449_v20 = vsel %vm2618_vm15, %v3447_v23, %v9390_v11  ;;  %v3233_v47 = vmin.f32 %v3225_v60, 6.0  ;;  %v3124_v32 = vadd.f32 %v3094_v16, %v3016_v59  ;;  %v3384_v34 = vadd.f32 %v3354_v26, %v3276_v37 }
 0x2b7   : > { %v3477_v24 = vadd.f32 %v3449_v20, %v3385_v40  ;;  %v3446_v4 = vsel %vm2618_vm15, %v3444_v61, %v3445_v12  ;;  %v9392_v54 = vrot.slane %v9391_v58, 1  ;;  %v9394_v38 = vrot.slane %v9393_v27, 1  ;;  %v9397_v40 = vld [vmem:[#allocation30_spill] sm:$0xff]  ;;  %v9402_v58 = vld [vmem:[#allocation156_spill] sm:$0xff] }
 0x2b8   : > { %v3241_v39 = vpack.c.bf16 %v3233_v47, %v3233_v47  ;;  %v9396_v30 = vrot.slane %v9395_v53, 1  ;;  %v9398_v23 = vrot.slane %v9397_v40, 1  ;;  %v3648_v16 = vmul.f32 %v7157_v21, %v3492_v55 }
 0x2b9   : > { %v3590_v56 = vsel %vm2618_vm15, %v9394_v38, %v9392_v54  ;;  %v3216_v37 = vadd.f32 %v3186_v46, %v3124_v32  ;;  %v3476_v60 = vadd.f32 %v3446_v4, %v3384_v34  ;;  %v3504_v1 = vmul.f32 %v8217_v48, %v3492_v55  ;;  %v9399_v46 = vld [vmem:[#allocation135_spill] sm:$0xff]  ;;  %v9401_v34 = vld [vmem:[#allocation114_spill] sm:$0xff] }
 0x2ba   : > { %v3593_v18 = vsel %vm2618_vm15, %v9398_v23, %v9396_v30  ;;  %v3505_v19 = vmul.f32 %v8217_v48, %v3493_v42  ;;  %3249 = vst [vmem:[#allocation3 + $0xc] sm:$0xf] %v3241_v39  ;;  %v3650_v63 = vmul.f32 %v7157_v21, %v3493_v42  ;;  %v3680_v61 = vrot.slane %v3648_v16, 1  ;;  %v9405_v30 = vld [vmem:[#allocation26_spill] sm:$0xff] }
 0x2bb   : > { %v3728_v59 = vunpack.c.h.bf16 %v7918_v36  ;;  %v3729_v12 = vunpack.c.h.bf16 %v7939_v5  ;;  %v3224_v9 = vmax.f32 %v3216_v37, 0.0  ;;  %v3512_v11 = vadd.f32 %v3504_v1, %v3476_v60  ;;  %v9408_v37 = vld [vmem:[#allocation35_spill] sm:$0xff] }
 0x2bc   : > { %v3513_v20 = vadd.f32 %v3505_v19, %v3477_v24  ;;  %v8237_v47 = vrot.slane %v9383_v6, %v7365_v15  ;;  %v9400_v26 = vrot.slane %v9399_v46, 1  ;;  %v3683_v32 = vrot.slane %v3650_v63, 1 }
 0x2bd   : > { %v8244_v42 = vrot.slane %v9383_v6, %v9355_v8  ;;  %v3884_v36 = vmul.f32 %v9401_v34, %v3728_v59  ;;  %v3232_v4 = vmin.f32 %v3224_v9, 6.0  ;;  %v3620_v5 = vadd.f32 %v3590_v56, %v3512_v11 }
 0x2be   : > { %v3682_v55 = vsel %vm2618_vm15, %v3680_v61, %v9400_v26  ;;  %v3621_v39 = vadd.f32 %v3593_v18, %v3513_v20  ;;  %v3740_v24 = vmul.f32 %v8237_v47, %v3728_v59  ;;  %v9403_v54 = vrot.slane %v9402_v58, 1 }
 0x2bf   : > { %v3741_v27 = vmul.f32 %v8237_v47, %v3729_v12  ;;  %v9404_v38 = vunpack.c.h.bf16 %v9362_v22  ;;  %v9406_v8 = vunpack.c.l.bf16 %v9405_v30  ;;  %v3240_v40 = vpack.c.bf16 %v3232_v4, %v3232_v4  ;;  %v9410_v22 = vld [vmem:[#allocation146_spill] sm:$0xff] }
 0x2c0   : > { %v3685_v15 = vsel %vm2618_vm15, %v3683_v32, %v9403_v54  ;;  %v3712_v23 = vadd.f32 %v3682_v55, %v3620_v5  ;;  %v9407_v18 = vunpack.c.h.bf16 %v9374_v10  ;;  %v9409_v60 = vunpack.c.l.bf16 %v9408_v37  ;;  %v9412_v55 = vld [vmem:[#allocation163_spill] sm:$0xff] }
 0x2c1   : > { %v3792_v53 = vmul.f32 %v8244_v42, %v9404_v38  ;;  %v3793_v6 = vmul.f32 %v8244_v42, %v9406_v8  ;;  %v3713_v56 = vadd.f32 %v3685_v15, %v3621_v39  ;;  %v9411_v61 = vunpack.c.l.bf16 %v9410_v22  ;;  %3248 = vst [vmem:[#allocation3] sm:$0xf] %v3240_v40  ;;  %v9414_v15 = vld [vmem:[#allocation162_spill] sm:$0xff] }
 0x2c2   : > { %v3794_v16 = vmul.f32 %v8244_v42, %v9407_v18  ;;  %v3795_v1 = vmul.f32 %v8244_v42, %v9409_v60  ;;  %v3748_v9 = vadd.f32 %v3740_v24, %v3712_v23  ;;  %v3886_v46 = vmul.f32 %v9401_v34, %v3729_v12  ;;  %v8280_v23 = vld [vmem:[#allocation2 + $0x12c] sm:$0xff]   ;;  %v9419_v18 = vld [vmem:[#allocation41_spill] sm:$0xff] }
 0x2c3   : > { %v3824_v19 = vrot.slane %v3792_v53, 1  ;;  %v3825_v63 = vrot.slane %v3793_v6, 1  ;;  %v3885_v59 = vmul.f32 %v9401_v34, %v9411_v61  ;;  %v3749_v11 = vadd.f32 %v3741_v27, %v3713_v56  ;;  %v9416_v53 = vld [vmem:[#allocation142_spill] sm:$0xff]  ;;  %v9418_v6 = vld [vmem:[#allocation165_spill] sm:$0xff]  ;;  %v8285_v60 = vld [vmem:[#allocation2 + $0x18c] sm:$0xff]  }
 0x2c4   : > { %v3827_v20 = vrot.slane %v3794_v16, 1  ;;  %v3828_v26 = vrot.slane %v3795_v1, 1  ;;  %v9413_v32 = vunpack.c.l.bf16 %v9412_v55  ;;  %v3916_v5 = vrot.slane %v3884_v36, 1  ;;  %v9421_v61 = vld [vmem:[#allocation166_spill] sm:$0xff] }
 0x2c5   : > { %v3826_v10 = vsel %vm2618_vm15, %v3824_v19, %v3825_v63  ;;  %v3917_v58 = vrot.slane %v3885_v59, 1  ;;  %v3919_v54 = vrot.slane %v3886_v46, 1  ;;  %v9415_v38 = vunpack.c.l.bf16 %v9414_v15  ;;  %v9420_v63 = vld [vmem:[#allocation53_spill] sm:$0xff] }
 0x2c6   : > { %v3887_v4 = vmul.f32 %v9401_v34, %v9413_v32  ;;  %v3856_v39 = vadd.f32 %v3826_v10, %v3748_v9  ;;  %v3829_v24 = vsel %vm2618_vm15, %v3827_v20, %v3828_v26  ;;  %v9417_v12 = vunpack.c.l.bf16 %v7810_v43 }
 0x2c7   : > { %v2544_v30 = vmul.f32 %v9416_v53, %v9415_v38  ;;  %v2717_v40 = vrot.slane %v9418_v6, 1  ;;  %v3857_v56 = vadd.f32 %v3829_v24, %v3749_v11  ;;  %v3918_v36 = vsel %vm2618_vm15, %v3916_v5, %v3917_v58  ;;  %v9424_v5 = vld [vmem:[#allocation38_spill] sm:$0xff]  ;;  %v9426_v58 = vld [vmem:[#allocation36_spill] sm:$0xff] }
 0x2c8   : > { %v3920_v27 = vrot.slane %v3887_v4, 1  ;;  %v2545_v8 = vmul.f32 %v9416_v53, %v9417_v12  ;;  %v2720_v37 = vrot.slane %v7828_v0, 1  ;;  %v3948_v19 = vadd.f32 %v3918_v36, %v3856_v39  ;;  %v8296_v0 = vld [vmem:[#allocation2 + $0x15c] sm:$0xff]  }
 0x2c9   : > { %v2653_v16 = vadd.f32 %v9419_v18, %v2544_v30  ;;  %v9422_v59 = vrot.slane %v9421_v61, 1  ;;  %v9423_v11 = vrot.slane %v7831_v29, 1  ;;  %v2761_v26 = vunpack.c.l.bf16 %v8280_v23  ;;  %v8304_v30 = vld [vmem:[#allocation2 + $0x1bc] sm:$0xff]  }
 0x2ca   : > { %v3921_v1 = vsel %vm2618_vm15, %v3919_v54, %v3920_v27  ;;  %v2654_v22 = vadd.f32 %v9420_v63, %v2545_v8  ;;  %v3956_v55 = vmax.f32 %v3948_v19, 0.0  ;;  %v2762_v4 = vunpack.c.l.bf16 %v8285_v60  ;;  %v9428_v27 = vld [vmem:[#allocation48_spill] sm:$0xff]  ;;  %v9430_v8 = vld [vmem:[#allocation47_spill] sm:$0xff] }
 0x2cb   : > { %v2719_v9 = vsel %vm2618_vm15, %v2717_v40, %v9422_v59  ;;  %v3949_v20 = vadd.f32 %v3921_v1, %v3857_v56  ;;  %v2722_v46 = vsel %vm2618_vm15, %v2720_v37, %v9423_v11  ;;  %v9425_v39 = vrot.slane %v9424_v5, 1 }
 0x2cc   : > { %v2745_v10 = vadd.f32 %v2719_v9, %v2653_v16  ;;  %v2746_v32 = vadd.f32 %v2722_v46, %v2654_v22  ;;  %v9427_v54 = vrot.slane %v9426_v58, 1  ;;  %v2773_v24 = vmul.f32 %v7799_v7, %v2761_v26 }
 0x2cd   : > { %v3957_v29 = vmax.f32 %v3949_v20, 0.0  ;;  %v9429_v12 = vrot.slane %v9428_v27, 1  ;;  %v9431_v6 = vrot.slane %v9430_v8, 1  ;;  %v2919_v56 = vmul.f32 %v7153_v49, %v2761_v26 }
 0x2ce   : > { %v2863_v38 = vsel %vm2618_vm15, %v9427_v54, %v9425_v39  ;;  %v3964_v36 = vmin.f32 %v3956_v55, 6.0  ;;  %v2774_v18 = vmul.f32 %v7799_v7, %v2762_v4  ;;  %v2921_v16 = vmul.f32 %v7153_v49, %v2762_v4  ;;  %v9433_v39 = vld [vmem:[#allocation185_spill] sm:$0xff]  ;;  %v9435_v54 = vld [vmem:[#allocation40_spill] sm:$0xff] }
 0x2cf   : > { %v2866_v40 = vsel %vm2618_vm15, %v9431_v6, %v9429_v12  ;;  %v2998_v37 = vunpack.c.l.bf16 %v8296_v0  ;;  %v3965_v1 = vmin.f32 %v3957_v29, 6.0  ;;  %v2781_v19 = vadd.f32 %v2773_v24, %v2745_v10  ;;  %v9437_v24 = vld [vmem:[#allocation43_spill] sm:$0xff]  ;;  %v9439_v12 = vld [vmem:[#allocation56_spill] sm:$0xff] }
 0x2d0   : > { %v2953_v63 = vrot.slane %v2919_v56, 1  ;;  %v2999_v22 = vunpack.c.l.bf16 %v8304_v30  ;;  %v3972_v61 = vpack.c.bf16 %v3964_v36, %v3964_v36  ;;  %v2782_v59 = vadd.f32 %v2774_v18, %v2746_v32  ;;  %v9441_v56 = vld [vmem:[#allocation57_spill] sm:$0xff] }
 0x2d1   : > { %v2956_v9 = vrot.slane %v2921_v16, 1  ;;  %v3010_v20 = vmul.f32 %v8004_v44, %v2998_v37  ;;  %v3973_v11 = vpack.c.bf16 %v3965_v1, %v3965_v1  ;;  %v2889_v46 = vadd.f32 %v2863_v38, %v2781_v19 }
 0x2d2   : > { %v9432_v26 = vrot.slane %v7767_v57, 1  ;;  %v3011_v4 = vmul.f32 %v8004_v44, %v2999_v22  ;;  %3980 = vst [vmem:[#allocation3 + $0x4] sm:$0xf] %v3972_v61  ;;  %v2890_v5 = vadd.f32 %v2866_v40, %v2782_v59  ;;  %v9434_v10 = vrot.slane %v9433_v39, 1 }
 0x2d3   : > { %v9436_v29 = vunpack.c.l.bf16 %v9435_v54  ;;  %v9438_v27 = vunpack.c.l.bf16 %v9437_v24  ;;  %3981 = vst [vmem:[#allocation3 + $0x10] sm:$0xf] %v3973_v11  ;;  %v9440_v8 = vunpack.c.l.bf16 %v9439_v12  ;;  %v9442_v40 = vunpack.c.l.bf16 %v9441_v56  ;;  %v9449_v56 = vld [vmem:[#allocation167_spill] sm:$0xff] }
 0x2d4   : > { %v2955_v55 = vsel %vm2618_vm15, %v2953_v63, %v9432_v26  ;;  %v2958_v58 = vsel %vm2618_vm15, %v2956_v9, %v9434_v10  ;;  %v3156_v18 = vmul.f32 %v9379_v50, %v2998_v37  ;;  %v9443_v63 = vld [vmem:[#allocation178_spill] sm:$0xff]  ;;  %v3158_v26 = vmul.f32 %v9379_v50, %v2999_v22  ;;  %v9445_v10 = vld [vmem:[#allocation188_spill] sm:$0xff] }
 0x2d5   : > { %v3064_v32 = vmul.f32 %v8008_v62, %v9436_v29  ;;  %v3065_v38 = vmul.f32 %v8008_v62, %v9438_v27  ;;  %v2981_v57 = vadd.f32 %v2955_v55, %v2889_v46  ;;  %v3066_v6 = vmul.f32 %v8008_v62, %v9440_v8 }
 0x2d6   : > { %v3067_v36 = vmul.f32 %v8008_v62, %v9442_v40  ;;  %v2982_v16 = vadd.f32 %v2958_v58, %v2890_v5  ;;  %v9444_v61 = vunpack.c.l.bf16 %v9443_v63  ;;  %v9446_v29 = vunpack.c.l.bf16 %v9445_v10 }
 0x2d7   : > { %v3098_v1 = vrot.slane %v3064_v32, 1  ;;  %v3099_v19 = vrot.slane %v3065_v38, 1  ;;  %v3018_v9 = vadd.f32 %v3010_v20, %v2981_v57  ;;  %v3101_v11 = vrot.slane %v3066_v6, 1 }
 0x2d8   : > { %v3157_v59 = vmul.f32 %v9379_v50, %v9444_v61  ;;  %v3102_v46 = vrot.slane %v3067_v36, 1  ;;  %v3019_v55 = vadd.f32 %v3011_v4, %v2982_v16  ;;  %v3159_v24 = vmul.f32 %v9379_v50, %v9446_v29  ;;  %v9450_v36 = vld [vmem:[#allocation180_spill] sm:$0xff] }
 0x2d9   : > { %v3100_v39 = vsel %vm2618_vm15, %v3098_v1, %v3099_v19  ;;  %v3190_v37 = vrot.slane %v3156_v18, 1  ;;  %v3193_v27 = vrot.slane %v3158_v26, 1  ;;  %v9447_v20 = vunpack.c.h.bf16 %v9414_v15  ;;  %v5885_v1 = vld [vmem:[#allocation3] ss:$12 sps:$4 sm:$0xff]  }
 0x2da   : > { %v3103_v5 = vsel %vm2618_vm15, %v3101_v11, %v3102_v46  ;;  %v3126_v58 = vadd.f32 %v3100_v39, %v3018_v9  ;;  %v3191_v32 = vrot.slane %v3157_v59, 1  ;;  %v3194_v8 = vrot.slane %v3159_v24, 1  ;;  %v5887_v19 = vld [vmem:[#allocation3 + $0x4] ss:$12 sps:$4 sm:$0xff]   ;;  %v5892_v24 = vld [vmem:[#allocation10 + $0xb0] sm:$0xff]  }
 0x2db   : > { %v3127_v38 = vadd.f32 %v3103_v5, %v3019_v55  ;;  %v3278_v57 = vmul.f32 %v8191_v41, %v9447_v20  ;;  %v9448_v22 = vunpack.c.h.bf16 %v7810_v43  ;;  %v3450_v40 = vrot.slane %v9449_v56, 1  ;;  %v9451_v15 = vld [vmem:[#allocation42_spill] sm:$0xff]  ;;  %v9453_v46 = vld [vmem:[#allocation168_spill] sm:$0xff]  ;;  %5024 = vmatprep.mubr.bf16.mxu1 %v5887_v19 }
 0x2dc   : > { %v3192_v6 = vsel %vm2618_vm15, %v3190_v37, %v3191_v32  ;;  %v3453_v18 = vrot.slane %v9450_v36, 1  ;;  %v3494_v16 = vunpack.c.h.bf16 %v8280_v23  ;;  %v3195_v63 = vsel %vm2618_vm15, %v3193_v27, %v3194_v8  ;;  %v9452_v9 = vld [vmem:[#allocation54_spill] sm:$0xff]  ;;  %5025 = vmatmul.mubr.bf16.vlgmr.msra.gmra.mxu1 %v5885_v1  ;;  %v9457_v8 = vld [vmem:[#allocation39_spill] sm:$0xff] }
 0x2dd   : > { %v3279_v4 = vmul.f32 %v8191_v41, %v9448_v22  ;;  %v3218_v61 = vadd.f32 %v3192_v6, %v3126_v58  ;;  %v3386_v59 = vadd.f32 %v9451_v15, %v3278_v57  ;;  %v3219_v43 = vadd.f32 %v3195_v63, %v3127_v38  ;;  %v9455_v39 = vld [vmem:[#allocation182_spill] sm:$0xff]  ;;  %v9459_v57 = vld [vmem:[#allocation37_spill] sm:$0xff] }
 0x2de   : > { %v9454_v26 = vrot.slane %v9453_v46, 1  ;;  %v9456_v10 = vrot.slane %v9455_v39, 1  ;;  %v3495_v23 = vunpack.c.h.bf16 %v8285_v60  ;;  %v3506_v32 = vmul.f32 %v8217_v48, %v3494_v16  ;;  %v9461_v6 = vld [vmem:[#allocation50_spill] sm:$0xff]  ;;  %v9463_v60 = vld [vmem:[#allocation49_spill] sm:$0xff] }
 0x2df   : > { %v3387_v11 = vadd.f32 %v9452_v9, %v3279_v4  ;;  %v3226_v37 = vmax.f32 %v3218_v61, 0.0  ;;  %v3227_v27 = vmax.f32 %v3219_v43, 0.0  ;;  %v9458_v20 = vrot.slane %v9457_v8, 1  ;;  %v9465_v61 = vld [vmem:[#allocation184_spill] sm:$0xff]  ;;  %v5895_v43 = vld [vmem:[#allocation10 + $0xa8] sm:$0xff]   ;;  %v9471_v8 = vld [vmem:[#allocation45_spill] sm:$0xff] }
 0x2e0   : > { %v3452_v55 = vsel %vm2618_vm15, %v3450_v40, %v9454_v26  ;;  %v3455_v29 = vsel %vm2618_vm15, %v3453_v18, %v9456_v10  ;;  %v3507_v38 = vmul.f32 %v8217_v48, %v3495_v23  ;;  %v9460_v22 = vrot.slane %v9459_v57, 1  ;;  %5731 = vmatpush3.bf16.msra.mxu1 %v9465_v61 }
 0x2e1   : > { %v3478_v5 = vadd.f32 %v3452_v55, %v3386_v59  ;;  %v3479_v58 = vadd.f32 %v3455_v29, %v3387_v11  ;;  %v9462_v56 = vrot.slane %v9461_v6, 1  ;;  %v9464_v40 = vrot.slane %v9463_v60, 1  ;;  %5732 = vmatprep.subr.bf16.mxu1 %v5892_v24  ;;  %v9474_v60 = vld [vmem:[#allocation59_spill] sm:$0xff] }
 0x2e2   : > { %v3596_v4 = vsel %vm2618_vm15, %v9460_v22, %v9458_v20  ;;  %v3234_v18 = vmin.f32 %v3226_v37, 6.0  ;;  %v3652_v63 = vmul.f32 %v7157_v21, %v3494_v16  ;;  %v3654_v1 = vmul.f32 %v7157_v21, %v3495_v23  ;;  %v9466_v37 = vld [vmem:[#allocation175_spill] sm:$0xff] }
 0x2e3   : > { %v3599_v36 = vsel %vm2618_vm15, %v9464_v40, %v9462_v56  ;;  %v3514_v19 = vadd.f32 %v3506_v32, %v3478_v5  ;;  %v3235_v15 = vmin.f32 %v3227_v27, 6.0  ;;  %v3515_v59 = vadd.f32 %v3507_v38, %v3479_v58 }
 0x2e4   : > { %v3730_v9 = vunpack.c.h.bf16 %v8296_v0  ;;  %v3731_v11 = vunpack.c.h.bf16 %v8304_v30  ;;  %v3242_v46 = vpack.c.bf16 %v3234_v18, %v3234_v18  ;;  %v3686_v55 = vrot.slane %v3652_v63, 1  ;;  %v9468_v0 = vld [vmem:[#allocation186_spill] sm:$0xff]  ;;  %5733 = vmatpush3.bf16.msra.mxu1 %v5892_v24 }
 0x2e5   : > { %v3622_v26 = vadd.f32 %v3596_v4, %v3514_v19  ;;  %v3689_v39 = vrot.slane %v3654_v1, 1  ;;  %v3243_v10 = vpack.c.bf16 %v3235_v15, %v3235_v15  ;;  %v3623_v29 = vadd.f32 %v3599_v36, %v3515_v59  ;;  %5734 = vmatprep.subr.bf16.mxu1 %v5895_v43  ;;  %v9476_v1 = vld [vmem:[#allocation179_spill] sm:$0xff] }
 0x2e6   : > { %v3742_v16 = vmul.f32 %v8237_v47, %v3730_v9  ;;  %v3743_v23 = vmul.f32 %v8237_v47, %v3731_v11  ;;  %3250 = vst [vmem:[#allocation3 + $0x18] sm:$0xf] %v3242_v46  ;;  %v9467_v5 = vrot.slane %v9466_v37, 1  ;;  %v9469_v32 = vrot.slane %v9468_v0, 1  ;;  %v9480_v0 = vld [vmem:[#allocation187_spill] sm:$0xff] }
 0x2e7   : > { %v9470_v27 = vunpack.c.h.bf16 %v9435_v54  ;;  %v9472_v20 = vunpack.c.l.bf16 %v9471_v8  ;;  %3251 = vst [vmem:[#allocation3 + $0x24] sm:$0xf] %v3243_v10  ;;  %v9473_v6 = vunpack.c.h.bf16 %v9439_v12  ;;  %v9475_v40 = vunpack.c.l.bf16 %v9474_v60  ;;  %v5897_v54 = vld [vmem:[#allocation10 + $0xa0] sm:$0xff]   ;;  %v9482_v8 = vld [vmem:[#allocation194_spill] sm:$0xff] }
 0x2e8   : > { %v3688_v58 = vsel %vm2618_vm15, %v3686_v55, %v9467_v5  ;;  %v3691_v30 = vsel %vm2618_vm15, %v3689_v39, %v9469_v32  ;;  %v3888_v63 = vmul.f32 %v9401_v34, %v3730_v9  ;;  %v9477_v61 = vunpack.c.l.bf16 %v9476_v1  ;;  %v9478_v39 = vld [vmem:[#allocation189_spill] sm:$0xff]  ;;  %5735 = vmatpush3.bf16.msra.mxu1 %v5895_v43  ;;  %v8422_v43 = vld [vmem:[#allocation2 + $0x24c] sm:$0xff]  }
 0x2e9   : > { %v3796_v38 = vmul.f32 %v8244_v42, %v9470_v27  ;;  %v3797_v57 = vmul.f32 %v8244_v42, %v9472_v20  ;;  %v3714_v22 = vadd.f32 %v3688_v58, %v3622_v26  ;;  %v3715_v4 = vadd.f32 %v3691_v30, %v3623_v29  ;;  %5736 = vmatprep.subr.bf16.mxu1 %v5897_v54  ;;  %v5898_v30 = vld [vmem:[#allocation10 + $0x98] sm:$0xff]  }
 0x2ea   : > { %v3798_v56 = vmul.f32 %v8244_v42, %v9473_v6  ;;  %v3799_v36 = vmul.f32 %v8244_v42, %v9475_v40  ;;  %v3889_v24 = vmul.f32 %v9401_v34, %v9477_v61  ;;  %v3890_v55 = vmul.f32 %v9401_v34, %v3731_v11  ;;  %v9486_v40 = vld [vmem:[#allocation199_spill] sm:$0xff] }
 0x2eb   : > { %v3830_v18 = vrot.slane %v3796_v38, 1  ;;  %v3831_v19 = vrot.slane %v3797_v57, 1  ;;  %v3750_v15 = vadd.f32 %v3742_v16, %v3714_v22  ;;  %v3751_v59 = vadd.f32 %v3743_v23, %v3715_v4  ;;  %v8417_v23 = vld [vmem:[#allocation2 + $0x1ec] sm:$0xff]  }
 0x2ec   : > { %v3833_v46 = vrot.slane %v3798_v56, 1  ;;  %v3834_v12 = vrot.slane %v3799_v36, 1  ;;  %v9479_v10 = vunpack.c.l.bf16 %v9478_v39  ;;  %v3922_v37 = vrot.slane %v3888_v63, 1  ;;  %v9484_v4 = vld [vmem:[#allocation60_spill] sm:$0xff]  ;;  %v9485_v56 = vld [vmem:[#allocation190_spill] sm:$0xff]  ;;  %5737 = vmatpush3.bf16.msra.mxu1 %v5897_v54 }
 0x2ed   : > { %v3832_v26 = vsel %vm2618_vm15, %v3830_v18, %v3831_v19  ;;  %v3923_v58 = vrot.slane %v3889_v24, 1  ;;  %v9481_v32 = vunpack.c.l.bf16 %v9480_v0  ;;  %v3925_v11 = vrot.slane %v3890_v55, 1  ;;  %v9487_v63 = vld [vmem:[#allocation76_spill] sm:$0xff]  ;;  %5738 = vmatprep.subr.bf16.mxu1 %v5898_v30  ;;  %v8441_v54 = vld [vmem:[#allocation2 + $0x27c] sm:$0xff]  }
 0x2ee   : > { %v3891_v29 = vmul.f32 %v9401_v34, %v9479_v10  ;;  %v3835_v9 = vsel %vm2618_vm15, %v3833_v46, %v3834_v12  ;;  %v3858_v5 = vadd.f32 %v3832_v26, %v3750_v15  ;;  %v9483_v20 = vunpack.c.l.bf16 %v9482_v8  ;;  %v9488_v15 = vld [vmem:[#allocation192_spill] sm:$0xff]  ;;  %v5899_v10 = vld [vmem:[#allocation10 + $0x90] sm:$0xff]  }
 0x2ef   : > { %v2546_v16 = vmul.f32 %v9416_v53, %v9481_v32  ;;  %v3859_v27 = vadd.f32 %v3835_v9, %v3751_v59  ;;  %v3924_v22 = vsel %vm2618_vm15, %v3922_v37, %v3923_v58  ;;  %v2723_v60 = vrot.slane %v9485_v56, 1  ;;  %v9490_v12 = vld [vmem:[#allocation200_spill] sm:$0xff]  ;;  %v8439_v58 = vld [vmem:[#allocation2 + $0x21c] sm:$0xff]  }
 0x2f0   : > { %v3926_v38 = vrot.slane %v3891_v29, 1  ;;  %v2547_v57 = vmul.f32 %v9416_v53, %v9483_v20  ;;  %v2726_v36 = vrot.slane %v9486_v40, 1  ;;  %v3950_v19 = vadd.f32 %v3924_v22, %v3858_v5  ;;  %v9496_v22 = vld [vmem:[#allocation81_spill] sm:$0xff]  ;;  %v9498_v56 = vld [vmem:[#allocation80_spill] sm:$0xff]  ;;  %5739 = vmatpush3.bf16.msra.mxu1 %v5898_v30 }
 0x2f1   : > { %v2655_v6 = vadd.f32 %v9484_v4, %v2546_v16  ;;  %v2763_v61 = vunpack.c.l.bf16 %v8417_v23  ;;  %v9489_v59 = vrot.slane %v9488_v15, 1  ;;  %v9491_v26 = vrot.slane %v9490_v12, 1  ;;  %5740 = vmatprep.subr.bf16.mxu1 %v5899_v10  ;;  %v9500_v30 = vld [vmem:[#allocation196_spill] sm:$0xff] }
 0x2f2   : > { %v3927_v18 = vsel %vm2618_vm15, %v3925_v11, %v3926_v38  ;;  %v2656_v1 = vadd.f32 %v9487_v63, %v2547_v57  ;;  %v2764_v39 = vunpack.c.l.bf16 %v8422_v43  ;;  %v3958_v29 = vmax.f32 %v3950_v19, 0.0  ;;  %v9494_v38 = vld [vmem:[#allocation63_spill] sm:$0xff] }
 0x2f3   : > { %v3951_v24 = vadd.f32 %v3927_v18, %v3859_v27  ;;  %v2725_v46 = vsel %vm2618_vm15, %v2723_v60, %v9489_v59  ;;  %v2728_v55 = vsel %vm2618_vm15, %v2726_v36, %v9491_v26  ;;  %v2775_v5 = vmul.f32 %v7799_v7, %v2763_v61  ;;  %v9492_v27 = vld [vmem:[#allocation64_spill] sm:$0xff]  ;;  %v5902_v59 = vld [vmem:[#allocation10 + $0x88] sm:$0xff]  }
 0x2f4   : > { %v2747_v37 = vadd.f32 %v2725_v46, %v2655_v6  ;;  %v2748_v9 = vadd.f32 %v2728_v55, %v2656_v1  ;;  %v2776_v16 = vmul.f32 %v7799_v7, %v2764_v39  ;;  %v9493_v11 = vrot.slane %v9492_v27, 1  ;;  %5741 = vmatpush3.bf16.msra.mxu1 %v5899_v10 }
 0x2f5   : > { %v3959_v32 = vmax.f32 %v3951_v24, 0.0  ;;  %v9495_v20 = vrot.slane %v9494_v38, 1  ;;  %v9497_v4 = vrot.slane %v9496_v22, 1  ;;  %v9499_v6 = vrot.slane %v9498_v56, 1  ;;  %5742 = vmatprep.subr.bf16.mxu1 %v5902_v59 }
 0x2f6   : > { %v3966_v40 = vmin.f32 %v3958_v29, 6.0  ;;  %v2783_v36 = vadd.f32 %v2775_v5, %v2747_v37  ;;  %v2923_v18 = vmul.f32 %v7153_v49, %v2763_v61  ;;  %v2925_v19 = vmul.f32 %v7153_v49, %v2764_v39  ;;  %v9502_v5 = vld [vmem:[#allocation20_spill] sm:$0xff] }
 0x2f7   : > { %v2869_v57 = vsel %vm2618_vm15, %v9495_v20, %v9493_v11  ;;  %v2872_v60 = vsel %vm2618_vm15, %v9499_v6, %v9497_v4  ;;  %v3967_v63 = vmin.f32 %v3959_v32, 6.0  ;;  %v2784_v1 = vadd.f32 %v2776_v16, %v2748_v9  ;;  %v9504_v11 = vld [vmem:[#allocation71_spill] sm:$0xff] }
 0x2f8   : > { %v3000_v24 = vunpack.c.l.bf16 %v8439_v58  ;;  %v3001_v15 = vunpack.c.l.bf16 %v8441_v54  ;;  %v3974_v46 = vpack.c.bf16 %v3966_v40, %v3966_v40  ;;  %v2891_v12 = vadd.f32 %v2869_v57, %v2783_v36  ;;  %v9506_v57 = vld [vmem:[#allocation72_spill] sm:$0xff]  ;;  %5743 = vmatpush3.bf16.msra.mxu1 %v5902_v59 }
 0x2f9   : > { %v2959_v26 = vrot.slane %v2923_v18, 1  ;;  %v2962_v55 = vrot.slane %v2925_v19, 1  ;;  %v3975_v27 = vpack.c.bf16 %v3967_v63, %v3967_v63  ;;  %v2892_v29 = vadd.f32 %v2872_v60, %v2784_v1  ;;  %v9508_v60 = vld [vmem:[#allocation88_spill] sm:$0xff]  ;;  %v9510_v18 = vld [vmem:[#allocation89_spill] sm:$0xff] }
 0x2fa   : > { %v3012_v37 = vmul.f32 %v8004_v44, %v3000_v24  ;;  %v3013_v61 = vmul.f32 %v8004_v44, %v3001_v15  ;;  %3982 = vst [vmem:[#allocation3 + $0x1c] sm:$0xf] %v3974_v46  ;;  %v9501_v39 = vrot.slane %v9500_v30, 1  ;;  %v9503_v32 = vrot.slane %v9502_v5, 1  ;;  %v5905_v1 = vld [vmem:[#allocation10 + $0x80] sm:$0xff]   ;;  %v9512_v30 = vld [vmem:[#allocation195_spill] sm:$0xff] }
 0x2fb   : > { %v9505_v38 = vunpack.c.l.bf16 %v9504_v11  ;;  %v9507_v22 = vunpack.c.l.bf16 %v9506_v57  ;;  %3983 = vst [vmem:[#allocation3 + $0x28] sm:$0xf] %v3975_v27  ;;  %v9509_v40 = vunpack.c.l.bf16 %v9508_v60  ;;  %v9511_v19 = vunpack.c.l.bf16 %v9510_v18  ;;  %5744 = vmatprep.subr.bf16.mxu1 %v5905_v1 }
 0x2fc   : > { %v2961_v9 = vsel %vm2618_vm15, %v2959_v26, %v9501_v39  ;;  %v2964_v16 = vsel %vm2618_vm15, %v2962_v55, %v9503_v32  ;;  %v3160_v55 = vmul.f32 %v9379_v50, %v3000_v24  ;;  %v9513_v39 = vunpack.c.l.bf16 %v9512_v30  ;;  %5745 = vmatpush3.bf16.msra.mxu1 %v5905_v1 }
 0x2fd   : > { %v3068_v20 = vmul.f32 %v8008_v62, %v9505_v38  ;;  %v3069_v4 = vmul.f32 %v8008_v62, %v9507_v22  ;;  %v2983_v56 = vadd.f32 %v2961_v9, %v2891_v12  ;;  %v2984_v6 = vadd.f32 %v2964_v16, %v2892_v29  ;;  %v9514_v16 = vld [vmem:[#allocation205_spill] sm:$0xff] }
 0x2fe   : > { %v3070_v36 = vmul.f32 %v8008_v62, %v9509_v40  ;;  %v3071_v63 = vmul.f32 %v8008_v62, %v9511_v19  ;;  %v3161_v10 = vmul.f32 %v9379_v50, %v9513_v39  ;;  %v3162_v32 = vmul.f32 %v9379_v50, %v3001_v15  ;;  %v9518_v19 = vld [vmem:[#allocation61_spill] sm:$0xff] }
 0x2ff   : > { %v3104_v46 = vrot.slane %v3068_v20, 1  ;;  %v3105_v26 = vrot.slane %v3069_v4, 1  ;;  %v3020_v12 = vadd.f32 %v3012_v37, %v2983_v56  ;;  %v3021_v27 = vadd.f32 %v3013_v61, %v2984_v6 }
 0x300   : > { %v3107_v29 = vrot.slane %v3070_v36, 1  ;;  %v3108_v9 = vrot.slane %v3071_v63, 1  ;;  %v9515_v38 = vunpack.c.l.bf16 %v9514_v16  ;;  %v3196_v20 = vrot.slane %v3160_v55, 1  ;;  %v9519_v63 = vld [vmem:[#allocation191_spill] sm:$0xff]  ;;  %v9524_v16 = vld [vmem:[#allocation202_spill] sm:$0xff] }
 0x301   : > { %v3106_v5 = vsel %vm2618_vm15, %v3104_v46, %v3105_v26  ;;  %v3197_v4 = vrot.slane %v3161_v10, 1  ;;  %v9516_v40 = vunpack.c.h.bf16 %v9480_v0  ;;  %v3199_v56 = vrot.slane %v3162_v32, 1  ;;  %v9520_v26 = vld [vmem:[#allocation201_spill] sm:$0xff] }
 0x302   : > { %v3163_v57 = vmul.f32 %v9379_v50, %v9515_v38  ;;  %v3109_v24 = vsel %vm2618_vm15, %v3107_v29, %v3108_v9  ;;  %v3128_v22 = vadd.f32 %v3106_v5, %v3020_v12  ;;  %v9517_v15 = vunpack.c.h.bf16 %v9482_v8  ;;  %v5888_v30 = vld [vmem:[#allocation3 + $0x1c] ss:$12 sps:$4 sm:$0xff]   ;;  %v5890_v0 = vld [vmem:[#allocation3 + $0x18] ss:$12 sps:$4 sm:$0xff]  }
 0x303   : > { %v3280_v37 = vmul.f32 %v8191_v41, %v9516_v40  ;;  %v3129_v61 = vadd.f32 %v3109_v24, %v3021_v27  ;;  %v3198_v18 = vsel %vm2618_vm15, %v3196_v20, %v3197_v4  ;;  %v3456_v46 = vrot.slane %v9519_v63, 1  ;;  %v9521_v12 = vld [vmem:[#allocation77_spill] sm:$0xff]  ;;  %5032 = vmatprep.mubr.bf16.mxu1 %v5888_v30 }
 0x304   : > { %v3200_v6 = vrot.slane %v3163_v57, 1  ;;  %v3281_v36 = vmul.f32 %v8191_v41, %v9517_v15  ;;  %v3459_v55 = vrot.slane %v9520_v26, 1  ;;  %v3220_v10 = vadd.f32 %v3198_v18, %v3128_v22  ;;  %v9522_v9 = vld [vmem:[#allocation193_spill] sm:$0xff]  ;;  %5033 = vmatmul.mubr.bf16.gmra.mxu1 %v5890_v0 }
 0x305   : > { %v3388_v59 = vadd.f32 %v9518_v19, %v3280_v37  ;;  %v3496_v29 = vunpack.c.h.bf16 %v8417_v23  ;;  %v9523_v5 = vrot.slane %v9522_v9, 1  ;;  %v9525_v38 = vrot.slane %v9524_v16, 1  ;;  %v9526_v37 = vld [vmem:[#allocation66_spill] sm:$0xff] }
 0x306   : > { %v3201_v39 = vsel %vm2618_vm15, %v3199_v56, %v3200_v6  ;;  %v3389_v27 = vadd.f32 %v9521_v12, %v3281_v36  ;;  %v3497_v20 = vunpack.c.h.bf16 %v8422_v43  ;;  %v3228_v24 = vmax.f32 %v3220_v10, 0.0  ;;  %v9528_v56 = vld [vmem:[#allocation65_spill] sm:$0xff]  ;;  %v9530_v36 = vld [vmem:[#allocation83_spill] sm:$0xff]  ;;  %v9532_v19 = vld [vmem:[#allocation82_spill] sm:$0xff] }
 0x307   : > { %v3221_v8 = vadd.f32 %v3201_v39, %v3129_v61  ;;  %v3458_v32 = vsel %vm2618_vm15, %v3456_v46, %v9523_v5  ;;  %v3461_v57 = vsel %vm2618_vm15, %v3459_v55, %v9525_v38  ;;  %v3508_v40 = vmul.f32 %v8217_v48, %v3496_v29 }
 0x308   : > { %v3480_v4 = vadd.f32 %v3458_v32, %v3388_v59  ;;  %v3481_v22 = vadd.f32 %v3461_v57, %v3389_v27  ;;  %v3509_v1 = vmul.f32 %v8217_v48, %v3497_v20  ;;  %v9527_v61 = vrot.slane %v9526_v37, 1 }
 0x309   : > { %v3229_v23 = vmax.f32 %v3221_v8, 0.0  ;;  %v9529_v6 = vrot.slane %v9528_v56, 1  ;;  %v9531_v18 = vrot.slane %v9530_v36, 1  ;;  %v9533_v43 = vrot.slane %v9532_v19, 1 }
 0x30a   : > { %v3236_v59 = vmin.f32 %v3228_v24, 6.0  ;;  %v3516_v46 = vadd.f32 %v3508_v40, %v3480_v4  ;;  %v3656_v26 = vmul.f32 %v7157_v21, %v3496_v29  ;;  %v3658_v55 = vmul.f32 %v7157_v21, %v3497_v20  ;;  %v9534_v29 = vld [vmem:[#allocation197_spill] sm:$0xff]  ;;  %v9536_v24 = vld [vmem:[#allocation203_spill] sm:$0xff] }
 0x30b   : > { %v3602_v15 = vsel %vm2618_vm15, %v9529_v6, %v9527_v61  ;;  %v3605_v63 = vsel %vm2618_vm15, %v9533_v43, %v9531_v18  ;;  %v3237_v30 = vmin.f32 %v3229_v23, 6.0  ;;  %v3517_v0 = vadd.f32 %v3509_v1, %v3481_v22  ;;  %v9539_v40 = vld [vmem:[#allocation75_spill] sm:$0xff] }
 0x30c   : > { %v3732_v39 = vunpack.c.h.bf16 %v8439_v58  ;;  %v3733_v10 = vunpack.c.h.bf16 %v8441_v54  ;;  %v3244_v12 = vpack.c.bf16 %v3236_v59, %v3236_v59  ;;  %v3624_v27 = vadd.f32 %v3602_v15, %v3516_v46  ;;  %v9542_v15 = vld [vmem:[#allocation90_spill] sm:$0xff] }
 0x30d   : > { %v3692_v8 = vrot.slane %v3656_v26, 1  ;;  %v3695_v9 = vrot.slane %v3658_v55, 1  ;;  %v3245_v5 = vpack.c.bf16 %v3237_v30, %v3237_v30  ;;  %v3625_v32 = vadd.f32 %v3605_v63, %v3517_v0  ;;  %v9544_v63 = vld [vmem:[#allocation198_spill] sm:$0xff] }
 0x30e   : > { %v3744_v16 = vmul.f32 %v8237_v47, %v3732_v39  ;;  %v3745_v38 = vmul.f32 %v8237_v47, %v3733_v10  ;;  %3252 = vst [vmem:[#allocation3 + $0x30] sm:$0xf] %v3244_v12  ;;  %v9535_v57 = vrot.slane %v9534_v29, 1  ;;  %v9537_v4 = vrot.slane %v9536_v24, 1 }
 0x30f   : > { %v9538_v54 = vunpack.c.h.bf16 %v9504_v11  ;;  %v9540_v23 = vunpack.c.l.bf16 %v9539_v40  ;;  %3253 = vst [vmem:[#allocation3 + $0x3c] sm:$0xf] %v3245_v5  ;;  %v9541_v56 = vunpack.c.h.bf16 %v9508_v60  ;;  %v9543_v36 = vunpack.c.l.bf16 %v9542_v15 }
 0x310   : > { %v3694_v20 = vsel %vm2618_vm15, %v3692_v8, %v9535_v57  ;;  %v3697_v58 = vsel %vm2618_vm15, %v3695_v9, %v9537_v4  ;;  %v3892_v11 = vmul.f32 %v9401_v34, %v3732_v39  ;;  %v9545_v59 = vunpack.c.l.bf16 %v9544_v63  ;;  %v9548_v57 = vld [vmem:[#allocation204_spill] sm:$0xff] }
 0x311   : > { %v3800_v22 = vmul.f32 %v8244_v42, %v9538_v54  ;;  %v3801_v1 = vmul.f32 %v8244_v42, %v9540_v23  ;;  %v3716_v37 = vadd.f32 %v3694_v20, %v3624_v27  ;;  %v3717_v61 = vadd.f32 %v3697_v58, %v3625_v32  ;;  %v9546_v27 = vld [vmem:[#allocation24_spill] sm:$0xff]  ;;  %v9551_v23 = vld [vmem:[#allocation93_spill] sm:$0xff] }
 0x312   : > { %v3802_v6 = vmul.f32 %v8244_v42, %v9541_v56  ;;  %v3803_v18 = vmul.f32 %v8244_v42, %v9543_v36  ;;  %v3893_v46 = vmul.f32 %v9401_v34, %v9545_v59  ;;  %v3894_v12 = vmul.f32 %v9401_v34, %v3733_v10  ;;  %v9553_v36 = vld [vmem:[#allocation111_spill] sm:$0xff] }
 0x313   : > { %v3836_v19 = vrot.slane %v3800_v22, 1  ;;  %v3837_v43 = vrot.slane %v3801_v1, 1  ;;  %v3752_v26 = vadd.f32 %v3744_v16, %v3716_v37  ;;  %v3753_v55 = vadd.f32 %v3745_v38, %v3717_v61  ;;  %v8557_v38 = vld [vmem:[#allocation2 + $0x2ac] sm:$0xff]   ;;  %v9552_v37 = vld [vmem:[#allocation206_spill] sm:$0xff] }
 0x314   : > { %v3839_v30 = vrot.slane %v3802_v6, 1  ;;  %v3840_v0 = vrot.slane %v3803_v18, 1  ;;  %v9547_v8 = vunpack.c.l.bf16 %v9546_v27  ;;  %v3928_v5 = vrot.slane %v3892_v11, 1  ;;  %v8562_v22 = vld [vmem:[#allocation2 + $0x30c] sm:$0xff]  }
 0x315   : > { %v3838_v60 = vsel %vm2618_vm15, %v3836_v19, %v3837_v43  ;;  %v3929_v29 = vrot.slane %v3893_v46, 1  ;;  %v9549_v20 = vunpack.c.l.bf16 %v9548_v57  ;;  %v3931_v4 = vrot.slane %v3894_v12, 1  ;;  %v9554_v11 = vld [vmem:[#allocation207_spill] sm:$0xff]  ;;  %v8581_v12 = vld [vmem:[#allocation2 + $0x33c] sm:$0xff]  }
 0x316   : > { %v3895_v9 = vmul.f32 %v9401_v34, %v9547_v8  ;;  %v3841_v32 = vsel %vm2618_vm15, %v3839_v30, %v3840_v0  ;;  %v3860_v39 = vadd.f32 %v3838_v60, %v3752_v26  ;;  %v9550_v10 = vunpack.c.l.bf16 %v8111_v17  ;;  %v8579_v60 = vld [vmem:[#allocation2 + $0x2dc] sm:$0xff]  }
 0x317   : > { %v2548_v16 = vmul.f32 %v9416_v53, %v9549_v20  ;;  %v3861_v24 = vadd.f32 %v3841_v32, %v3753_v55  ;;  %v3930_v40 = vsel %vm2618_vm15, %v3928_v5, %v3929_v29  ;;  %v2729_v61 = vrot.slane %v9552_v37, 1  ;;  %v9559_v32 = vld [vmem:[#allocation97_spill] sm:$0xff]  ;;  %v9561_v29 = vld [vmem:[#allocation123_spill] sm:$0xff] }
 0x318   : > { %v3932_v58 = vrot.slane %v3895_v9, 1  ;;  %v2549_v54 = vmul.f32 %v9416_v53, %v9550_v10  ;;  %v2732_v56 = vrot.slane %v8133_v31, 1  ;;  %v3952_v15 = vadd.f32 %v3930_v40, %v3860_v39  ;;  %v9557_v9 = vld [vmem:[#allocation98_spill] sm:$0xff] }
 0x319   : > { %v2657_v1 = vadd.f32 %v9551_v23, %v2548_v16  ;;  %v2765_v19 = vunpack.c.l.bf16 %v8557_v38  ;;  %v9555_v53 = vrot.slane %v9554_v11, 1  ;;  %v9556_v59 = vrot.slane %v8142_v25, 1  ;;  %v9563_v16 = vld [vmem:[#allocation122_spill] sm:$0xff] }
 0x31a   : > { %v3933_v6 = vsel %vm2618_vm15, %v3931_v4, %v3932_v58  ;;  %v2658_v18 = vadd.f32 %v9553_v36, %v2549_v54  ;;  %v2766_v26 = vunpack.c.l.bf16 %v8562_v22  ;;  %v3960_v55 = vmax.f32 %v3952_v15, 0.0 }
 0x31b   : > { %v3953_v43 = vadd.f32 %v3933_v6, %v3861_v24  ;;  %v2731_v63 = vsel %vm2618_vm15, %v2729_v61, %v9555_v53  ;;  %v2734_v46 = vsel %vm2618_vm15, %v2732_v56, %v9556_v59  ;;  %v2777_v0 = vmul.f32 %v7799_v7, %v2765_v19  ;;  %v9567_v59 = vld [vmem:[#allocation105_spill] sm:$0xff] }
 0x31c   : > { %v2749_v31 = vadd.f32 %v2731_v63, %v2657_v1  ;;  %v2750_v30 = vadd.f32 %v2734_v46, %v2658_v18  ;;  %v2778_v8 = vmul.f32 %v7799_v7, %v2766_v26  ;;  %v9558_v5 = vrot.slane %v9557_v9, 1  ;;  %v9573_v9 = vld [vmem:[#allocation130_spill] sm:$0xff] }
 0x31d   : > { %v3961_v27 = vmax.f32 %v3953_v43, 0.0  ;;  %v9560_v25 = vrot.slane %v9559_v32, 1  ;;  %v9562_v20 = vrot.slane %v9561_v29, 1  ;;  %v9564_v24 = vrot.slane %v9563_v16, 1 }
 0x31e   : > { %v3968_v58 = vmin.f32 %v3960_v55, 6.0  ;;  %v2785_v10 = vadd.f32 %v2777_v0, %v2749_v31  ;;  %v2927_v54 = vmul.f32 %v7153_v49, %v2765_v19  ;;  %v2929_v40 = vmul.f32 %v7153_v49, %v2766_v26  ;;  %v9569_v55 = vld [vmem:[#allocation106_spill] sm:$0xff] }
 0x31f   : > { %v2875_v39 = vsel %vm2618_vm15, %v9560_v25, %v9558_v5  ;;  %v2878_v4 = vsel %vm2618_vm15, %v9564_v24, %v9562_v20  ;;  %v3969_v23 = vmin.f32 %v3961_v27, 6.0  ;;  %v2786_v7 = vadd.f32 %v2778_v8, %v2750_v30  ;;  %v9571_v27 = vld [vmem:[#allocation129_spill] sm:$0xff] }
 0x320   : > { %v3002_v1 = vunpack.c.l.bf16 %v8579_v60  ;;  %v3003_v37 = vunpack.c.l.bf16 %v8581_v12  ;;  %v3976_v61 = vpack.c.bf16 %v3968_v58, %v3968_v58  ;;  %v2893_v56 = vadd.f32 %v2875_v39, %v2785_v10 }
 0x321   : > { %v2965_v6 = vrot.slane %v2927_v54, 1  ;;  %v2968_v15 = vrot.slane %v2929_v40, 1  ;;  %v3977_v36 = vpack.c.bf16 %v3969_v23, %v3969_v23  ;;  %v2894_v18 = vadd.f32 %v2878_v4, %v2786_v7 }
 0x322   : > { %v3014_v43 = vmul.f32 %v8004_v44, %v3002_v1  ;;  %v3015_v11 = vmul.f32 %v8004_v44, %v3003_v37  ;;  %3984 = vst [vmem:[#allocation3 + $0x34] sm:$0xf] %v3976_v61  ;;  %v9565_v19 = vrot.slane %v8106_v45, 1  ;;  %v9566_v53 = vrot.slane %v8163_v52, 1 }
 0x323   : > { %v9568_v46 = vunpack.c.l.bf16 %v9567_v59  ;;  %v9570_v31 = vunpack.c.l.bf16 %v9569_v55  ;;  %3985 = vst [vmem:[#allocation3 + $0x40] sm:$0xf] %v3977_v36  ;;  %v9572_v8 = vunpack.c.l.bf16 %v9571_v27  ;;  %v9574_v5 = vunpack.c.l.bf16 %v9573_v9 }
 0x324   : > { %v2967_v49 = vsel %vm2618_vm15, %v2965_v6, %v9565_v19  ;;  %v2970_v63 = vsel %vm2618_vm15, %v2968_v15, %v9566_v53  ;;  %v3164_v39 = vmul.f32 %v9379_v50, %v3002_v1  ;;  %v9575_v29 = vunpack.c.l.bf16 %v8120_v13 }
 0x325   : > { %v3072_v26 = vmul.f32 %v8008_v62, %v9568_v46  ;;  %v3073_v30 = vmul.f32 %v8008_v62, %v9570_v31  ;;  %v2985_v0 = vadd.f32 %v2967_v49, %v2893_v56  ;;  %v2986_v44 = vadd.f32 %v2970_v63, %v2894_v18  ;;  %v5896_v63 = vld [vmem:[#allocation3 + $0x30] ss:$12 sps:$4 sm:$0xff]  }
 0x326   : > { %v3074_v45 = vmul.f32 %v8008_v62, %v9572_v8  ;;  %v3075_v52 = vmul.f32 %v8008_v62, %v9574_v5  ;;  %v3165_v20 = vmul.f32 %v9379_v50, %v9575_v29  ;;  %v3166_v54 = vmul.f32 %v9379_v50, %v3003_v37  ;;  %v9587_v29 = vld [vmem:[#allocation99_spill] sm:$0xff] }
 0x327   : > { %v3110_v32 = vrot.slane %v3072_v26, 1  ;;  %v3111_v25 = vrot.slane %v3073_v30, 1  ;;  %v3022_v16 = vadd.f32 %v3014_v43, %v2985_v0  ;;  %v3023_v24 = vadd.f32 %v3015_v11, %v2986_v44  ;;  %v9579_v43 = vld [vmem:[#allocation94_spill] sm:$0xff]  ;;  %v9580_v11 = vld [vmem:[#allocation208_spill] sm:$0xff]  ;;  %v9581_v26 = vld [vmem:[#allocation113_spill] sm:$0xff] }
 0x328   : > { %v3113_v4 = vrot.slane %v3074_v45, 1  ;;  %v3114_v58 = vrot.slane %v3075_v52, 1  ;;  %v9576_v40 = vunpack.c.l.bf16 %v8154_v28  ;;  %v3202_v23 = vrot.slane %v3164_v39, 1  ;;  %v9582_v30 = vld [vmem:[#allocation209_spill] sm:$0xff] }
 0x329   : > { %v3112_v10 = vsel %vm2618_vm15, %v3110_v32, %v3111_v25  ;;  %v3203_v61 = vrot.slane %v3165_v20, 1  ;;  %v9577_v13 = vunpack.c.h.bf16 %v9548_v57  ;;  %v3205_v15 = vrot.slane %v3166_v54, 1  ;;  %v9585_v25 = vld [vmem:[#allocation100_spill] sm:$0xff] }
 0x32a   : > { %v3167_v62 = vmul.f32 %v9379_v50, %v9576_v40  ;;  %v3115_v7 = vsel %vm2618_vm15, %v3113_v4, %v3114_v58  ;;  %v3130_v1 = vadd.f32 %v3112_v10, %v3022_v16  ;;  %v9578_v18 = vunpack.c.h.bf16 %v8111_v17  ;;  %v5893_v53 = vld [vmem:[#allocation3 + $0x34] ss:$12 sps:$4 sm:$0xff]   ;;  %v9589_v16 = vld [vmem:[#allocation125_spill] sm:$0xff] }
 0x32b   : > { %v3282_v56 = vmul.f32 %v8191_v41, %v9577_v13  ;;  %v3131_v6 = vadd.f32 %v3115_v7, %v3023_v24  ;;  %v3204_v28 = vsel %vm2618_vm15, %v3202_v23, %v3203_v61  ;;  %v3462_v19 = vrot.slane %v9580_v11, 1  ;;  %5040 = vmatprep.mubr.bf16.mxu1 %v5893_v53  ;;  %v9591_v4 = vld [vmem:[#allocation124_spill] sm:$0xff]  ;;  %v9596_v11 = vld [vmem:[#allocation107_spill] sm:$0xff] }
 0x32c   : > { %v3206_v36 = vrot.slane %v3167_v62, 1  ;;  %v3283_v37 = vmul.f32 %v8191_v41, %v9578_v18  ;;  %v3465_v49 = vrot.slane %v8138_v3, 1  ;;  %v3222_v46 = vadd.f32 %v3204_v28, %v3130_v1  ;;  %5041 = vmatmul.mubr.bf16.gmra.mxu1 %v5896_v63 }
 0x32d   : > { %v3390_v50 = vadd.f32 %v9579_v43, %v3282_v56  ;;  %v3498_v31 = vunpack.c.h.bf16 %v8557_v38  ;;  %v9583_v41 = vrot.slane %v9582_v30, 1  ;;  %v9584_v44 = vrot.slane %v8147_v51, 1 }
 0x32e   : > { %v3207_v57 = vsel %vm2618_vm15, %v3205_v15, %v3206_v36  ;;  %v3391_v55 = vadd.f32 %v9581_v26, %v3283_v37  ;;  %v3499_v3 = vunpack.c.h.bf16 %v8562_v22  ;;  %v3230_v45 = vmax.f32 %v3222_v46, 0.0 }
 0x32f   : > { %v3223_v17 = vadd.f32 %v3207_v57, %v3131_v6  ;;  %v3464_v0 = vsel %vm2618_vm15, %v3462_v19, %v9583_v41  ;;  %v3467_v8 = vsel %vm2618_vm15, %v3465_v49, %v9584_v44  ;;  %v3510_v52 = vmul.f32 %v8217_v48, %v3498_v31  ;;  %v9599_v57 = vld [vmem:[#allocation131_spill] sm:$0xff] }
 0x330   : > { %v3482_v9 = vadd.f32 %v3464_v0, %v3390_v50  ;;  %v3483_v5 = vadd.f32 %v3467_v8, %v3391_v55  ;;  %v3511_v38 = vmul.f32 %v8217_v48, %v3499_v3  ;;  %v9586_v39 = vrot.slane %v9585_v25, 1  ;;  %v3988_v8 = vld [vmem:[#allocation2 + $0x38] ss:$12 sps:$4 sm:$0xff]  }
 0x331   : > { %v3231_v32 = vmax.f32 %v3223_v17, 0.0  ;;  %v9588_v20 = vrot.slane %v9587_v29, 1  ;;  %v9590_v24 = vrot.slane %v9589_v16, 1  ;;  %v9592_v22 = vrot.slane %v9591_v4, 1 }
 0x332   : > { %v3238_v10 = vmin.f32 %v3230_v45, 6.0  ;;  %v3518_v54 = vadd.f32 %v3510_v52, %v3482_v9  ;;  %v3660_v40 = vmul.f32 %v7157_v21, %v3498_v31  ;;  %v3662_v62 = vmul.f32 %v7157_v21, %v3499_v3  ;;  %v4124_v52 = vld [vmem:[#allocation2 + $0x5c] sm:$0x1] }
 0x333   : > { %v3608_v51 = vsel %vm2618_vm15, %v9588_v20, %v9586_v39  ;;  %v3611_v58 = vsel %vm2618_vm15, %v9592_v22, %v9590_v24  ;;  %v3239_v23 = vmin.f32 %v3231_v32, 6.0  ;;  %v3519_v48 = vadd.f32 %v3511_v38, %v3483_v5  ;;  %v4017_v5 = vld [vmem:[#allocation2 + $0x50] sm:$0x1]  ;;  %v9603_v24 = vld [vmem:[#allocation115_spill] sm:$0xff] }
 0x334   : > { %v3734_v7 = vunpack.c.h.bf16 %v8579_v60  ;;  %v3735_v1 = vunpack.c.h.bf16 %v8581_v12  ;;  %v3246_v61 = vpack.c.bf16 %v3238_v10, %v3238_v10  ;;  %v3626_v13 = vadd.f32 %v3608_v51, %v3518_v54  ;;  %v9604_v10 = vld [vmem:[#allocation23_spill] sm:$0xff] }
 0x335   : > { %v3698_v56 = vrot.slane %v3660_v40, 1  ;;  %v3701_v6 = vrot.slane %v3662_v62, 1  ;;  %v3247_v15 = vpack.c.bf16 %v3239_v23, %v3239_v23  ;;  %v3627_v36 = vadd.f32 %v3611_v58, %v3519_v48  ;;  %v9605_v40 = vld [vmem:[#allocation116_spill] sm:$0xff] }
 0x336   : > { %v3746_v18 = vmul.f32 %v8237_v47, %v3734_v7  ;;  %v3747_v37 = vmul.f32 %v8237_v47, %v3735_v1  ;;  %3254 = vst [vmem:[#allocation3 + $0x48] sm:$0xf] %v3246_v61  ;;  %v9593_v28 = vrot.slane %v8109_v2, 1  ;;  %v9594_v43 = vrot.slane %v8166_v33, 1  ;;  %v9607_v61 = vld [vmem:[#allocation132_spill] sm:$0xff] }
 0x337   : > { %v9595_v12 = vunpack.c.h.bf16 %v9567_v59  ;;  %v9597_v19 = vunpack.c.l.bf16 %v9596_v11  ;;  %3255 = vst [vmem:[#allocation3 + $0x54] sm:$0xf] %v3247_v15  ;;  %v9598_v63 = vunpack.c.h.bf16 %v9571_v27  ;;  %v9600_v46 = vunpack.c.l.bf16 %v9599_v57 }
 0x338   : > { %v3700_v21 = vsel %vm2618_vm15, %v3698_v56, %v9593_v28  ;;  %v3703_v60 = vsel %vm2618_vm15, %v3701_v6, %v9594_v43  ;;  %v3896_v59 = vmul.f32 %v9401_v34, %v3734_v7  ;;  %v9601_v31 = vunpack.c.l.bf16 %v8128_v35  ;;  %v4453_v56 = vld [vmem:[#allocation2 + $0x104] sm:$0xf]  ;;  %v9610_v28 = vld [vmem:[#allocation44_spill] sm:$0xff] }
 0x339   : > { %v3804_v50 = vmul.f32 %v8244_v42, %v9595_v12  ;;  %v3805_v49 = vmul.f32 %v8244_v42, %v9597_v19  ;;  %v3718_v53 = vadd.f32 %v3700_v21, %v3626_v13  ;;  %v3719_v47 = vadd.f32 %v3703_v60, %v3627_v36  ;;  %v4452_v60 = vld [vmem:[#allocation2 + $0xa4] sm:$0xf]  ;;  %v9612_v19 = vld [vmem:[#allocation108_spill] sm:$0xff] }
 0x33a   : > { %v3806_v2 = vmul.f32 %v8244_v42, %v9598_v63  ;;  %v3807_v33 = vmul.f32 %v8244_v42, %v9600_v46  ;;  %v3897_v17 = vmul.f32 %v9401_v34, %v9601_v31  ;;  %v3898_v3 = vmul.f32 %v9401_v34, %v3735_v1  ;;  %v9606_v1 = vld [vmem:[#allocation128_spill] sm:$0xff] }
 0x33b   : > { %v3842_v26 = vrot.slane %v3804_v50, 1  ;;  %v3843_v55 = vrot.slane %v3805_v49, 1  ;;  %v3754_v30 = vadd.f32 %v3746_v18, %v3718_v53  ;;  %v3755_v41 = vadd.f32 %v3747_v37, %v3719_v47  ;;  %v9608_v18 = vld [vmem:[#allocation46_spill] sm:$0xff] }
 0x33c   : > { %v3845_v0 = vrot.slane %v3806_v2, 1  ;;  %v3846_v44 = vrot.slane %v3807_v33, 1  ;;  %v9602_v45 = vunpack.c.l.bf16 %v8156_v14  ;;  %v3934_v9 = vrot.slane %v3896_v59, 1  ;;  %v9613_v47 = vld [vmem:[#allocation34_spill] sm:$0xff]  ;;  %v9615_v2 = vld [vmem:[#allocation33_spill] sm:$0xff]  ;;  %v9617_v33 = vld [vmem:[#allocation120_spill] sm:$0xff] }
 0x33d   : > { %v3844_v27 = vsel %vm2618_vm15, %v3842_v26, %v3843_v55  ;;  %v3935_v38 = vrot.slane %v3897_v17, 1  ;;  %v3996_v25 = vunpack.c.h.bf16 %v3988_v8  ;;  %v3937_v29 = vrot.slane %v3898_v3, 1  ;;  %v9619_v55 = vld [vmem:[#allocation119_spill] sm:$0xff]  ;;  %v9621_v17 = vld [vmem:[#allocation110_spill] sm:$0xff] }
 0x33e   : > { %v3899_v42 = vmul.f32 %v9401_v34, %v9602_v45  ;;  %v3847_v35 = vsel %vm2618_vm15, %v3845_v0, %v3846_v44  ;;  %v3862_v32 = vadd.f32 %v3844_v27, %v3754_v30  ;;  %v4032_v51 = vunpack.c.l.bf16 %v3988_v8 }
 0x33f   : > { %v3863_v39 = vadd.f32 %v3847_v35, %v3755_v41  ;;  %v3936_v16 = vsel %vm2618_vm15, %v3934_v9, %v3935_v38  ;;  %v4008_v4 = vmul.f32 %v9603_v24, %v3996_v25  ;;  %v4033_v22 = vunpack.c.l.bf16 %v4017_v5  ;;  %v9623_v41 = vld [vmem:[#allocation109_spill] sm:$0xff]  ;;  %v9625_v38 = vld [vmem:[#allocation55_spill] sm:$0xff] }
 0x340   : > { %v3938_v20 = vrot.slane %v3899_v42, 1  ;;  %v4132_v14 = vunpack.c.l.bf16 %v4124_v52  ;;  %v3954_v58 = vadd.f32 %v3936_v16, %v3862_v32  ;;  %v4052_v54 = vmul.f32 %v9604_v10, %v4032_v51 }
 0x341   : > { %v4144_v62 = vmul.f32 %v9605_v40, %v3996_v25  ;;  %v4053_v48 = vmul.f32 %v9604_v10, %v4033_v22  ;;  %v4209_v13 = vadd.f32 %v9607_v61, %v9606_v1  ;;  %v9609_v37 = vrot.slane %v9608_v18, 1  ;;  %v9630_v22 = vld [vmem:[#allocation133_spill] sm:$0xff] }
 0x342   : > { %v3939_v34 = vsel %vm2618_vm15, %v3937_v29, %v3938_v20  ;;  %v4145_v7 = vmul.f32 %v9605_v40, %v4132_v14  ;;  %v3962_v6 = vmax.f32 %v3954_v58, 0.0  ;;  %v4084_v15 = vrot.slane %v4052_v54, 1  ;;  %v9628_v20 = vld [vmem:[#allocation51_spill] sm:$0xff]  ;;  %v9631_v58 = vld [vmem:[#allocation117_spill] sm:$0xff]  ;;  %v9632_v40 = vld [vmem:[#allocation126_spill] sm:$0xff] }
 0x343   : > { %v3955_v23 = vadd.f32 %v3939_v34, %v3863_v39  ;;  %v4176_v36 = vrot.slane %v4144_v62, 1  ;;  %v9611_v21 = vrot.slane %v9610_v28, 1  ;;  %v4085_v50 = vrot.slane %v4053_v48, 1  ;;  %v9627_v39 = vld [vmem:[#allocation27_spill] sm:$0xff]  ;;  %v9639_v28 = vld [vmem:[#allocation52_spill] sm:$0xff] }
 0x344   : > { %v4177_v11 = vrot.slane %v4145_v7, 1  ;;  %v4245_v49 = vadd.f32 %v9612_v19, %v4209_v13  ;;  %v3970_v53 = vmin.f32 %v3962_v6, 6.0  ;;  %v9614_v63 = vrot.slane %v9613_v47, 1  ;;  %v9634_v7 = vld [vmem:[#allocation118_spill] sm:$0xff]  ;;  %v9635_v13 = vld [vmem:[#allocation121_spill] sm:$0xff] }
 0x345   : > { %v4322_v43 = vsel %vm2618_vm15, %v9611_v21, %v9609_v37  ;;  %v3963_v12 = vmax.f32 %v3955_v23, 0.0  ;;  %v9616_v57 = vrot.slane %v9615_v2, 1  ;;  %v9618_v26 = vrot.slane %v9617_v33, 1  ;;  %v9642_v47 = vld [vmem:[#allocation62_spill] sm:$0xff] }
 0x346   : > { %v9620_v59 = vrot.slane %v9619_v55, 1  ;;  %v9622_v30 = vrot.slane %v9621_v17, 1  ;;  %v9624_v0 = vrot.slane %v9623_v41, 1  ;;  %v4086_v27 = vsel %vm2618_vm15, %v4084_v15, %v4085_v50  ;;  %v9649_v41 = vld [vmem:[#allocation68_spill] sm:$0xff] }
 0x347   : > { %v4325_v46 = vsel %vm2618_vm15, %v9616_v57, %v9614_v63  ;;  %v3971_v8 = vmin.f32 %v3963_v12, 6.0  ;;  %v4178_v3 = vsel %vm2618_vm15, %v4176_v36, %v4177_v11  ;;  %v3978_v42 = vpack.c.bf16 %v3970_v53, %v3970_v53  ;;  %v9637_v36 = vld [vmem:[#allocation58_spill] sm:$0xff]  ;;  %v9641_v53 = vld [vmem:[#allocation152_spill] sm:$0xff] }
 0x348   : > { %v4414_v31 = vsel %vm2618_vm15, %v9620_v59, %v9618_v26  ;;  %v4417_v44 = vsel %vm2618_vm15, %v9624_v0, %v9622_v30  ;;  %v4353_v45 = vadd.f32 %v4325_v46, %v4245_v49  ;;  %v4116_v9 = vadd.f32 %v4086_v27, %v4008_v4  ;;  %v9643_v57 = vld [vmem:[#allocation136_spill] sm:$0xff]  ;;  %v9644_v46 = vld [vmem:[#allocation143_spill] sm:$0xff]  ;;  %v9645_v26 = vld [vmem:[#allocation70_spill] sm:$0xff] }
 0x349   : > { %v4460_v5 = vunpack.c.l.bf16 %v4452_v60  ;;  %v4461_v52 = vunpack.c.l.bf16 %v4453_v56  ;;  %v3979_v35 = vpack.c.bf16 %v3971_v8, %v3971_v8  ;;  %v9626_v25 = vunpack.c.l.bf16 %v9625_v38  ;;  %3986 = vst [vmem:[#allocation3 + $0x4c] sm:$0xf] %v3978_v42  ;;  %v9647_v59 = vld [vmem:[#allocation69_spill] sm:$0xff] }
 0x34a   : > { %v4445_v32 = vadd.f32 %v4417_v44, %v4353_v45  ;;  %v9629_v51 = vunpack.c.l.bf16 %v9628_v20  ;;  %v4208_v24 = vadd.f32 %v4178_v3, %v4116_v9  ;;  %v9633_v62 = vunpack.c.l.bf16 %v9632_v40  ;;  %v9651_v44 = vld [vmem:[#allocation67_spill] sm:$0xff]  ;;  %v9653_v45 = vld [vmem:[#allocation134_spill] sm:$0xff]  ;;  %v9654_v9 = vld [vmem:[#allocation145_spill] sm:$0xff] }
 0x34b   : > { %v4524_v29 = vmul.f32 %v9627_v39, %v9626_v25  ;;  %v4472_v14 = vmul.f32 %v9630_v22, %v4460_v5  ;;  %v4473_v34 = vmul.f32 %v9630_v22, %v4461_v52  ;;  %v4616_v4 = vmul.f32 %v9631_v58, %v4460_v5  ;;  %3987 = vst [vmem:[#allocation3 + $0x58] sm:$0xf] %v3979_v35 }
 0x34c   : > { %v4526_v16 = vmul.f32 %v9627_v39, %v9629_v51  ;;  %v4617_v23 = vmul.f32 %v9631_v58, %v9633_v62  ;;  %v4618_v48 = vmul.f32 %v9631_v58, %v4461_v52  ;;  %v4244_v1 = vadd.f32 %v9634_v7, %v4208_v24  ;;  %v9656_v52 = vld [vmem:[#allocation144_spill] sm:$0xff]  ;;  %v9660_v51 = vld [vmem:[#allocation138_spill] sm:$0xff]  ;;  %v9664_v62 = vld [vmem:[#allocation137_spill] sm:$0xff] }
 0x34d   : > { %v4556_v10 = vrot.slane %v4524_v29, 1  ;;  %v4481_v61 = vadd.f32 %v4473_v34, %v4445_v32  ;;  %v9636_v56 = vunpack.c.l.bf16 %v9635_v13  ;;  %v4648_v15 = vrot.slane %v4616_v4, 1  ;;  %v9658_v29 = vld [vmem:[#allocation140_spill] sm:$0xff]  ;;  %v9662_v34 = vld [vmem:[#allocation139_spill] sm:$0xff] }
 0x34e   : > { %v4559_v54 = vrot.slane %v4526_v16, 1  ;;  %v9638_v18 = vrot.slane %v9637_v36, 1  ;;  %v9640_v21 = vrot.slane %v9639_v28, 1  ;;  %v4649_v12 = vrot.slane %v4617_v23, 1  ;;  %v9666_v7 = vld [vmem:[#allocation164_spill] sm:$0xff] }
 0x34f   : > { %v4619_v6 = vmul.f32 %v9631_v58, %v9636_v56  ;;  %v4651_v50 = vrot.slane %v4618_v48, 1  ;;  %v4352_v11 = vadd.f32 %v4322_v43, %v4244_v1  ;;  %v4355_v63 = vadd.f32 %v9642_v47, %v9641_v53  ;;  %v9665_v48 = vld [vmem:[#allocation161_spill] sm:$0xff]  ;;  %v9669_v56 = vld [vmem:[#allocation78_spill] sm:$0xff] }
 0x350   : > { %v4558_v37 = vsel %vm2618_vm15, %v4556_v10, %v9638_v18  ;;  %v4561_v60 = vsel %vm2618_vm15, %v4559_v54, %v9640_v21  ;;  %v4650_v2 = vsel %vm2618_vm15, %v4648_v15, %v4649_v12  ;;  %v4482_v33 = vadd.f32 %v9644_v46, %v9643_v57  ;;  %v5903_v54 = vld [vmem:[#allocation3 + $0x48] ss:$12 sps:$4 sm:$0xff]   ;;  %v4456_v36 = vld [vmem:[#allocation2 + $0x224] sm:$0xf]  ;;  %v9671_v21 = vld [vmem:[#allocation153_spill] sm:$0xff] }
 0x351   : > { %v4589_v19 = vadd.f32 %v4561_v60, %v4481_v61  ;;  %v4652_v49 = vrot.slane %v4619_v6, 1  ;;  %v9646_v55 = vrot.slane %v9645_v26, 1  ;;  %v9648_v17 = vrot.slane %v9647_v59, 1  ;;  %v9667_v61 = vld [vmem:[#allocation79_spill] sm:$0xff]  ;;  %v9672_v12 = vld [vmem:[#allocation74_spill] sm:$0xff] }
 0x352   : > { %v9650_v0 = vrot.slane %v9649_v41, 1  ;;  %v9652_v43 = vrot.slane %v9651_v44, 1  ;;  %v4444_v27 = vadd.f32 %v4414_v31, %v4352_v11  ;;  %v4447_v42 = vadd.f32 %v9653_v45, %v4355_v63  ;;  %v9663_v31 = vld [vmem:[#allocation141_spill] sm:$0xff]  ;;  %v9677_v46 = vld [vmem:[#allocation155_spill] sm:$0xff]  ;;  %v9679_v26 = vld [vmem:[#allocation154_spill] sm:$0xff] }
 0x353   : > { %v4564_v30 = vsel %vm2618_vm15, %v9648_v17, %v9646_v55  ;;  %v4653_v3 = vsel %vm2618_vm15, %v4651_v50, %v4652_v49  ;;  %v9655_v5 = vrot.slane %v9654_v9, 1  ;;  %v9657_v35 = vrot.slane %v9656_v52, 1  ;;  %v5900_v10 = vld [vmem:[#allocation3 + $0x4c] ss:$12 sps:$4 sm:$0xff]   ;;  %v4457_v49 = vld [vmem:[#allocation2 + $0x284] sm:$0xf] }
 0x354   : > { %v4567_v8 = vsel %vm2618_vm15, %v9652_v43, %v9650_v0  ;;  %v4681_v38 = vadd.f32 %v4653_v3, %v4589_v19  ;;  %v4590_v25 = vadd.f32 %v4564_v30, %v4482_v33  ;;  %v9659_v20 = vrot.slane %v9658_v29, 1  ;;  %v9674_v11 = vld [vmem:[#allocation73_spill] sm:$0xff]  ;;  %5048 = vmatprep.mubr.bf16.mxu1 %v5900_v10  ;;  %v9681_v0 = vld [vmem:[#allocation151_spill] sm:$0xff]  ;;  %v9683_v43 = vld [vmem:[#allocation150_spill] sm:$0xff] }
 0x355   : > { %v4656_v32 = vsel %vm2618_vm15, %v9657_v35, %v9655_v5  ;;  %v9661_v16 = vrot.slane %v9660_v51, 1  ;;  %v4212_v4 = vadd.f32 %v9663_v31, %v9662_v34  ;;  %v4480_v40 = vadd.f32 %v4472_v14, %v4444_v27  ;;  %v9676_v63 = vld [vmem:[#allocation149_spill] sm:$0xff]  ;;  %5049 = vmatmul.mubr.bf16.gmra.mxu1 %v5903_v54 }
 0x356   : > { %v4483_v23 = vadd.f32 %v9664_v62, %v4447_v42  ;;  %v4213_v1 = vadd.f32 %v9666_v7, %v9665_v48  ;;  %v9668_v13 = vrot.slane %v9667_v61, 1  ;;  %v9670_v6 = vrot.slane %v9669_v56, 1 }
 0x357   : > { %v4659_v24 = vsel %vm2618_vm15, %v9661_v16, %v9659_v20  ;;  %v4689_v18 = vmax.f32 %v4681_v38, 0.0  ;;  %v4682_v28 = vadd.f32 %v4656_v32, %v4590_v25  ;;  %v4248_v60 = vadd.f32 %v9671_v21, %v4212_v4  ;;  %v9685_v16 = vld [vmem:[#allocation86_spill] sm:$0xff]  ;;  %v9693_v21 = vld [vmem:[#allocation87_spill] sm:$0xff] }
 0x358   : > { %v4334_v15 = vsel %vm2618_vm15, %v9670_v6, %v9668_v13  ;;  %v9673_v50 = vrot.slane %v9672_v12, 1  ;;  %v9675_v14 = vrot.slane %v9674_v11, 1  ;;  %v4588_v53 = vadd.f32 %v4558_v37, %v4480_v40 }
 0x359   : > { %v4591_v47 = vadd.f32 %v4567_v8, %v4483_v23  ;;  %v4249_v57 = vadd.f32 %v9676_v63, %v4213_v1  ;;  %v9678_v33 = vrot.slane %v9677_v46, 1  ;;  %v9680_v55 = vrot.slane %v9679_v26, 1  ;;  %v9689_v1 = vld [vmem:[#allocation158_spill] sm:$0xff] }
 0x35a   : > { %v4337_v19 = vsel %vm2618_vm15, %v9675_v14, %v9673_v50  ;;  %v4697_v17 = vmin.f32 %v4689_v18, 6.0  ;;  %v4690_v30 = vmax.f32 %v4682_v28, 0.0  ;;  %v4356_v41 = vadd.f32 %v4334_v15, %v4248_v60  ;;  %v9695_v50 = vld [vmem:[#allocation85_spill] sm:$0xff]  ;;  %v4459_v46 = vld [vmem:[#allocation2 + $0x344] sm:$0xf] }
 0x35b   : > { %v4426_v59 = vsel %vm2618_vm15, %v9680_v55, %v9678_v33  ;;  %v9682_v44 = vrot.slane %v9681_v0, 1  ;;  %v9684_v27 = vrot.slane %v9683_v43, 1  ;;  %v4680_v37 = vadd.f32 %v4650_v2, %v4588_v53  ;;  %v4458_v33 = vld [vmem:[#allocation2 + $0x2e4] sm:$0xf]  ;;  %v9697_v55 = vld [vmem:[#allocation159_spill] sm:$0xff] }
 0x35c   : > { %v4683_v8 = vadd.f32 %v4659_v24, %v4591_v47  ;;  %v4357_v45 = vadd.f32 %v4337_v19, %v4249_v57  ;;  %v4464_v42 = vunpack.c.l.bf16 %v4456_v36  ;;  %v4705_v9 = vpack.c.bf16 %v4697_v17, %v4697_v17  ;;  %v9687_v24 = vld [vmem:[#allocation84_spill] sm:$0xff]  ;;  %v9691_v36 = vld [vmem:[#allocation157_spill] sm:$0xff] }
 0x35d   : > { %v4429_v3 = vsel %vm2618_vm15, %v9684_v27, %v9682_v44  ;;  %v4698_v5 = vmin.f32 %v4690_v30, 6.0  ;;  %v4448_v52 = vadd.f32 %v4426_v59, %v4356_v41  ;;  %v4465_v35 = vunpack.c.l.bf16 %v4457_v49  ;;  %v9698_v59 = vld [vmem:[#allocation160_spill] sm:$0xff]  ;;  %v9699_v30 = vld [vmem:[#allocation181_spill] sm:$0xff]  ;;  %v9700_v41 = vld [vmem:[#allocation183_spill] sm:$0xff] }
 0x35e   : > { %v4688_v32 = vmax.f32 %v4680_v37, 0.0  ;;  %v4691_v38 = vmax.f32 %v4683_v8, 0.0  ;;  %v4449_v25 = vadd.f32 %v4429_v3, %v4357_v45  ;;  %v4476_v29 = vmul.f32 %v9630_v22, %v4464_v42  ;;  %4713 = vst [vmem:[#allocation3 + $0x14] sm:$0xf] %v4705_v9  ;;  %v9701_v44 = vld [vmem:[#allocation96_spill] sm:$0xff]  ;;  %v9703_v27 = vld [vmem:[#allocation95_spill] sm:$0xff] }
 0x35f   : > { %v4706_v20 = vpack.c.bf16 %v4698_v5, %v4698_v5  ;;  %v4477_v51 = vmul.f32 %v9630_v22, %v4465_v35  ;;  %v9686_v34 = vunpack.c.l.bf16 %v9685_v16  ;;  %v9688_v31 = vunpack.c.l.bf16 %v9687_v24  ;;  %v9707_v5 = vld [vmem:[#allocation91_spill] sm:$0xff]  ;;  %v9713_v16 = vld [vmem:[#allocation172_spill] sm:$0xff] }
 0x360   : > { %v4696_v10 = vmin.f32 %v4688_v32, 6.0  ;;  %v4699_v54 = vmin.f32 %v4691_v38, 6.0  ;;  %v4484_v40 = vadd.f32 %v4476_v29, %v4448_v52  ;;  %v4624_v62 = vmul.f32 %v9631_v58, %v4464_v42  ;;  %v9705_v42 = vld [vmem:[#allocation92_spill] sm:$0xff]  ;;  %v9709_v32 = vld [vmem:[#allocation174_spill] sm:$0xff] }
 0x361   : > { %v4532_v2 = vmul.f32 %v9627_v39, %v9686_v34  ;;  %v4534_v4 = vmul.f32 %v9627_v39, %v9688_v31  ;;  %4714 = vst [vmem:[#allocation3 + $0x20] sm:$0xf] %v4706_v20  ;;  %v4485_v23 = vadd.f32 %v4477_v51, %v4449_v25  ;;  %v9690_v61 = vunpack.c.l.bf16 %v9689_v1  ;;  %v9711_v25 = vld [vmem:[#allocation173_spill] sm:$0xff]  ;;  %v9715_v31 = vld [vmem:[#allocation171_spill] sm:$0xff] }
 0x362   : > { %v4704_v56 = vpack.c.bf16 %v4696_v10, %v4696_v10  ;;  %v4707_v6 = vpack.c.bf16 %v4699_v54, %v4699_v54  ;;  %v4626_v15 = vmul.f32 %v9631_v58, %v4465_v35  ;;  %v9692_v18 = vunpack.c.l.bf16 %v9691_v36  ;;  %v9717_v10 = vld [vmem:[#allocation170_spill] sm:$0xff] }
 0x363   : > { %v4568_v48 = vrot.slane %v4532_v2, 1  ;;  %v4571_v7 = vrot.slane %v4534_v4, 1  ;;  %v4625_v13 = vmul.f32 %v9631_v58, %v9690_v61  ;;  %v9694_v60 = vrot.slane %v9693_v21, 1  ;;  %v9714_v2 = vld [vmem:[#allocation169_spill] sm:$0xff] }
 0x364   : > { %v4627_v28 = vmul.f32 %v9631_v58, %v9692_v18  ;;  %v9696_v11 = vrot.slane %v9695_v50, 1  ;;  %v4660_v19 = vrot.slane %v4624_v62, 1  ;;  %4712 = vst [vmem:[#allocation3 + $0x8] sm:$0xf] %v4704_v56  ;;  %4715 = vst [vmem:[#allocation3 + $0x2c] sm:$0xf] %v4707_v6  ;;  %v4214_v17 = vadd.f32 %v9698_v59, %v9697_v55 }
 0x365   : > { %v4570_v12 = vsel %vm2618_vm15, %v4568_v48, %v9694_v60  ;;  %v4661_v49 = vrot.slane %v4625_v13, 1  ;;  %v4663_v63 = vrot.slane %v4626_v15, 1  ;;  %v4215_v0 = vadd.f32 %v9700_v41, %v9699_v30  ;;  %v9721_v15 = vld [vmem:[#allocation101_spill] sm:$0xff]  ;;  %v9727_v30 = vld [vmem:[#allocation176_spill] sm:$0xff] }
 0x366   : > { %v4573_v14 = vsel %vm2618_vm15, %v4571_v7, %v9696_v11  ;;  %v4592_v53 = vadd.f32 %v4570_v12, %v4484_v40  ;;  %v4664_v57 = vrot.slane %v4627_v28, 1  ;;  %v9702_v43 = vrot.slane %v9701_v44, 1  ;;  %v9719_v7 = vld [vmem:[#allocation103_spill] sm:$0xff] }
 0x367   : > { %v4593_v47 = vadd.f32 %v4573_v14, %v4485_v23  ;;  %v4662_v26 = vsel %vm2618_vm15, %v4660_v19, %v4661_v49  ;;  %v9704_v3 = vrot.slane %v9703_v27, 1  ;;  %v9706_v9 = vrot.slane %v9705_v42, 1  ;;  %v9723_v49 = vld [vmem:[#allocation177_spill] sm:$0xff] }
 0x368   : > { %v4665_v8 = vsel %vm2618_vm15, %v4663_v63, %v4664_v57  ;;  %v4684_v45 = vadd.f32 %v4662_v26, %v4592_v53  ;;  %v9708_v52 = vrot.slane %v9707_v5, 1  ;;  %v9710_v38 = vrot.slane %v9709_v32, 1 }
 0x369   : > { %v4340_v37 = vsel %vm2618_vm15, %v9704_v3, %v9702_v43  ;;  %v9712_v29 = vrot.slane %v9711_v25, 1  ;;  %v4685_v51 = vadd.f32 %v4665_v8, %v4593_v47  ;;  %v4250_v34 = vadd.f32 %v9713_v16, %v4214_v17  ;;  %v9729_v43 = vld [vmem:[#allocation102_spill] sm:$0xff] }
 0x36a   : > { %v4343_v35 = vsel %vm2618_vm15, %v9708_v52, %v9706_v9  ;;  %v4251_v24 = vadd.f32 %v9714_v2, %v4215_v0  ;;  %v9716_v4 = vrot.slane %v9715_v31, 1  ;;  %v9718_v54 = vrot.slane %v9717_v10, 1 }
 0x36b   : > { %v4432_v20 = vsel %vm2618_vm15, %v9712_v29, %v9710_v38  ;;  %v4692_v62 = vmax.f32 %v4684_v45, 0.0  ;;  %v4466_v23 = vunpack.c.l.bf16 %v4458_v33  ;;  %v4467_v48 = vunpack.c.l.bf16 %v4459_v46  ;;  %v5904_v50 = vld [vmem:[#allocation3 + $0x8] ss:$12 sps:$4 sm:$0xff]   ;;  %v5906_v63 = vld [vmem:[#allocation3 + $0x20] ss:$12 sps:$4 sm:$0xff]  }
 0x36c   : > { %v4435_v40 = vsel %vm2618_vm15, %v9718_v54, %v9716_v4  ;;  %v9720_v1 = vunpack.c.l.bf16 %v9719_v7  ;;  %v4693_v13 = vmax.f32 %v4685_v51, 0.0  ;;  %v4358_v56 = vadd.f32 %v4340_v37, %v4250_v34  ;;  %v9725_v33 = vld [vmem:[#allocation104_spill] sm:$0xff]  ;;  %5746 = vmatprep.mubr.bf16.mxu1 %v5904_v50 }
 0x36d   : > { %v4359_v6 = vadd.f32 %v4343_v35, %v4251_v24  ;;  %v9722_v36 = vunpack.c.l.bf16 %v9721_v15  ;;  %v4700_v28 = vmin.f32 %v4692_v62, 6.0  ;;  %v4478_v21 = vmul.f32 %v9630_v22, %v4466_v23  ;;  %5747 = vmatmul.mubr.bf16.vlgmr.msra.gmra.mxu1 %v5906_v63 }
 0x36e   : > { %v4536_v61 = vmul.f32 %v9627_v39, %v9720_v1  ;;  %v4479_v60 = vmul.f32 %v9630_v22, %v4467_v48  ;;  %v4450_v11 = vadd.f32 %v4432_v20, %v4358_v56  ;;  %v4628_v19 = vmul.f32 %v9631_v58, %v4466_v23 }
 0x36f   : > { %v4538_v18 = vmul.f32 %v9627_v39, %v9722_v36  ;;  %v4451_v14 = vadd.f32 %v4435_v40, %v4359_v6  ;;  %v9724_v53 = vunpack.c.l.bf16 %v9723_v49  ;;  %v4701_v57 = vmin.f32 %v4693_v13, 6.0 }
 0x370   : > { %v4574_v12 = vrot.slane %v4536_v61, 1  ;;  %v4708_v46 = vpack.c.bf16 %v4700_v28, %v4700_v28  ;;  %v9726_v39 = vrot.slane %v9725_v33, 1  ;;  %v4486_v22 = vadd.f32 %v4478_v21, %v4450_v11 }
 0x371   : > { %v4629_v47 = vmul.f32 %v9631_v58, %v9724_v53  ;;  %v4577_v55 = vrot.slane %v4538_v18, 1  ;;  %v4487_v59 = vadd.f32 %v4479_v60, %v4451_v14  ;;  %v4630_v17 = vmul.f32 %v9631_v58, %v4467_v48 }
 0x372   : > { %v4576_v26 = vsel %vm2618_vm15, %v4574_v12, %v9726_v39  ;;  %v9728_v41 = vunpack.c.l.bf16 %v9727_v30  ;;  %v4709_v44 = vpack.c.bf16 %v4701_v57, %v4701_v57  ;;  %4716 = vst [vmem:[#allocation3 + $0x38] sm:$0xf] %v4708_v46  ;;  %v9730_v27 = vrot.slane %v9729_v43, 1 }
 0x373   : > { %v4666_v37 = vrot.slane %v4628_v19, 1  ;;  %v4667_v8 = vrot.slane %v4629_v47, 1  ;;  %v4594_v45 = vadd.f32 %v4576_v26, %v4486_v22  ;;  %v4669_v9 = vrot.slane %v4630_v17, 1 }
 0x374   : > { %v4631_v0 = vmul.f32 %v9631_v58, %v9728_v41  ;;  %v4579_v3 = vsel %vm2618_vm15, %v4577_v55, %v9730_v27  ;;  %4717 = vst [vmem:[#allocation3 + $0x44] sm:$0xf] %v4709_v44 }
 0x375   : > { %v4595_v42 = vadd.f32 %v4579_v3, %v4487_v59  ;;  %v4668_v52 = vsel %vm2618_vm15, %v4666_v37, %v4667_v8  ;;  %v6100_v8 = vmov 1935823168  }
 0x376   : > { %v4670_v5 = vrot.slane %v4631_v0, 1  ;;  %v4686_v32 = vadd.f32 %v4668_v52, %v4594_v45  ;;  %v5171_v45 = vunpack.c.l.s4 %v6100_v8 }
 0x378   : > { %v4671_v35 = vsel %vm2618_vm15, %v4669_v9, %v4670_v5  ;;  %v4694_v38 = vmax.f32 %v4686_v32, 0.0 }
 0x379   : > { %v4687_v58 = vadd.f32 %v4671_v35, %v4595_v42 }
 0x37a   : > { %v4702_v29 = vmin.f32 %v4694_v38, 6.0 }
 0x37b   : > { %v4695_v25 = vmax.f32 %v4687_v58, 0.0  ;;  %v5907_v51 = vld [vmem:[#allocation3 + $0x38] ss:$12 sps:$4 sm:$0xff]   ;;  %v5172_v58 = vunpack.c.0.s8 %v5171_v45 }
 0x37c   : > { %v4710_v16 = vpack.c.bf16 %v4702_v29, %v4702_v29  ;;  %5750 = vmatprep.mubr.bf16.mxu1 %v5907_v51 }
 0x37d   : > { %v4703_v20 = vmin.f32 %v4695_v25, 6.0 }
 0x37e   : > { %4718 = vst [vmem:[#allocation3 + $0x50] sm:$0xf] %v4710_v16 }
 0x37f   : > { %v4711_v34 = vpack.c.bf16 %v4703_v20, %v4703_v20 }
 0x381   : > { %4719 = vst [vmem:[#allocation3 + $0x5c] sm:$0xf] %v4711_v34  ;;  %v9731_v34 = vld [vmem:[#allocation17_spill] sm:$0xff] }
 0x388   : > { %v5908_v2 = vld [vmem:[#allocation3 + $0x50] ss:$12 sps:$4 sm:$0xff]  }
 0x389   : > { %5751 = vmatmul.mubr.bf16.gmra.mxu1 %v5908_v2  ;;  %v5175_v2 = vsub.s32 %v5172_v58, %v9731_v34 }
 0x39c   : > { %v5654_v24 = vpop.f32.mrf.mxu1 }
 0x39e   : > { %v5655_v31 = vpop.f32.mrf.mxu1 }
 0x39f   : > { %v5656_v14 = vadd.f32 %v5655_v31, %v5654_v24 }
 0x3a0   : > { %v5657_v4 = vpop.f32.mrf.mxu1 }
 0x3a2   : > { %v5658_v10 = vpop.f32.mrf.mxu1 }
 0x3a3   : > { %v5659_v12 = vadd.f32 %v5658_v10, %v5657_v4 }
 0x3c4   : > { %v5660_v54 = vpop.f32.mrf.mxu1 }
 0x3c6   : > { %v5661_v40 = vpop.f32.mrf.mxu1 }
 0x3c7   : > { %v5662_v50 = vadd.f32 %v5661_v40, %v5660_v54 }
 0x3c8   : > { %v5663_v62 = vpop.f32.mrf.mxu1 }
 0x3ca   : > { %v5664_v23 = vpop.f32.mrf.mxu1 }
 0x3cb   : > { %v5665_v21 = vadd.f32 %v5664_v23, %v5663_v62 }
 0x3ec   : > { %v5666_v48 = vpop.f32.mrf.mxu1 }
 0x3ee   : > { %v5667_v7 = vpop.f32.mrf.mxu1 }
 0x3ef   : > { %v5668_v22 = vadd.f32 %v5667_v7, %v5666_v48 }
 0x3f0   : > { %v5669_v1 = vpop.f32.mrf.mxu1 }
 0x3f2   : > { %v5670_v61 = vpop.f32.mrf.mxu1 }
 0x3f3   : > { %v5671_v17 = vadd.f32 %v5670_v61, %v5669_v1 }
 0x415   : > { %v5672_v13 = vpop.f32.mrf.mxu1 }
 0x417   : > { %v5673_v56 = vpop.f32.mrf.mxu1 }
 0x418   : > { %v5674_v39 = vadd.f32 %v5673_v56, %v5672_v13 }
 0x419   : > { %v5675_v6 = vpop.f32.mrf.mxu1 }
 0x41b   : > { %v5676_v15 = vpop.f32.mrf.mxu1 }
 0x41c   : > { %v5677_v26 = vadd.f32 %v5676_v15, %v5675_v6 }
 0x42d   : > { %v5748_v36 = vpop.f32.mrf.mxu1 }
 0x42e   : > { %v5100_v19 = vadd.f32 %v5748_v36, %v5662_v50 }
 0x42f   : > { %v5091_v18 = vpop.f32.mrf.mxu1 }
 0x430   : > { %v5092_v53 = vadd.f32 %v5656_v14, %v5091_v18 }
 0x431   : > { %v5749_v28 = vpop.f32.mrf.mxu1 }
 0x432   : > { %v5103_v11 = vadd.f32 %v5749_v28, %v5665_v21 }
 0x433   : > { %v5094_v60 = vpop.f32.mrf.mxu1 }
 0x434   : > { %v5095_v49 = vadd.f32 %v5659_v12, %v5094_v60  ;;  %v5123_v47 = vpack.c.bf16 %v5103_v11, %v5100_v19 }
 0x436   : > { %v5122_v63 = vpack.c.bf16 %v5095_v49, %v5092_v53  ;;  %v5138_v46 = vunpack.i.h.s16 %v5123_v47 }
 0x438   : > { %v5128_v55 = vunpack.i.h.s16 %v5122_v63  ;;  %v5530_v30 = vpack.c.b16 %v5138_v46, %v5123_v47 }
 0x43a   : > { %v5527_v43 = vpack.c.b16 %v5128_v55, %v5122_v63  ;;  %v5141_v42 = vunpack.i.h.s16 %v5530_v30 }
 0x43c   : > { %v5131_v52 = vunpack.i.h.s16 %v5527_v43  ;;  %v5531_v38 = vpack.c.b16 %v5141_v42, %v5530_v30 }
 0x43e   : > { %v5528_v20 = vpack.c.b16 %v5131_v52, %v5527_v43  ;;  %v5144_v24 = vunpack.i.h.s16 %v5531_v38 }
 0x440   : > { %v5134_v54 = vunpack.i.h.s16 %v5528_v20 }
 0x449   : > { %v5752_v57 = vpop.f32.mrf.mxu1 }
 0x44a   : > { %v5116_v41 = vadd.f32 %v5752_v57, %v5674_v39 }
 0x44b   : > { %v5107_v33 = vpop.f32.mrf.mxu1 }
 0x44c   : > { %v5108_v27 = vadd.f32 %v5668_v22, %v5107_v33 }
 0x44d   : > { %v5753_v59 = vpop.f32.mrf.mxu1 }
 0x44e   : > { %v5119_v0 = vadd.f32 %v5753_v59, %v5677_v26 }
 0x44f   : > { %v5110_v44 = vpop.f32.mrf.mxu1 }
 0x450   : > { %v5125_v3 = vpack.c.bf16 %v5119_v0, %v5116_v41  ;;  %v5111_v37 = vadd.f32 %v5671_v17, %v5110_v44 }
 0x452   : > { %v5158_v9 = vunpack.i.h.s16 %v5125_v3  ;;  %v5124_v5 = vpack.c.bf16 %v5111_v37, %v5108_v27 }
 0x454   : > { %v5536_v35 = vpack.c.b16 %v5158_v9, %v5125_v3  ;;  %v5148_v32 = vunpack.i.h.s16 %v5124_v5 }
 0x456   : > { %v5161_v25 = vunpack.i.h.s16 %v5536_v35  ;;  %v5533_v29 = vpack.c.b16 %v5148_v32, %v5124_v5 }
 0x458   : > { %v5537_v51 = vpack.c.b16 %v5161_v25, %v5536_v35  ;;  %v5151_v16 = vunpack.i.h.s16 %v5533_v29 }
 0x45a   : > { %v5164_v31 = vunpack.i.h.s16 %v5537_v51  ;;  %v5541_v4 = vpack.c.b16 %v5537_v51, %v5531_v38  ;;  %v5534_v10 = vpack.c.b16 %v5151_v16, %v5533_v29 }
 0x45c   : > { %v5542_v40 = vpack.c.b16 %v5164_v31, %v5144_v24  ;;  %v5154_v62 = vunpack.i.h.s16 %v5534_v10  ;;  %v5539_v23 = vpack.c.b16 %v5534_v10, %v5528_v20  ;;  %v5183_v48 = vrot.slane %v5541_v4, %v5175_v2 }
 0x45e   : > { %v5540_v7 = vpack.c.b16 %v5154_v62, %v5134_v54  ;;  %v5176_v1 = vrot.slane %v5539_v23, %v5175_v2  ;;  %v5197_v61 = vrot.slane %v5542_v40, %v5175_v2 }
 0x460   : > { %v5190_v13 = vrot.slane %v5540_v7, %v5175_v2  ;;  %v5198_v56 = vcombine.low %v5176_v1, %v5183_v48  ;;  %v5199_v6 = vcombine.high %v5176_v1, %v5183_v48 }
 0x462   : > { %v5200_v15 = vcombine.low %v5190_v13, %v5197_v61  ;;  %v5201_v36 = vcombine.high %v5190_v13, %v5197_v61  ;;  %5543 = vst.sshfl [vmem:[%s259_s14] sm:$0xff pattern:$0x75316420] %v5198_v56  ;;  %5544 = vst.sshfl [vmem:[%s259_s14 + $0x8] sm:$0xff pattern:$0x75316420] %v5199_v6 }
 0x464   : > { %5545 = vst.sshfl [vmem:[%s259_s14 + $0x10] sm:$0xff pattern:$0x75316420] %v5200_v15  ;;  %5546 = vst.sshfl [vmem:[%s259_s14 + $0x18] sm:$0xff pattern:$0x75316420] %v5201_v36 }
 0x465   : > { %6030 = shalt.err (!%p6027_p9)
}
 0x466   : > { %s6031_s11 = scalar_lea.hbm %s8883_s13, 512  ;;  %s6035_s29 = scalar_lea.hbm %s8924_s4, 1024 }
 0x467   : > { %p6032_p1 = scmp.ne.s32.totalorder %s8883_s13, %s6031_s11  ;;  %p6036_p11 = scmp.lt.s32.totalorder %s8883_s13, %s8924_s4 }
 0x468   : > { %p6037_p13 = scmp.lt.s32.totalorder %s6035_s29, %s6031_s11 }
 0x469   : > { %p6033_p8 = pnand %p6032_p1, %p9732_p6 }
 0x46a   : > { %p6038_p2 = por %p6037_p13, %p6036_p11 }
 0x46b   : > { %p6034_p10 = pneg %p6033_p8 }
 0x46d   : > { %p6039_p4 = pnand %p6038_p2, %p6034_p10 }
 0x46f   : > { %6042 = shalt.err (!%p6039_p4)
}
 0x470   : > { %5768 = dma.vmem_to_hbm [thread:$0]  (%p9732_p6), %s5254_s20, 512, %s8883_s13, %s5239_s19  }
 0x471 PF: > { %s5265_s21 = sand.u32 1, %s6077_s15   ;;  %p9733_p12 = scmp.ne.s32.totalorder %s9114_s22, 0 }
 0x472   : > { %p9734_p0 = scmp.ge.s32.totalorder %s6089_s18, 2  ;;  %s5266_s23 = scalar_lea.sflag [#allocation6], %s5265_s21 }
 0x474   : > { %p5785_p5 = pnand %p9734_p0, %p9733_p12 }
 0x476   : > { %p5786_p3 = pneg %p5785_p5 }
 0x478   : > { %6072 = dma.done.wait (%p5786_p3), %s5266_s23, 512  }
 0x479   : > { %6074 = vsyncadd (%p5786_p3), %s5266_s23, 4294966784  ;;  %p19_p7 = scmp.ge.s32.totalorder %s6210_s27, 4   ;;  %s9735_s15 = smov %s6081_s16 }
 0x47a   : > { %s9736_s16 = smov %s6085_s17  ;;  %s9737_s17 = smov %s6220_s5 }
 0x47b   : > { %s9738_s18 = smov %s6210_s27  ;;  %21 = sbr.rel (!%p19_p7) target bundleno = 7 (0x7), region = 96 }
 0x480   :  { %5271 = vsyncpa [#allocation5], 1 }
 0x481   :  { %5273 = vsyncpa [#allocation5 + $0x1], 1 }
 0x482   :  { %5274 = vsyncpa [#allocation8], 1 }
 0x483   :  { %5275 = vsyncpa [#allocation11], 1 }
 0x484   :  { %5276 = vsyncpa [#allocation6], 1 }
 0x485   :  { %5278 = vsyncpa [#allocation6 + $0x1], 1 }

</bundles_post_ra>
